<compile_context>
chip_gen: v5e
topology: v5e:2x2
jax: 0.10.0
libtpu: 0.0.40
codegen_flags: <defaults>
</compile_context>

<pallas_src>
import functools

import jax
import jax.numpy as jnp
from jax.experimental import pallas as pl
from jax.experimental.pallas import tpu as pltpu


def _bottleneck_kernel(TD, H, x_ref, w1_ref, w2_ref, w3_ref, b_ref, out_ref,
                       pad_ref):
  """conv1x1x1+BN+ReLU -> conv3x3x3+BN+ReLU -> conv1x1x1+BN -> +res -> ReLU."""
  WCp = w1_ref.shape[1]            # W * planes   (conv1 output lanes)
  WC2 = w2_ref.shape[2]            # W * planes   (conv2 output lanes)
  rows_out = TD * H                # interior rows of this D-slab

  b1 = b_ref[:, :WCp]              # (1, W*Cp)
  b2 = b_ref[:, WCp:WCp + WC2]     # (1, W*C2)
  b3 = b_ref[:, WCp + WC2:]        # (1, W*Cout)

  # --- conv1 (1x1x1, BN1 folded) + ReLU over the TD+2 slab planes (halo incl.)
  x_blk = x_ref[0, 0]                                    # ((TD+2)*H, W*Cin) bf16
  h1 = jnp.dot(x_blk, w1_ref[...], preferred_element_type=jnp.float32)
  h1 = jnp.maximum(h1 + b1, 0.0)                         # ((TD+2)*H, W*Cp) f32

  # Stage into the bf16 halo scratch (single cast); zero the H halo columns.
  pad_ref[:, 1:H + 1, :] = h1.reshape(TD + 2, H, WCp).astype(jnp.bfloat16)
  zcol = jnp.zeros((TD + 2, 1, WCp), jnp.bfloat16)
  pad_ref[:, 0:1, :] = zcol
  pad_ref[:, H + 1:H + 2, :] = zcol

  # conv2 zero-pads h1 in D, so slab-halo planes that fall outside the volume
  # must be zeroed (conv1+BN+ReLU of a zero x plane is relu(shift) != 0).
  zplane = jnp.zeros((1, H + 2, WCp), jnp.bfloat16)

  @pl.when(pl.program_id(1) == 0)
  def _():
    pad_ref[0:1, :, :] = zplane

  @pl.when(pl.program_id(1) == pl.num_programs(1) - 1)
  def _():
    pad_ref[TD + 1:TD + 2, :, :] = zplane

  # --- conv2 (3x3x3, stride=1, pad=1, BN2 folded) + ReLU ---------------------
  # 9 accumulated (kd, kh) matmuls on lane-dense bf16 windows; the kw taps and
  # the W zero padding live in the block-banded weight plane w2_ref[idx].
  h2 = jnp.zeros((rows_out, WC2), jnp.float32)
  for idx in range(9):
    kd, kh = idx // 3, idx % 3
    win = pad_ref[kd:kd + TD, kh:kh + H, :].reshape(rows_out, WCp)
    h2 = h2 + jnp.dot(win, w2_ref[idx], preferred_element_type=jnp.float32)
  h2 = jnp.maximum(h2 + b2, 0.0)                         # (TD*H, W*C2) f32

  # --- conv3 (1x1x1, BN3 folded) + residual + ReLU ---------------------------
  o = jnp.dot(h2.astype(jnp.bfloat16), w3_ref[...],
              preferred_element_type=jnp.float32)
  res = x_blk[H:H + rows_out, :].astype(jnp.float32)     # interior slab rows
  o = o + b3 + res                                       # Cout == Cin
  out_ref[0] = jnp.maximum(o, 0.0).astype(out_ref.dtype) # lane-dense store


def bottleneck_pallas(x_ncdhw, p, *, eps=1e-5, slab_rows=256):
  N, Cin, D, H, W = x_ncdhw.shape
  Cp = p['w1'].shape[0]            # planes (conv1 out)
  C2 = p['w2'].shape[0]            # planes (conv2 out)
  Cout = p['w3'].shape[0]          # planes * 4
  assert Cout == Cin, "downsample=None path requires in_planes == planes*4"

  # D-slab size: target ~slab_rows matmul rows per grid step (MXU fill) while
  # keeping TD a divisor of D so the halo handling stays uniform.
  td_cap = max(1, min(D, slab_rows // max(H, 1)))
  TD = max(d for d in range(1, D + 1) if D % d == 0 and d <= td_cap)
  n_slabs = D // TD
  rows_in = (TD + 2) * H

  def fold(g, b, m, v):
    s = g / jnp.sqrt(v + eps)
    return s, b - m * s

  s1, sh1 = fold(p['g1'], p['b1'], p['m1'], p['v1'])
  s2, sh2 = fold(p['g2'], p['b2'], p['m2'], p['v2'])
  s3, sh3 = fold(p['g3'], p['b3'], p['m3'], p['v3'])

  eye_w = jnp.eye(W, dtype=jnp.float32)

  # conv1 / conv3: BN scale folded into output channels, block-diagonal over W.
  w1_mat = (p['w1'][:, :, 0, 0, 0] * s1[:, None]).T                # (Cin, Cp)
  w1_blk = jnp.kron(eye_w, w1_mat).astype(jnp.bfloat16)            # (W*Cin, W*Cp)
  w3_mat = (p['w3'][:, :, 0, 0, 0] * s3[:, None]).T                # (C2, Cout)
  w3_blk = jnp.kron(eye_w, w3_mat).astype(jnp.bfloat16)            # (W*C2, W*Cout)

  # conv2: BN2 scale folded; block-banded along W (implicit zero pad in W), one
  # (W*Cp, W*C2) weight plane per (kd, kh) tap pair.  Vectorized construction.
  w2f = p['w2'] * s2[:, None, None, None, None]                    # (C2,Cp,3,3,3)
  taps = jnp.transpose(w2f, (2, 3, 4, 1, 0))                       # (kd,kh,kw,Cp,C2)
  wpos = jnp.arange(W)
  sel = (wpos[None, :, None] ==
         wpos[None, None, :] + jnp.arange(3)[:, None, None] - 1
         ).astype(jnp.float32)                                     # (kw, w_in, w_out)
  band = jnp.einsum('xio,abxcd->abicod', sel, taps)                # (3,3,W,Cp,W,C2)
  w2_stack = band.reshape(9, W * Cp, W * C2).astype(jnp.bfloat16)

  # The three (tiled-over-W) BN shifts packed into one small f32 row.
  bias_row = jnp.concatenate(
      [jnp.tile(sh1, W), jnp.tile(sh2, W), jnp.tile(sh3, W)]
  ).reshape(1, -1).astype(jnp.float32)

  # Channels-last, lane-dense rows; slabs carry a 1-plane D halo so a plain
  # BlockSpec expresses the overlap (duplicates 2/TD of the volume in HBM).
  x_rows = jnp.transpose(x_ncdhw, (0, 2, 3, 4, 1)).reshape(N, D, H, W * Cin)
  x_padd = jnp.pad(x_rows, ((0, 0), (1, 1), (0, 0), (0, 0)))
  x_slabs = jnp.stack(
      [x_padd[:, j * TD:j * TD + TD + 2] for j in range(n_slabs)], axis=1)
  x_slabs = x_slabs.reshape(N, n_slabs, rows_in, W * Cin).astype(jnp.bfloat16)

  # Actual VMEM footprint (conservatively assume everything double-buffered).
  wt_elems = W * Cin * W * Cp + 9 * W * Cp * W * C2 + W * C2 * W * Cout
  vmem_est = (2 * (2 * rows_in * W * Cin)           # bf16 input block x 2 bufs
              + 2 * (4 * TD * H * W * Cout)         # f32 output block x 2 bufs
              + 2 * (2 * wt_elems)                  # bf16 weights (worst case)
              + 2 * (4 * W * (Cp + C2 + Cout))      # f32 bias row
              + 2 * (TD + 2) * (H + 2) * W * Cp     # bf16 halo scratch
              + (8 << 20))                          # headroom for temporaries
  vmem_limit = int(min(max(vmem_est, 32 << 20), 100 << 20))

  useful_flops = 2 * N * D * H * W * (Cin * Cp + 27 * Cp * C2 + C2 * Cout)
  bytes_acc = int(2 * x_slabs.size + 4 * N * D * H * W * Cout
                  + 2 * wt_elems + 4 * bias_row.size)

  kernel = functools.partial(_bottleneck_kernel, TD, H)
  out_shape = jax.ShapeDtypeStruct((N, D * H, W * Cout), x_ncdhw.dtype)

  def _run(single_buffer_consts):
    def cspec(shape):
      index_map = lambda n, j: (0,) * len(shape)   # constant across the grid
      if single_buffer_consts:
        return pl.BlockSpec(shape, index_map, pipeline_mode=pl.Buffered(1))
      return pl.BlockSpec(shape, index_map)

    return pl.pallas_call(
        kernel,
        out_shape=out_shape,
        grid_spec=pltpu.PrefetchScalarGridSpec(
            num_scalar_prefetch=0,
            grid=(N, n_slabs),
            in_specs=[
                pl.BlockSpec((1, 1, rows_in, W * Cin),
                             lambda n, j: (n, j, 0, 0)),
                cspec((W * Cin, W * Cp)),
                cspec((9, W * Cp, W * C2)),
                cspec((W * C2, W * Cout)),
                cspec((1, W * (Cp + C2 + Cout))),
            ],
            out_specs=pl.BlockSpec((1, TD * H, W * Cout),
                                   lambda n, j: (n, j, 0)),
            scratch_shapes=[pltpu.VMEM((TD + 2, H + 2, W * Cp), jnp.bfloat16)],
        ),
        compiler_params=pltpu.CompilerParams(
            dimension_semantics=("parallel", "parallel"),
            vmem_limit_bytes=vmem_limit),
        cost_estimate=pl.CostEstimate(
            flops=useful_flops, transcendentals=0, bytes_accessed=bytes_acc),
    )(x_slabs, w1_blk, w2_stack, w3_blk, bias_row)

  try:
    out_rows = _run(True)     # single-buffer the constant weights (v7x VMEM)
  except Exception:           # fallback for JAX without BlockSpec pipeline_mode
    out_rows = _run(False)

  return out_rows.reshape(N, D, H, W, Cout).transpose(0, 4, 1, 2, 3)


def init_params(key, in_planes, planes):
  """Deterministic synthetic parameters matching the PyTorch module shapes."""
  expansion = 4
  ks = jax.random.split(key, 15)

  def nrm(k, shape, scale):
    return scale * jax.random.normal(k, shape, jnp.float32)

  p = {
      'w1': nrm(ks[0], (planes, in_planes, 1, 1, 1), 0.1),
      'w2': nrm(ks[1], (planes, planes, 3, 3, 3), 0.1),
      'w3': nrm(ks[2], (planes * expansion, planes, 1, 1, 1), 0.1),
  }
  for i, c in zip((1, 2, 3), (planes, planes, planes * expansion)):
    k0, k1, k2, k3 = jax.random.split(ks[2 + i], 4)
    p[f'g{i}'] = 1.0 + 0.1 * jax.random.normal(k0, (c,), jnp.float32)
    p[f'b{i}'] = 0.1 * jax.random.normal(k1, (c,), jnp.float32)
    p[f'm{i}'] = 0.1 * jax.random.normal(k2, (c,), jnp.float32)
    p[f'v{i}'] = 1.0 + 0.1 * jnp.abs(jax.random.normal(k3, (c,), jnp.float32))
  return p


def bottleneck_ref(x, p):
  """Pure-JAX f32 reference mirroring the PyTorch forward (eval-mode BN)."""
  eps = 1e-5

  def bn(y, g, b, m, v):
    s = g / jnp.sqrt(v + eps)
    return (y * s[None, :, None, None, None]
            + (b - m * s)[None, :, None, None, None])

  y = jnp.einsum('ncdhw,oc->nodhw', x, p['w1'][:, :, 0, 0, 0])
  y = jax.nn.relu(bn(y, p['g1'], p['b1'], p['m1'], p['v1']))

  N, C, D, H, W = y.shape
  yp = jnp.pad(y, ((0, 0), (0, 0), (1, 1), (1, 1), (1, 1)))
  z = jnp.zeros((N, p['w2'].shape[0], D, H, W), jnp.float32)
  for kd in range(3):
    for kh in range(3):
      for kw in range(3):
        z = z + jnp.einsum('ncdhw,oc->nodhw',
                           yp[:, :, kd:kd + D, kh:kh + H, kw:kw + W],
                           p['w2'][:, :, kd, kh, kw])
  z = jax.nn.relu(bn(z, p['g2'], p['b2'], p['m2'], p['v2']))

  o = jnp.einsum('ncdhw,oc->nodhw', z, p['w3'][:, :, 0, 0, 0])
  o = bn(o, p['g3'], p['b3'], p['m3'], p['v3'])
  return jax.nn.relu(o + x)


if __name__ == "__main__":
  key = jax.random.PRNGKey(0)
  kx, kp = jax.random.split(key)

  in_planes, planes = 64, 16        # expansion=4 -> out channels = 64 = in_planes
  N, D, H, W = 2, 8, 8, 8

  x = jax.random.normal(kx, (N, in_planes, D, H, W), jnp.float32)
  params = init_params(kp, in_planes, planes)
  ref = bottleneck_ref(x, params)

  # Tolerance accounts for bf16 MXU operands + bf16 input DMA (f32 accumulation)
  # vs. the f32 reference.
  def check(out, tag):
    assert out.shape == ref.shape == (N, in_planes, D, H, W)
    max_err = float(jnp.max(jnp.abs(out - ref)))
    if not jnp.allclose(out, ref, atol=3e-2, rtol=2e-2):
      raise AssertionError(f"{tag}: Pallas mismatch vs reference, "
                           f"max abs err {max_err}")

  # Multi-slab path: grid=(N, 2), exercises the D-halo handling + pipelining.
  out_multi = jax.block_until_ready(bottleneck_pallas(x, params, slab_rows=32))
  check(out_multi, "multi-slab")

  # Default path: largest slab that fits the row target (max MXU M per step).
  out_single = jax.block_until_ready(bottleneck_pallas(x, params))
  check(out_single, "single-slab")

  print("KERNEL_OK")
</pallas_src>

<mosaic_0001>
module attributes {stable_mosaic.version = 11 : i64} {
  func.func @_bottleneck_kernel(%arg0: i32, %arg1: i32, %arg2: memref<1x1x48x512xbf16, #tpu.memory_space<vmem>>, %arg3: memref<512x128xbf16, #tpu.memory_space<vmem>>, %arg4: memref<9x128x128xbf16, #tpu.memory_space<vmem>>, %arg5: memref<128x512xbf16, #tpu.memory_space<vmem>>, %arg6: memref<1x768xf32, #tpu.memory_space<vmem>>, %arg7: memref<1x32x512xf32, #tpu.memory_space<vmem>>, %arg8: memref<6x10x128xbf16, #tpu.memory_space<vmem>>) attributes {dimension_semantics = [#tpu.dimension_semantics<parallel>, #tpu.dimension_semantics<parallel>], iteration_bounds = array<i64: 2, 2>, scalar_prefetch = 0 : i64, scratch_operands = 1 : i64, tpu.core_type = #tpu.core_type<tc>, window_params = [{transform_indices = @transform_0, window_bounds = array<i64: 1, 1, 48, 512>}, {pipeline_mode = #tpu.pipeline_mode<synchronous>, transform_indices = @transform_1, window_bounds = array<i64: 512, 128>}, {pipeline_mode = #tpu.pipeline_mode<synchronous>, transform_indices = @transform_2, window_bounds = array<i64: 9, 128, 128>}, {pipeline_mode = #tpu.pipeline_mode<synchronous>, transform_indices = @transform_3, window_bounds = array<i64: 128, 512>}, {pipeline_mode = #tpu.pipeline_mode<synchronous>, transform_indices = @transform_4, window_bounds = array<i64: 1, 768>}, {transform_indices = @transform_5, window_bounds = array<i64: 1, 32, 512>}]} {
    %c0 = arith.constant 0 : index
    %c0_0 = arith.constant 0 : index
    %0 = vector.load %arg6[%c0, %c0_0] : memref<1x768xf32, #tpu.memory_space<vmem>>, vector<1x128xf32>
    %c0_1 = arith.constant 0 : index
    %c128 = arith.constant 128 : index
    %1 = vector.load %arg6[%c0_1, %c128] : memref<1x768xf32, #tpu.memory_space<vmem>>, vector<1x128xf32>
    %c0_2 = arith.constant 0 : index
    %c256 = arith.constant 256 : index
    %2 = vector.load %arg6[%c0_2, %c256] : memref<1x768xf32, #tpu.memory_space<vmem>>, vector<1x512xf32>
    %c0_3 = arith.constant 0 : index
    %c0_4 = arith.constant 0 : index
    %c0_5 = arith.constant 0 : index
    %c0_6 = arith.constant 0 : index
    %3 = vector.load %arg2[%c0_3, %c0_4, %c0_5, %c0_6] : memref<1x1x48x512xbf16, #tpu.memory_space<vmem>>, vector<1x1x48x512xbf16>
    %4 = vector.shape_cast %3 : vector<1x1x48x512xbf16> to vector<48x512xbf16>
    %c0_7 = arith.constant 0 : index
    %c0_8 = arith.constant 0 : index
    %5 = vector.load %arg3[%c0_7, %c0_8] : memref<512x128xbf16, #tpu.memory_space<vmem>>, vector<512x128xbf16>
    %cst = arith.constant dense<0.000000e+00> : vector<48x128xf32>
    %6 = tpu.matmul %4, %5, %cst {dimension_numbers = #tpu.dot_dimension_numbers<[1], [0], [0], [1], [0, 0, 1, 1], [], []>} : vector<48x512xbf16>, vector<512x128xbf16>, vector<48x128xf32> -> vector<48x128xf32>
    %7 = vector.broadcast %0 : vector<1x128xf32> to vector<48x128xf32>
    %8 = arith.addf %6, %7 : vector<48x128xf32>
    %cst_9 = arith.constant 0.000000e+00 : f32
    %9 = vector.broadcast %cst_9 : f32 to vector<48x128xf32>
    %10 = arith.maximumf %8, %9 : vector<48x128xf32>
    %11 = vector.shape_cast %10 : vector<48x128xf32> to vector<6x8x128xf32>
    %12 = arith.truncf %11 : vector<6x8x128xf32> to vector<6x8x128xbf16>
    %c0_10 = arith.constant 0 : index
    %c1 = arith.constant 1 : index
    %c0_11 = arith.constant 0 : index
    %13 = vector.load %arg8[%c0_10, %c1, %c0_11] : memref<6x10x128xbf16, #tpu.memory_space<vmem>>, vector<6x8x128xbf16>
    tpu.vector_store %arg8[%c0_10, %c1, %c0_11], %12 {strides = array<i32>} : memref<6x10x128xbf16, #tpu.memory_space<vmem>>, vector<6x8x128xbf16>,
    %cst_12 = arith.constant 0.000000e+00 : bf16
    %14 = vector.broadcast %cst_12 : bf16 to vector<6x1x128xbf16>
    %c0_13 = arith.constant 0 : index
    %c0_14 = arith.constant 0 : index
    %c0_15 = arith.constant 0 : index
    %15 = vector.load %arg8[%c0_13, %c0_14, %c0_15] : memref<6x10x128xbf16, #tpu.memory_space<vmem>>, vector<6x1x128xbf16>
    tpu.vector_store %arg8[%c0_13, %c0_14, %c0_15], %14 {strides = array<i32>} : memref<6x10x128xbf16, #tpu.memory_space<vmem>>, vector<6x1x128xbf16>,
    %c0_16 = arith.constant 0 : index
    %c9 = arith.constant 9 : index
    %c0_17 = arith.constant 0 : index
    %16 = vector.load %arg8[%c0_16, %c9, %c0_17] : memref<6x10x128xbf16, #tpu.memory_space<vmem>>, vector<6x1x128xbf16>
    tpu.vector_store %arg8[%c0_16, %c9, %c0_17], %14 {strides = array<i32>} : memref<6x10x128xbf16, #tpu.memory_space<vmem>>, vector<6x1x128xbf16>,
    %cst_18 = arith.constant 0.000000e+00 : bf16
    %17 = vector.broadcast %cst_18 : bf16 to vector<1x10x128xbf16>
    %c0_i32 = arith.constant 0 : i32
    %18 = arith.cmpi eq, %arg1, %c0_i32 : i32
    %19 = arith.extui %18 : i1 to i32
    %c0_i32_19 = arith.constant 0 : i32
    %20 = arith.cmpi ne, %19, %c0_i32_19 : i32
    scf.if %20 {
      %c0_86 = arith.constant 0 : index
      %c0_87 = arith.constant 0 : index
      %c0_88 = arith.constant 0 : index
      %96 = vector.load %arg8[%c0_86, %c0_87, %c0_88] : memref<6x10x128xbf16, #tpu.memory_space<vmem>>, vector<1x10x128xbf16>
      tpu.vector_store %arg8[%c0_86, %c0_87, %c0_88], %17 {strides = array<i32>} : memref<6x10x128xbf16, #tpu.memory_space<vmem>>, vector<1x10x128xbf16>,
    } else {
    }
    %c1_i32 = arith.constant 1 : i32
    %21 = arith.cmpi eq, %arg1, %c1_i32 : i32
    %22 = arith.extui %21 : i1 to i32
    %c0_i32_20 = arith.constant 0 : i32
    %23 = arith.cmpi ne, %22, %c0_i32_20 : i32
    scf.if %23 {
      %c5_86 = arith.constant 5 : index
      %c0_87 = arith.constant 0 : index
      %c0_88 = arith.constant 0 : index
      %96 = vector.load %arg8[%c5_86, %c0_87, %c0_88] : memref<6x10x128xbf16, #tpu.memory_space<vmem>>, vector<1x10x128xbf16>
      tpu.vector_store %arg8[%c5_86, %c0_87, %c0_88], %17 {strides = array<i32>} : memref<6x10x128xbf16, #tpu.memory_space<vmem>>, vector<1x10x128xbf16>,
    } else {
    }
    %cst_21 = arith.constant 0.000000e+00 : f32
    %24 = vector.broadcast %cst_21 : f32 to vector<32x128xf32>
    %c0_22 = arith.constant 0 : index
    %c0_23 = arith.constant 0 : index
    %c0_24 = arith.constant 0 : index
    %25 = vector.load %arg8[%c0_22, %c0_23, %c0_24] : memref<6x10x128xbf16, #tpu.memory_space<vmem>>, vector<4x8x128xbf16>
    %26 = vector.shape_cast %25 : vector<4x8x128xbf16> to vector<32x128xbf16>
    %c0_25 = arith.constant 0 : index
    %c0_26 = arith.constant 0 : index
    %c0_27 = arith.constant 0 : index
    %27 = vector.load %arg4[%c0_25, %c0_26, %c0_27] : memref<9x128x128xbf16, #tpu.memory_space<vmem>>, vector<1x128x128xbf16>
    %28 = vector.shape_cast %27 : vector<1x128x128xbf16> to vector<128x128xbf16>
    %cst_28 = arith.constant dense<0.000000e+00> : vector<32x128xf32>
    %29 = tpu.matmul %26, %28, %cst_28 {dimension_numbers = #tpu.dot_dimension_numbers<[1], [0], [0], [1], [0, 0, 1, 1], [], []>} : vector<32x128xbf16>, vector<128x128xbf16>, vector<32x128xf32> -> vector<32x128xf32>
    %30 = arith.addf %24, %29 : vector<32x128xf32>
    %c0_29 = arith.constant 0 : index
    %c1_30 = arith.constant 1 : index
    %c0_31 = arith.constant 0 : index
    %31 = vector.load %arg8[%c0_29, %c1_30, %c0_31] : memref<6x10x128xbf16, #tpu.memory_space<vmem>>, vector<4x8x128xbf16>
    %32 = vector.shape_cast %31 : vector<4x8x128xbf16> to vector<32x128xbf16>
    %c1_32 = arith.constant 1 : index
    %c0_33 = arith.constant 0 : index
    %c0_34 = arith.constant 0 : index
    %33 = vector.load %arg4[%c1_32, %c0_33, %c0_34] : memref<9x128x128xbf16, #tpu.memory_space<vmem>>, vector<1x128x128xbf16>
    %34 = vector.shape_cast %33 : vector<1x128x128xbf16> to vector<128x128xbf16>
    %cst_35 = arith.constant dense<0.000000e+00> : vector<32x128xf32>
    %35 = tpu.matmul %32, %34, %cst_35 {dimension_numbers = #tpu.dot_dimension_numbers<[1], [0], [0], [1], [0, 0, 1, 1], [], []>} : vector<32x128xbf16>, vector<128x128xbf16>, vector<32x128xf32> -> vector<32x128xf32>
    %36 = arith.addf %30, %35 : vector<32x128xf32>
    %c0_36 = arith.constant 0 : index
    %c2 = arith.constant 2 : index
    %c0_37 = arith.constant 0 : index
    %37 = vector.load %arg8[%c0_36, %c2, %c0_37] : memref<6x10x128xbf16, #tpu.memory_space<vmem>>, vector<4x8x128xbf16>
    %38 = vector.shape_cast %37 : vector<4x8x128xbf16> to vector<32x128xbf16>
    %c2_38 = arith.constant 2 : index
    %c0_39 = arith.constant 0 : index
    %c0_40 = arith.constant 0 : index
    %39 = vector.load %arg4[%c2_38, %c0_39, %c0_40] : memref<9x128x128xbf16, #tpu.memory_space<vmem>>, vector<1x128x128xbf16>
    %40 = vector.shape_cast %39 : vector<1x128x128xbf16> to vector<128x128xbf16>
    %cst_41 = arith.constant dense<0.000000e+00> : vector<32x128xf32>
    %41 = tpu.matmul %38, %40, %cst_41 {dimension_numbers = #tpu.dot_dimension_numbers<[1], [0], [0], [1], [0, 0, 1, 1], [], []>} : vector<32x128xbf16>, vector<128x128xbf16>, vector<32x128xf32> -> vector<32x128xf32>
    %42 = arith.addf %36, %41 : vector<32x128xf32>
    %c1_42 = arith.constant 1 : index
    %c0_43 = arith.constant 0 : index
    %c0_44 = arith.constant 0 : index
    %43 = vector.load %arg8[%c1_42, %c0_43, %c0_44] : memref<6x10x128xbf16, #tpu.memory_space<vmem>>, vector<4x8x128xbf16>
    %44 = vector.shape_cast %43 : vector<4x8x128xbf16> to vector<32x128xbf16>
    %c3 = arith.constant 3 : index
    %c0_45 = arith.constant 0 : index
    %c0_46 = arith.constant 0 : index
    %45 = vector.load %arg4[%c3, %c0_45, %c0_46] : memref<9x128x128xbf16, #tpu.memory_space<vmem>>, vector<1x128x128xbf16>
    %46 = vector.shape_cast %45 : vector<1x128x128xbf16> to vector<128x128xbf16>
    %cst_47 = arith.constant dense<0.000000e+00> : vector<32x128xf32>
    %47 = tpu.matmul %44, %46, %cst_47 {dimension_numbers = #tpu.dot_dimension_numbers<[1], [0], [0], [1], [0, 0, 1, 1], [], []>} : vector<32x128xbf16>, vector<128x128xbf16>, vector<32x128xf32> -> vector<32x128xf32>
    %48 = arith.addf %42, %47 : vector<32x128xf32>
    %c1_48 = arith.constant 1 : index
    %c1_49 = arith.constant 1 : index
    %c0_50 = arith.constant 0 : index
    %49 = vector.load %arg8[%c1_48, %c1_49, %c0_50] : memref<6x10x128xbf16, #tpu.memory_space<vmem>>, vector<4x8x128xbf16>
    %50 = vector.shape_cast %49 : vector<4x8x128xbf16> to vector<32x128xbf16>
    %c4 = arith.constant 4 : index
    %c0_51 = arith.constant 0 : index
    %c0_52 = arith.constant 0 : index
    %51 = vector.load %arg4[%c4, %c0_51, %c0_52] : memref<9x128x128xbf16, #tpu.memory_space<vmem>>, vector<1x128x128xbf16>
    %52 = vector.shape_cast %51 : vector<1x128x128xbf16> to vector<128x128xbf16>
    %cst_53 = arith.constant dense<0.000000e+00> : vector<32x128xf32>
    %53 = tpu.matmul %50, %52, %cst_53 {dimension_numbers = #tpu.dot_dimension_numbers<[1], [0], [0], [1], [0, 0, 1, 1], [], []>} : vector<32x128xbf16>, vector<128x128xbf16>, vector<32x128xf32> -> vector<32x128xf32>
    %54 = arith.addf %48, %53 : vector<32x128xf32>
    %c1_54 = arith.constant 1 : index
    %c2_55 = arith.constant 2 : index
    %c0_56 = arith.constant 0 : index
    %55 = vector.load %arg8[%c1_54, %c2_55, %c0_56] : memref<6x10x128xbf16, #tpu.memory_space<vmem>>, vector<4x8x128xbf16>
    %56 = vector.shape_cast %55 : vector<4x8x128xbf16> to vector<32x128xbf16>
    %c5 = arith.constant 5 : index
    %c0_57 = arith.constant 0 : index
    %c0_58 = arith.constant 0 : index
    %57 = vector.load %arg4[%c5, %c0_57, %c0_58] : memref<9x128x128xbf16, #tpu.memory_space<vmem>>, vector<1x128x128xbf16>
    %58 = vector.shape_cast %57 : vector<1x128x128xbf16> to vector<128x128xbf16>
    %cst_59 = arith.constant dense<0.000000e+00> : vector<32x128xf32>
    %59 = tpu.matmul %56, %58, %cst_59 {dimension_numbers = #tpu.dot_dimension_numbers<[1], [0], [0], [1], [0, 0, 1, 1], [], []>} : vector<32x128xbf16>, vector<128x128xbf16>, vector<32x128xf32> -> vector<32x128xf32>
    %60 = arith.addf %54, %59 : vector<32x128xf32>
    %c2_60 = arith.constant 2 : index
    %c0_61 = arith.constant 0 : index
    %c0_62 = arith.constant 0 : index
    %61 = vector.load %arg8[%c2_60, %c0_61, %c0_62] : memref<6x10x128xbf16, #tpu.memory_space<vmem>>, vector<4x8x128xbf16>
    %62 = vector.shape_cast %61 : vector<4x8x128xbf16> to vector<32x128xbf16>
    %c6 = arith.constant 6 : index
    %c0_63 = arith.constant 0 : index
    %c0_64 = arith.constant 0 : index
    %63 = vector.load %arg4[%c6, %c0_63, %c0_64] : memref<9x128x128xbf16, #tpu.memory_space<vmem>>, vector<1x128x128xbf16>
    %64 = vector.shape_cast %63 : vector<1x128x128xbf16> to vector<128x128xbf16>
    %cst_65 = arith.constant dense<0.000000e+00> : vector<32x128xf32>
    %65 = tpu.matmul %62, %64, %cst_65 {dimension_numbers = #tpu.dot_dimension_numbers<[1], [0], [0], [1], [0, 0, 1, 1], [], []>} : vector<32x128xbf16>, vector<128x128xbf16>, vector<32x128xf32> -> vector<32x128xf32>
    %66 = arith.addf %60, %65 : vector<32x128xf32>
    %c2_66 = arith.constant 2 : index
    %c1_67 = arith.constant 1 : index
    %c0_68 = arith.constant 0 : index
    %67 = vector.load %arg8[%c2_66, %c1_67, %c0_68] : memref<6x10x128xbf16, #tpu.memory_space<vmem>>, vector<4x8x128xbf16>
    %68 = vector.shape_cast %67 : vector<4x8x128xbf16> to vector<32x128xbf16>
    %c7 = arith.constant 7 : index
    %c0_69 = arith.constant 0 : index
    %c0_70 = arith.constant 0 : index
    %69 = vector.load %arg4[%c7, %c0_69, %c0_70] : memref<9x128x128xbf16, #tpu.memory_space<vmem>>, vector<1x128x128xbf16>
    %70 = vector.shape_cast %69 : vector<1x128x128xbf16> to vector<128x128xbf16>
    %cst_71 = arith.constant dense<0.000000e+00> : vector<32x128xf32>
    %71 = tpu.matmul %68, %70, %cst_71 {dimension_numbers = #tpu.dot_dimension_numbers<[1], [0], [0], [1], [0, 0, 1, 1], [], []>} : vector<32x128xbf16>, vector<128x128xbf16>, vector<32x128xf32> -> vector<32x128xf32>
    %72 = arith.addf %66, %71 : vector<32x128xf32>
    %c2_72 = arith.constant 2 : index
    %c2_73 = arith.constant 2 : index
    %c0_74 = arith.constant 0 : index
    %73 = vector.load %arg8[%c2_72, %c2_73, %c0_74] : memref<6x10x128xbf16, #tpu.memory_space<vmem>>, vector<4x8x128xbf16>
    %74 = vector.shape_cast %73 : vector<4x8x128xbf16> to vector<32x128xbf16>
    %c8 = arith.constant 8 : index
    %c0_75 = arith.constant 0 : index
    %c0_76 = arith.constant 0 : index
    %75 = vector.load %arg4[%c8, %c0_75, %c0_76] : memref<9x128x128xbf16, #tpu.memory_space<vmem>>, vector<1x128x128xbf16>
    %76 = vector.shape_cast %75 : vector<1x128x128xbf16> to vector<128x128xbf16>
    %cst_77 = arith.constant dense<0.000000e+00> : vector<32x128xf32>
    %77 = tpu.matmul %74, %76, %cst_77 {dimension_numbers = #tpu.dot_dimension_numbers<[1], [0], [0], [1], [0, 0, 1, 1], [], []>} : vector<32x128xbf16>, vector<128x128xbf16>, vector<32x128xf32> -> vector<32x128xf32>
    %78 = arith.addf %72, %77 : vector<32x128xf32>
    %79 = vector.broadcast %1 : vector<1x128xf32> to vector<32x128xf32>
    %80 = arith.addf %78, %79 : vector<32x128xf32>
    %cst_78 = arith.constant 0.000000e+00 : f32
    %81 = vector.broadcast %cst_78 : f32 to vector<32x128xf32>
    %82 = arith.maximumf %80, %81 : vector<32x128xf32>
    %83 = arith.truncf %82 : vector<32x128xf32> to vector<32x128xbf16>
    %c0_79 = arith.constant 0 : index
    %c0_80 = arith.constant 0 : index
    %84 = vector.load %arg5[%c0_79, %c0_80] : memref<128x512xbf16, #tpu.memory_space<vmem>>, vector<128x512xbf16>
    %cst_81 = arith.constant dense<0.000000e+00> : vector<32x512xf32>
    %85 = tpu.matmul %83, %84, %cst_81 {dimension_numbers = #tpu.dot_dimension_numbers<[1], [0], [0], [1], [0, 0, 1, 1], [], []>} : vector<32x128xbf16>, vector<128x512xbf16>, vector<32x512xf32> -> vector<32x512xf32>
    %86 = vector.extract_strided_slice %4 {offsets = [8, 0], sizes = [32, 512], strides = [1, 1]} : vector<48x512xbf16> to vector<32x512xbf16>
    %87 = arith.extf %86 : vector<32x512xbf16> to vector<32x512xf32>
    %88 = vector.broadcast %2 : vector<1x512xf32> to vector<32x512xf32>
    %89 = arith.addf %85, %88 : vector<32x512xf32>
    %90 = arith.addf %89, %87 : vector<32x512xf32>
    %cst_82 = arith.constant 0.000000e+00 : f32
    %91 = vector.broadcast %cst_82 : f32 to vector<32x512xf32>
    %92 = arith.maximumf %90, %91 : vector<32x512xf32>
    %c0_83 = arith.constant 0 : index
    %c0_84 = arith.constant 0 : index
    %c0_85 = arith.constant 0 : index
    %93 = vector.load %arg7[%c0_83, %c0_84, %c0_85] : memref<1x32x512xf32, #tpu.memory_space<vmem>>, vector<1x32x512xf32>
    %94 = vector.shape_cast %93 : vector<1x32x512xf32> to vector<32x512xf32>
    %95 = vector.shape_cast %92 : vector<32x512xf32> to vector<1x32x512xf32>
    tpu.vector_store %arg7[%c0_83, %c0_84, %c0_85], %95 {strides = array<i32>} : memref<1x32x512xf32, #tpu.memory_space<vmem>>, vector<1x32x512xf32>,
    return
  }
  func.func @transform_0(%arg0: i32, %arg1: i32) -> (i32, i32, i32, i32) {
    %c0_i32 = arith.constant 0 : i32
    %c0_i32_0 = arith.constant 0 : i32
    %c0_i32_1 = arith.constant 0 : i32
    return %arg0, %arg1, %c0_i32, %c0_i32_0 : i32, i32, i32, i32
  }
  func.func @transform_1(%arg0: i32, %arg1: i32) -> (i32, i32) {
    %c0_i32 = arith.constant 0 : i32
    %c0_i32_0 = arith.constant 0 : i32
    %c0_i32_1 = arith.constant 0 : i32
    return %c0_i32, %c0_i32_0 : i32, i32
  }
  func.func @transform_2(%arg0: i32, %arg1: i32) -> (i32, i32, i32) {
    %c0_i32 = arith.constant 0 : i32
    %c0_i32_0 = arith.constant 0 : i32
    %c0_i32_1 = arith.constant 0 : i32
    %c0_i32_2 = arith.constant 0 : i32
    return %c0_i32, %c0_i32_0, %c0_i32_1 : i32, i32, i32
  }
  func.func @transform_3(%arg0: i32, %arg1: i32) -> (i32, i32) {
    %c0_i32 = arith.constant 0 : i32
    %c0_i32_0 = arith.constant 0 : i32
    %c0_i32_1 = arith.constant 0 : i32
    return %c0_i32, %c0_i32_0 : i32, i32
  }
  func.func @transform_4(%arg0: i32, %arg1: i32) -> (i32, i32) {
    %c0_i32 = arith.constant 0 : i32
    %c0_i32_0 = arith.constant 0 : i32
    %c0_i32_1 = arith.constant 0 : i32
    return %c0_i32, %c0_i32_0 : i32, i32
  }
  func.func @transform_5(%arg0: i32, %arg1: i32) -> (i32, i32, i32) {
    %c0_i32 = arith.constant 0 : i32
    %c0_i32_0 = arith.constant 0 : i32
    return %arg0, %arg1, %c0_i32 : i32, i32, i32
  }
}

module attributes {stable_mosaic.version = 11 : i64} {
  func.func @_bottleneck_kernel(%arg0: i32, %arg1: i32, %arg2: memref<1x1x48x512xbf16, #tpu.memory_space<vmem>>, %arg3: memref<512x128xbf16, #tpu.memory_space<vmem>>, %arg4: memref<9x128x128xbf16, #tpu.memory_space<vmem>>, %arg5: memref<128x512xbf16, #tpu.memory_space<vmem>>, %arg6: memref<1x768xf32, #tpu.memory_space<vmem>>, %arg7: memref<1x32x512xf32, #tpu.memory_space<vmem>>, %arg8: memref<6x10x128xbf16, #tpu.memory_space<vmem>>) attributes {dimension_semantics = [#tpu.dimension_semantics<parallel>, #tpu.dimension_semantics<parallel>], iteration_bounds = array<i64: 2, 2>, scalar_prefetch = 0 : i64, scratch_operands = 1 : i64, tpu.core_type = #tpu.core_type<tc>, window_params = [{transform_indices = @transform_0, window_bounds = array<i64: 1, 1, 48, 512>}, {pipeline_mode = #tpu.pipeline_mode<synchronous>, transform_indices = @transform_1, window_bounds = array<i64: 512, 128>}, {pipeline_mode = #tpu.pipeline_mode<synchronous>, transform_indices = @transform_2, window_bounds = array<i64: 9, 128, 128>}, {pipeline_mode = #tpu.pipeline_mode<synchronous>, transform_indices = @transform_3, window_bounds = array<i64: 128, 512>}, {pipeline_mode = #tpu.pipeline_mode<synchronous>, transform_indices = @transform_4, window_bounds = array<i64: 1, 768>}, {transform_indices = @transform_5, window_bounds = array<i64: 1, 32, 512>}]} {
    %c0 = arith.constant 0 : index
    %c0_0 = arith.constant 0 : index
    %0 = vector.load %arg6[%c0, %c0_0] : memref<1x768xf32, #tpu.memory_space<vmem>>, vector<1x128xf32>
    %c0_1 = arith.constant 0 : index
    %c128 = arith.constant 128 : index
    %1 = vector.load %arg6[%c0_1, %c128] : memref<1x768xf32, #tpu.memory_space<vmem>>, vector<1x128xf32>
    %c0_2 = arith.constant 0 : index
    %c256 = arith.constant 256 : index
    %2 = vector.load %arg6[%c0_2, %c256] : memref<1x768xf32, #tpu.memory_space<vmem>>, vector<1x512xf32>
    %c0_3 = arith.constant 0 : index
    %c0_4 = arith.constant 0 : index
    %c0_5 = arith.constant 0 : index
    %c0_6 = arith.constant 0 : index
    %3 = vector.load %arg2[%c0_3, %c0_4, %c0_5, %c0_6] : memref<1x1x48x512xbf16, #tpu.memory_space<vmem>>, vector<1x1x48x512xbf16>
    %4 = vector.shape_cast %3 : vector<1x1x48x512xbf16> to vector<48x512xbf16>
    %c0_7 = arith.constant 0 : index
    %c0_8 = arith.constant 0 : index
    %5 = vector.load %arg3[%c0_7, %c0_8] : memref<512x128xbf16, #tpu.memory_space<vmem>>, vector<512x128xbf16>
    %cst = arith.constant dense<0.000000e+00> : vector<48x128xf32>
    %6 = tpu.matmul %4, %5, %cst {dimension_numbers = #tpu.dot_dimension_numbers<[1], [0], [0], [1], [0, 0, 1, 1], [], []>} : vector<48x512xbf16>, vector<512x128xbf16>, vector<48x128xf32> -> vector<48x128xf32>
    %7 = vector.broadcast %0 : vector<1x128xf32> to vector<48x128xf32>
    %8 = arith.addf %6, %7 : vector<48x128xf32>
    %cst_9 = arith.constant 0.000000e+00 : f32
    %9 = vector.broadcast %cst_9 : f32 to vector<48x128xf32>
    %10 = arith.maximumf %8, %9 : vector<48x128xf32>
    %11 = vector.shape_cast %10 : vector<48x128xf32> to vector<6x8x128xf32>
    %12 = arith.truncf %11 : vector<6x8x128xf32> to vector<6x8x128xbf16>
    %c0_10 = arith.constant 0 : index
    %c1 = arith.constant 1 : index
    %c0_11 = arith.constant 0 : index
    %13 = vector.load %arg8[%c0_10, %c1, %c0_11] : memref<6x10x128xbf16, #tpu.memory_space<vmem>>, vector<6x8x128xbf16>
    tpu.vector_store %arg8[%c0_10, %c1, %c0_11], %12 {strides = array<i32>} : memref<6x10x128xbf16, #tpu.memory_space<vmem>>, vector<6x8x128xbf16>,
    %cst_12 = arith.constant 0.000000e+00 : bf16
    %14 = vector.broadcast %cst_12 : bf16 to vector<6x1x128xbf16>
    %c0_13 = arith.constant 0 : index
    %c0_14 = arith.constant 0 : index
    %c0_15 = arith.constant 0 : index
    %15 = vector.load %arg8[%c0_13, %c0_14, %c0_15] : memref<6x10x128xbf16, #tpu.memory_space<vmem>>, vector<6x1x128xbf16>
    tpu.vector_store %arg8[%c0_13, %c0_14, %c0_15], %14 {strides = array<i32>} : memref<6x10x128xbf16, #tpu.memory_space<vmem>>, vector<6x1x128xbf16>,
    %c0_16 = arith.constant 0 : index
    %c9 = arith.constant 9 : index
    %c0_17 = arith.constant 0 : index
    %16 = vector.load %arg8[%c0_16, %c9, %c0_17] : memref<6x10x128xbf16, #tpu.memory_space<vmem>>, vector<6x1x128xbf16>
    tpu.vector_store %arg8[%c0_16, %c9, %c0_17], %14 {strides = array<i32>} : memref<6x10x128xbf16, #tpu.memory_space<vmem>>, vector<6x1x128xbf16>,
    %cst_18 = arith.constant 0.000000e+00 : bf16
    %17 = vector.broadcast %cst_18 : bf16 to vector<1x10x128xbf16>
    %c0_i32 = arith.constant 0 : i32
    %18 = arith.cmpi eq, %arg1, %c0_i32 : i32
    %19 = arith.extui %18 : i1 to i32
    %c0_i32_19 = arith.constant 0 : i32
    %20 = arith.cmpi ne, %19, %c0_i32_19 : i32
    scf.if %20 {
      %c0_86 = arith.constant 0 : index
      %c0_87 = arith.constant 0 : index
      %c0_88 = arith.constant 0 : index
      %96 = vector.load %arg8[%c0_86, %c0_87, %c0_88] : memref<6x10x128xbf16, #tpu.memory_space<vmem>>, vector<1x10x128xbf16>
      tpu.vector_store %arg8[%c0_86, %c0_87, %c0_88], %17 {strides = array<i32>} : memref<6x10x128xbf16, #tpu.memory_space<vmem>>, vector<1x10x128xbf16>,
    } else {
    }
    %c1_i32 = arith.constant 1 : i32
    %21 = arith.cmpi eq, %arg1, %c1_i32 : i32
    %22 = arith.extui %21 : i1 to i32
    %c0_i32_20 = arith.constant 0 : i32
    %23 = arith.cmpi ne, %22, %c0_i32_20 : i32
    scf.if %23 {
      %c5_86 = arith.constant 5 : index
      %c0_87 = arith.constant 0 : index
      %c0_88 = arith.constant 0 : index
      %96 = vector.load %arg8[%c5_86, %c0_87, %c0_88] : memref<6x10x128xbf16, #tpu.memory_space<vmem>>, vector<1x10x128xbf16>
      tpu.vector_store %arg8[%c5_86, %c0_87, %c0_88], %17 {strides = array<i32>} : memref<6x10x128xbf16, #tpu.memory_space<vmem>>, vector<1x10x128xbf16>,
    } else {
    }
    %cst_21 = arith.constant 0.000000e+00 : f32
    %24 = vector.broadcast %cst_21 : f32 to vector<32x128xf32>
    %c0_22 = arith.constant 0 : index
    %c0_23 = arith.constant 0 : index
    %c0_24 = arith.constant 0 : index
    %25 = vector.load %arg8[%c0_22, %c0_23, %c0_24] : memref<6x10x128xbf16, #tpu.memory_space<vmem>>, vector<4x8x128xbf16>
    %26 = vector.shape_cast %25 : vector<4x8x128xbf16> to vector<32x128xbf16>
    %c0_25 = arith.constant 0 : index
    %c0_26 = arith.constant 0 : index
    %c0_27 = arith.constant 0 : index
    %27 = vector.load %arg4[%c0_25, %c0_26, %c0_27] : memref<9x128x128xbf16, #tpu.memory_space<vmem>>, vector<1x128x128xbf16>
    %28 = vector.shape_cast %27 : vector<1x128x128xbf16> to vector<128x128xbf16>
    %cst_28 = arith.constant dense<0.000000e+00> : vector<32x128xf32>
    %29 = tpu.matmul %26, %28, %cst_28 {dimension_numbers = #tpu.dot_dimension_numbers<[1], [0], [0], [1], [0, 0, 1, 1], [], []>} : vector<32x128xbf16>, vector<128x128xbf16>, vector<32x128xf32> -> vector<32x128xf32>
    %30 = arith.addf %24, %29 : vector<32x128xf32>
    %c0_29 = arith.constant 0 : index
    %c1_30 = arith.constant 1 : index
    %c0_31 = arith.constant 0 : index
    %31 = vector.load %arg8[%c0_29, %c1_30, %c0_31] : memref<6x10x128xbf16, #tpu.memory_space<vmem>>, vector<4x8x128xbf16>
    %32 = vector.shape_cast %31 : vector<4x8x128xbf16> to vector<32x128xbf16>
    %c1_32 = arith.constant 1 : index
    %c0_33 = arith.constant 0 : index
    %c0_34 = arith.constant 0 : index
    %33 = vector.load %arg4[%c1_32, %c0_33, %c0_34] : memref<9x128x128xbf16, #tpu.memory_space<vmem>>, vector<1x128x128xbf16>
    %34 = vector.shape_cast %33 : vector<1x128x128xbf16> to vector<128x128xbf16>
    %cst_35 = arith.constant dense<0.000000e+00> : vector<32x128xf32>
    %35 = tpu.matmul %32, %34, %cst_35 {dimension_numbers = #tpu.dot_dimension_numbers<[1], [0], [0], [1], [0, 0, 1, 1], [], []>} : vector<32x128xbf16>, vector<128x128xbf16>, vector<32x128xf32> -> vector<32x128xf32>
    %36 = arith.addf %30, %35 : vector<32x128xf32>
    %c0_36 = arith.constant 0 : index
    %c2 = arith.constant 2 : index
    %c0_37 = arith.constant 0 : index
    %37 = vector.load %arg8[%c0_36, %c2, %c0_37] : memref<6x10x128xbf16, #tpu.memory_space<vmem>>, vector<4x8x128xbf16>
    %38 = vector.shape_cast %37 : vector<4x8x128xbf16> to vector<32x128xbf16>
    %c2_38 = arith.constant 2 : index
    %c0_39 = arith.constant 0 : index
    %c0_40 = arith.constant 0 : index
    %39 = vector.load %arg4[%c2_38, %c0_39, %c0_40] : memref<9x128x128xbf16, #tpu.memory_space<vmem>>, vector<1x128x128xbf16>
    %40 = vector.shape_cast %39 : vector<1x128x128xbf16> to vector<128x128xbf16>
    %cst_41 = arith.constant dense<0.000000e+00> : vector<32x128xf32>
    %41 = tpu.matmul %38, %40, %cst_41 {dimension_numbers = #tpu.dot_dimension_numbers<[1], [0], [0], [1], [0, 0, 1, 1], [], []>} : vector<32x128xbf16>, vector<128x128xbf16>, vector<32x128xf32> -> vector<32x128xf32>
    %42 = arith.addf %36, %41 : vector<32x128xf32>
    %c1_42 = arith.constant 1 : index
    %c0_43 = arith.constant 0 : index
    %c0_44 = arith.constant 0 : index
    %43 = vector.load %arg8[%c1_42, %c0_43, %c0_44] : memref<6x10x128xbf16, #tpu.memory_space<vmem>>, vector<4x8x128xbf16>
    %44 = vector.shape_cast %43 : vector<4x8x128xbf16> to vector<32x128xbf16>
    %c3 = arith.constant 3 : index
    %c0_45 = arith.constant 0 : index
    %c0_46 = arith.constant 0 : index
    %45 = vector.load %arg4[%c3, %c0_45, %c0_46] : memref<9x128x128xbf16, #tpu.memory_space<vmem>>, vector<1x128x128xbf16>
    %46 = vector.shape_cast %45 : vector<1x128x128xbf16> to vector<128x128xbf16>
    %cst_47 = arith.constant dense<0.000000e+00> : vector<32x128xf32>
    %47 = tpu.matmul %44, %46, %cst_47 {dimension_numbers = #tpu.dot_dimension_numbers<[1], [0], [0], [1], [0, 0, 1, 1], [], []>} : vector<32x128xbf16>, vector<128x128xbf16>, vector<32x128xf32> -> vector<32x128xf32>
    %48 = arith.addf %42, %47 : vector<32x128xf32>
    %c1_48 = arith.constant 1 : index
    %c1_49 = arith.constant 1 : index
    %c0_50 = arith.constant 0 : index
    %49 = vector.load %arg8[%c1_48, %c1_49, %c0_50] : memref<6x10x128xbf16, #tpu.memory_space<vmem>>, vector<4x8x128xbf16>
    %50 = vector.shape_cast %49 : vector<4x8x128xbf16> to vector<32x128xbf16>
    %c4 = arith.constant 4 : index
    %c0_51 = arith.constant 0 : index
    %c0_52 = arith.constant 0 : index
    %51 = vector.load %arg4[%c4, %c0_51, %c0_52] : memref<9x128x128xbf16, #tpu.memory_space<vmem>>, vector<1x128x128xbf16>
    %52 = vector.shape_cast %51 : vector<1x128x128xbf16> to vector<128x128xbf16>
    %cst_53 = arith.constant dense<0.000000e+00> : vector<32x128xf32>
    %53 = tpu.matmul %50, %52, %cst_53 {dimension_numbers = #tpu.dot_dimension_numbers<[1], [0], [0], [1], [0, 0, 1, 1], [], []>} : vector<32x128xbf16>, vector<128x128xbf16>, vector<32x128xf32> -> vector<32x128xf32>
    %54 = arith.addf %48, %53 : vector<32x128xf32>
    %c1_54 = arith.constant 1 : index
    %c2_55 = arith.constant 2 : index
    %c0_56 = arith.constant 0 : index
    %55 = vector.load %arg8[%c1_54, %c2_55, %c0_56] : memref<6x10x128xbf16, #tpu.memory_space<vmem>>, vector<4x8x128xbf16>
    %56 = vector.shape_cast %55 : vector<4x8x128xbf16> to vector<32x128xbf16>
    %c5 = arith.constant 5 : index
    %c0_57 = arith.constant 0 : index
    %c0_58 = arith.constant 0 : index
    %57 = vector.load %arg4[%c5, %c0_57, %c0_58] : memref<9x128x128xbf16, #tpu.memory_space<vmem>>, vector<1x128x128xbf16>
    %58 = vector.shape_cast %57 : vector<1x128x128xbf16> to vector<128x128xbf16>
    %cst_59 = arith.constant dense<0.000000e+00> : vector<32x128xf32>
    %59 = tpu.matmul %56, %58, %cst_59 {dimension_numbers = #tpu.dot_dimension_numbers<[1], [0], [0], [1], [0, 0, 1, 1], [], []>} : vector<32x128xbf16>, vector<128x128xbf16>, vector<32x128xf32> -> vector<32x128xf32>
    %60 = arith.addf %54, %59 : vector<32x128xf32>
    %c2_60 = arith.constant 2 : index
    %c0_61 = arith.constant 0 : index
    %c0_62 = arith.constant 0 : index
    %61 = vector.load %arg8[%c2_60, %c0_61, %c0_62] : memref<6x10x128xbf16, #tpu.memory_space<vmem>>, vector<4x8x128xbf16>
    %62 = vector.shape_cast %61 : vector<4x8x128xbf16> to vector<32x128xbf16>
    %c6 = arith.constant 6 : index
    %c0_63 = arith.constant 0 : index
    %c0_64 = arith.constant 0 : index
    %63 = vector.load %arg4[%c6, %c0_63, %c0_64] : memref<9x128x128xbf16, #tpu.memory_space<vmem>>, vector<1x128x128xbf16>
    %64 = vector.shape_cast %63 : vector<1x128x128xbf16> to vector<128x128xbf16>
    %cst_65 = arith.constant dense<0.000000e+00> : vector<32x128xf32>
    %65 = tpu.matmul %62, %64, %cst_65 {dimension_numbers = #tpu.dot_dimension_numbers<[1], [0], [0], [1], [0, 0, 1, 1], [], []>} : vector<32x128xbf16>, vector<128x128xbf16>, vector<32x128xf32> -> vector<32x128xf32>
    %66 = arith.addf %60, %65 : vector<32x128xf32>
    %c2_66 = arith.constant 2 : index
    %c1_67 = arith.constant 1 : index
    %c0_68 = arith.constant 0 : index
    %67 = vector.load %arg8[%c2_66, %c1_67, %c0_68] : memref<6x10x128xbf16, #tpu.memory_space<vmem>>, vector<4x8x128xbf16>
    %68 = vector.shape_cast %67 : vector<4x8x128xbf16> to vector<32x128xbf16>
    %c7 = arith.constant 7 : index
    %c0_69 = arith.constant 0 : index
    %c0_70 = arith.constant 0 : index
    %69 = vector.load %arg4[%c7, %c0_69, %c0_70] : memref<9x128x128xbf16, #tpu.memory_space<vmem>>, vector<1x128x128xbf16>
    %70 = vector.shape_cast %69 : vector<1x128x128xbf16> to vector<128x128xbf16>
    %cst_71 = arith.constant dense<0.000000e+00> : vector<32x128xf32>
    %71 = tpu.matmul %68, %70, %cst_71 {dimension_numbers = #tpu.dot_dimension_numbers<[1], [0], [0], [1], [0, 0, 1, 1], [], []>} : vector<32x128xbf16>, vector<128x128xbf16>, vector<32x128xf32> -> vector<32x128xf32>
    %72 = arith.addf %66, %71 : vector<32x128xf32>
    %c2_72 = arith.constant 2 : index
    %c2_73 = arith.constant 2 : index
    %c0_74 = arith.constant 0 : index
    %73 = vector.load %arg8[%c2_72, %c2_73, %c0_74] : memref<6x10x128xbf16, #tpu.memory_space<vmem>>, vector<4x8x128xbf16>
    %74 = vector.shape_cast %73 : vector<4x8x128xbf16> to vector<32x128xbf16>
    %c8 = arith.constant 8 : index
    %c0_75 = arith.constant 0 : index
    %c0_76 = arith.constant 0 : index
    %75 = vector.load %arg4[%c8, %c0_75, %c0_76] : memref<9x128x128xbf16, #tpu.memory_space<vmem>>, vector<1x128x128xbf16>
    %76 = vector.shape_cast %75 : vector<1x128x128xbf16> to vector<128x128xbf16>
    %cst_77 = arith.constant dense<0.000000e+00> : vector<32x128xf32>
    %77 = tpu.matmul %74, %76, %cst_77 {dimension_numbers = #tpu.dot_dimension_numbers<[1], [0], [0], [1], [0, 0, 1, 1], [], []>} : vector<32x128xbf16>, vector<128x128xbf16>, vector<32x128xf32> -> vector<32x128xf32>
    %78 = arith.addf %72, %77 : vector<32x128xf32>
    %79 = vector.broadcast %1 : vector<1x128xf32> to vector<32x128xf32>
    %80 = arith.addf %78, %79 : vector<32x128xf32>
    %cst_78 = arith.constant 0.000000e+00 : f32
    %81 = vector.broadcast %cst_78 : f32 to vector<32x128xf32>
    %82 = arith.maximumf %80, %81 : vector<32x128xf32>
    %83 = arith.truncf %82 : vector<32x128xf32> to vector<32x128xbf16>
    %c0_79 = arith.constant 0 : index
    %c0_80 = arith.constant 0 : index
    %84 = vector.load %arg5[%c0_79, %c0_80] : memref<128x512xbf16, #tpu.memory_space<vmem>>, vector<128x512xbf16>
    %cst_81 = arith.constant dense<0.000000e+00> : vector<32x512xf32>
    %85 = tpu.matmul %83, %84, %cst_81 {dimension_numbers = #tpu.dot_dimension_numbers<[1], [0], [0], [1], [0, 0, 1, 1], [], []>} : vector<32x128xbf16>, vector<128x512xbf16>, vector<32x512xf32> -> vector<32x512xf32>
    %86 = vector.extract_strided_slice %4 {offsets = [8, 0], sizes = [32, 512], strides = [1, 1]} : vector<48x512xbf16> to vector<32x512xbf16>
    %87 = arith.extf %86 : vector<32x512xbf16> to vector<32x512xf32>
    %88 = vector.broadcast %2 : vector<1x512xf32> to vector<32x512xf32>
    %89 = arith.addf %85, %88 : vector<32x512xf32>
    %90 = arith.addf %89, %87 : vector<32x512xf32>
    %cst_82 = arith.constant 0.000000e+00 : f32
    %91 = vector.broadcast %cst_82 : f32 to vector<32x512xf32>
    %92 = arith.maximumf %90, %91 : vector<32x512xf32>
    %c0_83 = arith.constant 0 : index
    %c0_84 = arith.constant 0 : index
    %c0_85 = arith.constant 0 : index
    %93 = vector.load %arg7[%c0_83, %c0_84, %c0_85] : memref<1x32x512xf32, #tpu.memory_space<vmem>>, vector<1x32x512xf32>
    %94 = vector.shape_cast %93 : vector<1x32x512xf32> to vector<32x512xf32>
    %95 = vector.shape_cast %92 : vector<32x512xf32> to vector<1x32x512xf32>
    tpu.vector_store %arg7[%c0_83, %c0_84, %c0_85], %95 {strides = array<i32>} : memref<1x32x512xf32, #tpu.memory_space<vmem>>, vector<1x32x512xf32>,
    return
  }
  func.func @transform_0(%arg0: i32, %arg1: i32) -> (i32, i32, i32, i32) {
    %c0_i32 = arith.constant 0 : i32
    %c0_i32_0 = arith.constant 0 : i32
    %c0_i32_1 = arith.constant 0 : i32
    return %arg0, %arg1, %c0_i32, %c0_i32_0 : i32, i32, i32, i32
  }
  func.func @transform_1(%arg0: i32, %arg1: i32) -> (i32, i32) {
    %c0_i32 = arith.constant 0 : i32
    %c0_i32_0 = arith.constant 0 : i32
    %c0_i32_1 = arith.constant 0 : i32
    return %c0_i32, %c0_i32_0 : i32, i32
  }
  func.func @transform_2(%arg0: i32, %arg1: i32) -> (i32, i32, i32) {
    %c0_i32 = arith.constant 0 : i32
    %c0_i32_0 = arith.constant 0 : i32
    %c0_i32_1 = arith.constant 0 : i32
    %c0_i32_2 = arith.constant 0 : i32
    return %c0_i32, %c0_i32_0, %c0_i32_1 : i32, i32, i32
  }
  func.func @transform_3(%arg0: i32, %arg1: i32) -> (i32, i32) {
    %c0_i32 = arith.constant 0 : i32
    %c0_i32_0 = arith.constant 0 : i32
    %c0_i32_1 = arith.constant 0 : i32
    return %c0_i32, %c0_i32_0 : i32, i32
  }
  func.func @transform_4(%arg0: i32, %arg1: i32) -> (i32, i32) {
    %c0_i32 = arith.constant 0 : i32
    %c0_i32_0 = arith.constant 0 : i32
    %c0_i32_1 = arith.constant 0 : i32
    return %c0_i32, %c0_i32_0 : i32, i32
  }
  func.func @transform_5(%arg0: i32, %arg1: i32) -> (i32, i32, i32) {
    %c0_i32 = arith.constant 0 : i32
    %c0_i32_0 = arith.constant 0 : i32
    return %arg0, %arg1, %c0_i32 : i32, i32, i32
  }
}

</mosaic_0001>

<bundles_post_ra>
// kernel: tpu_custom_call.1
= control target key start
LH: loop header
LB: loop body
LE: loop exit
PB: predicated region body
PF: predicated region fallthrough
CT: control target
= control target key end

     0   :  { %s4390_s0 = inlined_call_operand.hbm [shape: bf16[2,2,48,512], index: 0, kind: input, shape index: {}]   ;;  %s4391_s1 = inlined_call_operand.hbm [shape: bf16[512,128], index: 1, kind: input, shape index: {}]   ;;  %s4392_s2 = inlined_call_operand.hbm [shape: bf16[9,128,128], index: 2, kind: input, shape index: {}]   ;;  %s4393_s3 = inlined_call_operand.hbm [shape: bf16[128,512], index: 3, kind: input, shape index: {}]   ;;  %s4394_s4 = inlined_call_operand.hbm [shape: f32[1,768], index: 4, kind: input, shape index: {}]   ;;  %s4395_s5 = inlined_call_operand.hbm [shape: f32[2,64,512], index: 5, kind: output, shape index: {}]  }
   0x1   :  { %4406 = sst [smem:[#allocation23_spill]] %s4391_s1 }
   0x2   :  { %4407 = sst [smem:[#allocation24_spill]] %s4392_s2 }
   0x3   :  { %4408 = sst [smem:[#allocation25_spill]] %s4393_s3 }
   0x4   :  { %4409 = sst [smem:[#allocation26_spill]] %s4394_s4 }
   0x5   :  { %10 = vsyncpa [#allocation4], 0 }
   0x6   :  { %12 = vsyncpa [#allocation4 + $0x1], 0 }
   0x7   :  { %13 = vsyncpa [#allocation7], 0 }
   0x8   :  { %14 = vsyncpa [#allocation10], 0 }
   0x9   :  { %15 = vsyncpa [#allocation5], 0 }
   0xa   :  { %17 = vsyncpa [#allocation5 + $0x1], 0  ;;  %s3830_s18 = smov 0   ;;  %s3832_s19 = smov 0  }
   0xb   :  { %s3834_s20 = smov 0   ;;  %s3836_s21 = smov 0  }
   0xc   :  { %s3838_s22 = smov 0   ;;  %s3840_s23 = smov 0  }
   0xd   :  { %s3842_s24 = smov 0   ;;  %s3844_s25 = smov 0  }
   0xe LB: > { %4410 = sst [smem:[#allocation17_spill]] %s3758_s18  ;;  %s4396_s26 = sadd.s32 4294967295, %s3786_s25   ;;  %s3786_s25 = sphi %s3844_s25, %s23_s25   ;;  %s3782_s24 = sphi %s3842_s24, %s4449_s24   ;;  %s3778_s23 = sphi %s3840_s23, %s4443_s23   ;;  %s3774_s22 = sphi %s3838_s22, %s4448_s22   ;;  %s3770_s21 = sphi %s3836_s21, %s4442_s21   ;;  %s3766_s20 = sphi %s3834_s20, %s4447_s20   ;;  %s3762_s19 = sphi %s3832_s19, %s4446_s19   ;;  %s3758_s18 = sphi %s3830_s18, %s4445_s18  }
   0xf   : > { %4411 = sst [smem:[#allocation18_spill]] %s3778_s23  ;;  %s2584_s27 = sadd.s32 4294967294, %s3786_s25  }
  0x10   : > { %4412 = sst [smem:[#allocation19_spill]] %s3786_s25  ;;  %p57_p0 = scmp.ne.s32.totalorder %s3762_s19, %s3758_s18 }
  0x11   : > { %p3876_p1 = scmp.eq.s32.totalorder %s4396_s26, 0  ;;  %p173_p2 = scmp.eq.s32.totalorder %s2584_s27, 3 }
  0x12   : > { %p2585_p4 = scmp.ge.s32.totalorder %s3786_s25, 1  ;;  %p180_p6 = scmp.lt.s32.totalorder %s3786_s25, 5 }
  0x13   : > { %p3882_p3 = por %p3876_p1, %p57_p0  ;;  %p3887_p5 = por %p173_p2, %p57_p0 }
  0x14   : > { %s4417_s1 = sld [smem:[#allocation23_spill]]  ;;  %p3895_p7 = pnand %p2585_p4, %p180_p6 }
  0x15   : > { %s4415_s30 = scalar_select %p3887_p5, 1, 0 }
  0x16   : > { %p3422_p8 = pneg %p3895_p7  ;;  %s3788_s10 = smov [#allocation6]  }
  0x17   : > { %4416 = sst [smem:[#allocation20_spill]] %s4415_s30  ;;  %s193_s11 = sshll.u32 %s3788_s10, 4  ;;  %s194_s11 = int_to_ptr.vmem [resolvable:$true] %s193_s11 }
  0x18   : > { %p3903_p9 = pnand %p3422_p8, %p3876_p1  ;;  %s4420_s3 = sld [smem:[#allocation25_spill]] }
  0x19   : > { %s3789_s16 = smov 64   ;;  %s3790_s17 = smov 4  }
  0x1a   : > { %s191_s8 = sshll.u32 %s4417_s1, 4  ;;  %s3791_s27 = smov [#allocation9]   ;;  %s192_s8 = int_to_ptr.hbm [resolvable:$true] %s191_s8 }
  0x1b   : > { %3425 = dma.hbm_to_vmem [thread:$0]  (!%p3903_p9), %s192_s8, 4096, %s194_s11, [#allocation7], %s3789_s16, %s3789_s16, %s3790_s17  }
  0x1c   : > { %s221_s6 = sshll.u32 %s3791_s27, 4  ;;  %s4397_s7 = smov 256   ;;  %s222_s6 = int_to_ptr.vmem [resolvable:$true] %s221_s6 }
  0x1d   : > { %s4398_s10 = smov 16   ;;  %s4421_s2 = sld [smem:[#allocation24_spill]] }
  0x1e   : > { %s219_s15 = sshll.u32 %s4420_s3, 4  ;;  %s3794_s8 = smov [#allocation8]   ;;  %s220_s15 = int_to_ptr.hbm [resolvable:$true] %s219_s15 }
  0x1f   : > { %3431 = dma.hbm_to_vmem [thread:$0]  (!%p3903_p9), %s220_s15, 4096, %s222_s6, [#allocation10], %s4397_s7, %s4397_s7, %s4398_s10  }
  0x20   : > { %s207_s11 = sshll.u32 %s3794_s8, 4  ;;  %s4422_s4 = sld [smem:[#allocation26_spill]]  ;;  %s208_s11 = int_to_ptr.vmem [resolvable:$true] %s207_s11 }
  0x21   : > { %s3795_s15 = smov [#allocation11]   ;;  %s4423_s13 = sadd.s32 4294967295, %s3786_s25  }
  0x22   : > { %s236_s6 = sshll.u32 %s3795_s15, 4  ;;  %p167_p10 = scmp.eq.s32.totalorder %s4423_s13, 3  ;;  %s237_s6 = int_to_ptr.vmem [resolvable:$true] %s236_s6 }
  0x23   : > { %s205_s26 = sshll.u32 %s4421_s2, 4  ;;  %s32_s14 = sadd.s32 1, %s3778_s23  ;;  %s206_s26 = int_to_ptr.hbm [resolvable:$true] %s205_s26 }
  0x24   : > { %3428 = dma.hbm_to_vmem [thread:$0]  (!%p3903_p9), %s206_s26, 9216, %s208_s11, [#allocation7], %s3789_s16, %s3789_s16, %s3790_s17  }
  0x25   : > { %p33_p11 = scmp.ge.s32.totalorder %s32_s14, 2  ;;  %s35_s1 = sadd.s32 1, %s3782_s24 }
  0x26   : > { %s234_s3 = sshll.u32 %s4422_s4, 4  ;;  %p51_p12 = scmp.ne.s32.totalorder %s3766_s20, %s3762_s19  ;;  %s235_s3 = int_to_ptr.hbm [resolvable:$true] %s234_s3 }
  0x27   : > { %3434 = dma.hbm_to_vmem [thread:$0]  (!%p3903_p9), %s235_s3, 96, %s237_s6, [#allocation10]  }
  0x28   : > { %p52_p13 = scmp.eq.s32.totalorder %s3786_s25, 0  ;;  %s4451_s14 = smov (%p33_p11, %s32_s14), 0 }
  0x29   : > { %4424 = sst [smem:[#allocation21_spill]] %s4451_s14  ;;  %s4453_s1 = smov (!%p33_p11, %s35_s1), %s3782_s24 }
  0x2a   : > { %s40_s26 = ssub.s32 %s3778_s23, %s4451_s14  ;;  %s44_s16 = sadd.s32 1, %s3766_s20 }
  0x2b   : > { %p37_p0 = scmp.ge.s32.totalorder %s4453_s1, 2  ;;  %p3940_p2 = por %p167_p10, %p51_p12 }
  0x2c   : > { %p53_p4 = por %p52_p13, %p51_p12  ;;  %s247_s12 = sand.u32 1, %s3766_s20  }
  0x2d   : > { %s4455_s1 = smov (%p37_p0, %s4453_s1), 0  ;;  %p3447_p6 = scmp.lt.s32.totalorder %s3786_s25, 4 }
  0x2e   : > { %4426 = sst [smem:[#allocation22_spill]] %s4455_s1  ;;  %s3398_s17 = smul.u32 96, %s247_s12 }
  0x2f   : > { %s39_s8 = ssub.s32 %s3782_s24, %s4455_s1  ;;  %s3399_s11 = smul.u32 24, %s3778_s23 }
  0x30   : > { %s41_s27 = sor.u32 %s40_s26, %s39_s8  ;;  %s3400_s15 = smul.u32 48, %s3782_s24 }
  0x31   : > { %p42_p8 = scmp.eq.s32.totalorder %s41_s27, 0  ;;  %s251_s6 = scalar_lea.vmem [#allocation3], %s3398_s17 }
  0x32   : > { %s261_s13 = sshll.u32 %s251_s6, 4  ;;  %p3436_p9 = pnand %p3447_p6, %p53_p4  ;;  %s262_s13 = int_to_ptr.vmem [resolvable:$true] %s261_s13 }
  0x33   : > { %s3953_s7 = scalar_select %p42_p8, %s3766_s20, %s44_s16  }
  0x34   : > { %s256_s10 = sadd.s32 %s3400_s15, %s3399_s11  ;;  %s248_s25 = scalar_lea.sflag [#allocation4], %s247_s12 }
  0x35   : > { %s2591_s2 = sshll.u32 %s256_s10, 2  ;;  %s4427_s1 = smov 16  }
  0x36   : > { %s258_s30 = scalar_lea.hbm %s4390_s0, %s2591_s2  ;;  %s4428_s23 = smov 256  }
  0x37   : > { %s259_s18 = sshll.u32 %s258_s30, 4  ;;  %273 = sbr.rel (%p3895_p7) target bundleno = 729 (0x2d9), region = 40  ;;  %s260_s18 = int_to_ptr.hbm [resolvable:$true] %s259_s18 }
  0x38   : > { %3438 = dma.hbm_to_vmem [thread:$0]  (!%p3436_p9), %s260_s18, 1536, %s262_s13, %s248_s25, %s4428_s23, %s4428_s23, %s4427_s1  }
  0x39   : > { %s3964_s26 = sand.u32 (!%p3895_p7), 1, %s3762_s19  }
  0x3a   : > { %s3401_s10 = smul.u32 (!%p3895_p7), 96, %s3964_s26  ;;  %s276_s4 = scalar_lea.sflag (!%p3895_p7), [#allocation4], %s3964_s26 }
  0x3c   : > { %s3968_s2 = scalar_lea.vmem [#allocation3], %s3401_s10 }
  0x3d   : > { %3741 = dma.done.wait (%p3882_p3), %s276_s4, 1536  }
  0x3e   : > { %3743 = vsyncadd (%p3882_p3), %s276_s4, 4294965760 }
  0x3f   : > { %3745 = dma.done.wait (%p3876_p1), [#allocation7], 13312  }
  0x40   : > { %3747 = vsyncadd (%p3876_p1), [#allocation7], 4294953984 }
  0x41   : > { %3749 = dma.done.wait (%p3876_p1), [#allocation10], 4192  }
  0x42   : > { %3751 = vsyncadd (%p3876_p1), [#allocation10], 4294963104  ;;  %s2597_s18 = sshll.u32 %s3964_s26, 7  ;;  %v3983_v0 = vld [vmem:[#allocation11 + $0x1] sm:$0x1]  ;;  %v3988_v2 = vld [vmem:[%s3968_s2 + $0x10] sm:$0xff] }
  0x43   : > { %v3985_v1 = vld [vmem:[#allocation11 + $0x2] sm:$0xf]  ;;  %v3991_v3 = vld [vmem:[%s3968_s2 + $0x18] sm:$0xff]  ;;  %v3997_v5 = vld [vmem:[%s3968_s2 + $0x28] sm:$0xff]  ;;  %vm831_vm0 = vcmask 1043456   ;;  %vm837_vm2 = vcmask 1040384  }
  0x44   : > { %v3994_v4 = vld [vmem:[%s3968_s2 + $0x20] sm:$0xff]  ;;  %v4000_v6 = vld [vmem:[%s3968_s2 + $0x30] sm:$0xff]  ;;  %v4003_v7 = vld [vmem:[%s3968_s2 + $0x38] sm:$0xff]  ;;  %vm832_vm1 = vsmask.f32 7938  ;;  %s4109_s23 = scalar_lea.vmem [#allocation12], %s2597_s18 }
  0x45   : > { %v4006_v8 = vld [vmem:[%s3968_s2 + $0x40] sm:$0xff]  ;;  %v4009_v9 = vld [vmem:[%s3968_s2 + $0x48] sm:$0xff]  ;;  %v3254_v10 = vld [vmem:[#allocation6 + $0x38] sm:$0xff]  ;;  %vm838_vm3 = vsmask.f32 256  ;;  %p2774_p1 = scmp.ne.s32.totalorder %s3770_s21, 0 }
  0x46   : > { %v3262_v11 = vld [vmem:[#allocation6 + $0x78] sm:$0xff]  ;;  %663 = vmatpush.bf16.msra.mxu0 %v3254_v10  ;;  %v3253_v14 = vld [vmem:[#allocation6 + $0x30] sm:$0xff]  ;;  %v3252_v18 = vld [vmem:[#allocation6 + $0x28] sm:$0xff] }
  0x47   : > { %v3270_v12 = vld [vmem:[#allocation6 + $0xb8] sm:$0xff]  ;;  %687 = vmatpush.bf16.msra.mxu1 %v3262_v11  ;;  %v3261_v15 = vld [vmem:[#allocation6 + $0x70] sm:$0xff]  ;;  %v3260_v19 = vld [vmem:[#allocation6 + $0x68] sm:$0xff] }
  0x48   : > { %v3278_v13 = vld [vmem:[#allocation6 + $0xf8] sm:$0xff]  ;;  %711 = vmatpush.bf16.msra.mxu2 %v3270_v12  ;;  %v3269_v16 = vld [vmem:[#allocation6 + $0xb0] sm:$0xff]  ;;  %v3268_v20 = vld [vmem:[#allocation6 + $0xa8] sm:$0xff] }
  0x49   : > { %735 = vmatpush.bf16.msra.mxu3 %v3278_v13  ;;  %v3277_v17 = vld [vmem:[#allocation6 + $0xf0] sm:$0xff]  ;;  %v3276_v21 = vld [vmem:[#allocation6 + $0xe8] sm:$0xff]  ;;  %v3251_v22 = vld [vmem:[#allocation6 + $0x20] sm:$0xff] }
  0x4a   : > { %664 = vmatpush.bf16.msra.mxu0 %v3253_v14  ;;  %v3259_v23 = vld [vmem:[#allocation6 + $0x60] sm:$0xff]  ;;  %v3250_v26 = vld [vmem:[#allocation6 + $0x18] sm:$0xff]  ;;  %v3249_v30 = vld [vmem:[#allocation6 + $0x10] sm:$0xff] }
  0x4b   : > { %688 = vmatpush.bf16.msra.mxu1 %v3261_v15  ;;  %v3267_v24 = vld [vmem:[#allocation6 + $0xa0] sm:$0xff]  ;;  %v3258_v27 = vld [vmem:[#allocation6 + $0x58] sm:$0xff]  ;;  %v3257_v31 = vld [vmem:[#allocation6 + $0x50] sm:$0xff] }
  0x4c   : > { %712 = vmatpush.bf16.msra.mxu2 %v3269_v16  ;;  %v3275_v25 = vld [vmem:[#allocation6 + $0xe0] sm:$0xff]  ;;  %v3266_v28 = vld [vmem:[#allocation6 + $0x98] sm:$0xff]  ;;  %v3265_v32 = vld [vmem:[#allocation6 + $0x90] sm:$0xff] }
  0x4d   : > { %736 = vmatpush.bf16.msra.mxu3 %v3277_v17  ;;  %v3274_v29 = vld [vmem:[#allocation6 + $0xd8] sm:$0xff]  ;;  %v3273_v33 = vld [vmem:[#allocation6 + $0xd0] sm:$0xff]  ;;  %v3248_v34 = vld [vmem:[#allocation6 + $0x8] sm:$0xff] }
  0x4e   : > { %665 = vmatpush.bf16.msra.mxu0 %v3252_v18  ;;  %v3256_v35 = vld [vmem:[#allocation6 + $0x48] sm:$0xff]  ;;  %v3247_v38 = vld [vmem:[#allocation6] sm:$0xff]  ;;  %v3237_v43 = vld [vmem:[%s3968_s2 + $0xc] sm:$0xf0] }
  0x4f   : > { %689 = vmatpush.bf16.msra.mxu1 %v3260_v19  ;;  %v3264_v36 = vld [vmem:[#allocation6 + $0x88] sm:$0xff]  ;;  %v3255_v39 = vld [vmem:[#allocation6 + $0x40] sm:$0xff]  ;;  %v2602_v45 = vld [vmem:[%s3968_s2 + $0x10] sm:$0xf0] }
  0x50   : > { %713 = vmatpush.bf16.msra.mxu2 %v3268_v20  ;;  %v3272_v37 = vld [vmem:[#allocation6 + $0xc8] sm:$0xff]  ;;  %v3263_v40 = vld [vmem:[#allocation6 + $0x80] sm:$0xff]  ;;  %v3238_v47 = vld [vmem:[%s3968_s2 + $0x14] sm:$0xf0] }
  0x51   : > { %737 = vmatpush.bf16.msra.mxu3 %v3276_v21  ;;  %v3271_v41 = vld [vmem:[#allocation6 + $0xc0] sm:$0xff]  ;;  %v2608_v46 = vld [vmem:[%s3968_s2 + $0x8] sm:$0xf]  ;;  %v3236_v48 = vld [vmem:[%s3968_s2 + $0xc] sm:$0xf] }
  0x52   : > { %666 = vmatpush.bf16.msra.mxu0 %v3251_v22  ;;  %v2600_v42 = vld [vmem:[%s3968_s2] sm:$0xf]  ;;  %v3235_v44 = vld [vmem:[%s3968_s2 + $0x4] sm:$0xf]  ;;  %v2610_v49 = vld [vmem:[%s3968_s2 + $0x18] sm:$0xf0]  ;;  %v2609_v52 = vor.u32 %v3238_v47, %v2608_v46 }
  0x53   : > { %690 = vmatpush.bf16.msra.mxu1 %v3259_v23  ;;  %v2601_v50 = vor.u32 %v3237_v43, %v2600_v42  ;;  %v2605_v51 = vor.u32 %v3235_v44, %v2602_v45  ;;  %v2613_v53 = vor.u32 %v3236_v48, %v2610_v49  ;;  %v2616_v54 = vld [vmem:[%s3968_s2 + $0x20] sm:$0xf]  ;;  %v3241_v55 = vld [vmem:[%s3968_s2 + $0x2c] sm:$0xf0]  ;;  %v3239_v56 = vld [vmem:[%s3968_s2 + $0x24] sm:$0xf] }
  0x54   : > { %714 = vmatpush.bf16.msra.mxu2 %v3267_v24  ;;  %v2618_v57 = vld [vmem:[%s3968_s2 + $0x30] sm:$0xf0]  ;;  %v2624_v58 = vld [vmem:[%s3968_s2 + $0x28] sm:$0xf]  ;;  %v3242_v59 = vld [vmem:[%s3968_s2 + $0x34] sm:$0xf0]  ;;  %v2617_v62 = vor.u32 %v3241_v55, %v2616_v54 }
  0x55   : > { %738 = vmatpush.bf16.msra.mxu3 %v3275_v25  ;;  %v3240_v60 = vld [vmem:[%s3968_s2 + $0x2c] sm:$0xf]  ;;  %v2626_v61 = vld [vmem:[%s3968_s2 + $0x38] sm:$0xf0]  ;;  %v2621_v63 = vor.u32 %v3239_v56, %v2618_v57  ;;  %v2625_v10 = vor.u32 %v3242_v59, %v2624_v58  ;;  %v2632_v12 = vld [vmem:[%s3968_s2 + $0x40] sm:$0xf] }
  0x56   : > { %667 = vmatpush.bf16.msra.mxu0 %v3250_v26  ;;  %v2629_v11 = vor.u32 %v3240_v60, %v2626_v61  ;;  %v3245_v13 = vld [vmem:[%s3968_s2 + $0x4c] sm:$0xf0]  ;;  %v3243_v14 = vld [vmem:[%s3968_s2 + $0x44] sm:$0xf]  ;;  %v2634_v15 = vld [vmem:[%s3968_s2 + $0x50] sm:$0xf0] }
  0x57   : > { %691 = vmatpush.bf16.msra.mxu1 %v3258_v27  ;;  %v2640_v16 = vld [vmem:[%s3968_s2 + $0x48] sm:$0xf]  ;;  %v3246_v17 = vld [vmem:[%s3968_s2 + $0x54] sm:$0xf0]  ;;  %v3244_v18 = vld [vmem:[%s3968_s2 + $0x4c] sm:$0xf]  ;;  %v2633_v20 = vor.u32 %v3245_v13, %v2632_v12  ;;  %v2637_v21 = vor.u32 %v3243_v14, %v2634_v15 }
  0x58   : > { %715 = vmatpush.bf16.msra.mxu2 %v3266_v28  ;;  %v2642_v19 = vld [vmem:[%s3968_s2 + $0x58] sm:$0xf0]  ;;  %v2641_v22 = vor.u32 %v3246_v17, %v2640_v16  ;;  %v4035_v24 = vld [vmem:[#allocation11] ss:$0 sm:$0xff]  ;;  %vm4041_vm4 = vmand %vm831_vm0, %vm832_vm1 }
  0x59   : > { %739 = vmatpush.bf16.msra.mxu3 %v3274_v29  ;;  %v2645_v23 = vor.u32 %v3244_v18, %v2642_v19  ;;  %vm4046_vm5 = vmand %vm837_vm2, %vm838_vm3  ;;  %v843_v16 = vld [vmem:[#allocation2 + $0x8] sm:$0xf]  ;;  %v846_v19 = vld [vmem:[#allocation2 + $0xc] sm:$0x1] }
  0x5a   : > { %668 = vmatpush.bf16.msra.mxu0 %v3249_v30  ;;  %vm4057_vm6 = vmand %vm837_vm2, %vm832_vm1 }
  0x5b   : > { %692 = vmatpush.bf16.msra.mxu1 %v3257_v31 }
  0x5c   : > { %716 = vmatpush.bf16.msra.mxu2 %v3265_v32 }
  0x5d   : > { %740 = vmatpush.bf16.msra.mxu3 %v3273_v33 }
  0x5e   : > { %669 = vmatpush.bf16.msra.mxu0 %v3248_v34 }
  0x5f   : > { %693 = vmatpush.bf16.msra.mxu1 %v3256_v35 }
  0x60   : > { %717 = vmatpush.bf16.msra.mxu2 %v3264_v36 }
  0x61   : > { %741 = vmatpush.bf16.msra.mxu3 %v3272_v37 }
  0x62   : > { %670 = vmatpush.bf16.msra.mxu0 %v3247_v38 }
  0x63   : > { %694 = vmatpush.bf16.msra.mxu1 %v3255_v39 }
  0x64   : > { %718 = vmatpush.bf16.msra.mxu2 %v3263_v40 }
  0x65   : > { %742 = vmatpush.bf16.msra.mxu3 %v3271_v41  ;;  %671 = vmatmul.bf16.vlgmr.msra.gmra.mxu0 %v2601_v50  ;;  %v834_v50 = vld [vmem:[#allocation2] sm:$0xf] }
  0x66   : > { %695 = vmatmul.bf16.vlgmr.msra.gmra.mxu1 %v2605_v51 }
  0x67   : > { %719 = vmatmul.bf16.vlgmr.msra.gmra.mxu2 %v2609_v52  ;;  %v840_v52 = vld [vmem:[#allocation2 + $0x4] sm:$0x1] }
  0x68   : > { %743 = vmatmul.bf16.vlgmr.msra.gmra.mxu3 %v2613_v53 }
  0x75   : > { %676 = vmatmul.bf16.gmra.mxu0 %v2617_v62 }
  0x76   : > { %700 = vmatmul.bf16.gmra.mxu1 %v2621_v63 }
  0x77   : > { %724 = vmatmul.bf16.gmra.mxu2 %v2625_v10 }
  0x78   : > { %748 = vmatmul.bf16.gmra.mxu3 %v2629_v11 }
  0x85   : > { %681 = vmatmul.bf16.gmra.mxu0 %v2633_v20 }
  0x86   : > { %705 = vmatmul.bf16.gmra.mxu1 %v2637_v21 }
  0x87   : > { %729 = vmatmul.bf16.gmra.mxu2 %v2641_v22 }
  0x88   : > { %753 = vmatmul.bf16.gmra.mxu3 %v2645_v23 }
  0xe2   : > { %v672_v25 = vpop.f32.mrf.mxu0 }
  0xe3   : > { %v696_v26 = vpop.f32.mrf.mxu1  ;;  %v673_v27 = vadd.f32 %v4035_v24, %v672_v25 }
  0xe5   : > { %v697_v28 = vadd.f32 %v696_v26, %v673_v27 }
  0xea   : > { %v720_v29 = vpop.f32.mrf.mxu2  ;;  %v674_v32 = vpop.f32.mrf.mxu0 }
  0xeb   : > { %v744_v30 = vpop.f32.mrf.mxu3  ;;  %v721_v31 = vadd.f32 %v720_v29, %v697_v28  ;;  %v698_v33 = vpop.f32.mrf.mxu1  ;;  %v675_v35 = vadd.f32 %v4035_v24, %v674_v32 }
  0xed   : > { %v745_v34 = vadd.f32 %v744_v30, %v721_v31  ;;  %v699_v38 = vadd.f32 %v698_v33, %v675_v35 }
  0xef   : > { %v759_v36 = vmax.f32 %v745_v34, 0.0 }
  0xf1   : > { %v765_v37 = vpack.c.bf16 %v759_v36, %v759_v36 }
  0xf2   : > { %v722_v39 = vpop.f32.mrf.mxu2  ;;  %v677_v43 = vpop.f32.mrf.mxu0 }
  0xf3   : > { %v746_v40 = vpop.f32.mrf.mxu3  ;;  %v772_v41 = vshrl.u32 %v765_v37, 16  ;;  %v723_v42 = vadd.f32 %v722_v39, %v699_v38  ;;  %v701_v44 = vpop.f32.mrf.mxu1  ;;  %v678_v45 = vadd.f32 %v4035_v24, %v677_v43  ;;  %v775_v47 = vshll.u32 %v765_v37, 16 }
  0xf5   : > { %v774_v46 = vrot.slane %v772_v41, 7  ;;  %v747_v49 = vadd.f32 %v746_v40, %v723_v42  ;;  %v702_v56 = vadd.f32 %v701_v44, %v678_v45  ;;  %v849_v40 = vld [vmem:[#allocation2 + $0x10] sm:$0xf]  ;;  %v852_v41 = vld [vmem:[#allocation2 + $0x14] sm:$0x1] }
  0xf7   : > { %v777_v53 = vor.u32 %v775_v47, %v774_v46  ;;  %v778_v54 = vrot.slane %v774_v46, 4  ;;  %v760_v55 = vmax.f32 %v747_v49, 0.0 }
  0xf9   : > { %v835_v57 = vsel %vm4041_vm4, %v777_v53, %v834_v50  ;;  %v841_v58 = vsel %vm4046_vm5, %v778_v54, %v840_v52  ;;  %v766_v59 = vpack.c.bf16 %v760_v55, %v760_v55 }
  0xfa   : > { %836 = vst [vmem:[#allocation2] sm:$0xf] %v835_v57  ;;  %v725_v60 = vpop.f32.mrf.mxu2  ;;  %v679_v10 = vpop.f32.mrf.mxu0 }
  0xfb   : > { %v749_v61 = vpop.f32.mrf.mxu3  ;;  %842 = vst [vmem:[#allocation2 + $0x4] sm:$0x1] %v841_v58  ;;  %v780_v62 = vshrl.u32 %v766_v59, 16  ;;  %v726_v63 = vadd.f32 %v725_v60, %v702_v56  ;;  %v703_v11 = vpop.f32.mrf.mxu1  ;;  %v783_v13 = vshll.u32 %v766_v59, 16  ;;  %v680_v15 = vadd.f32 %v4035_v24, %v679_v10 }
  0xfd   : > { %v782_v12 = vrot.slane %v780_v62, 7  ;;  %v750_v14 = vadd.f32 %v749_v61, %v726_v63  ;;  %v704_v26 = vadd.f32 %v703_v11, %v680_v15  ;;  %v855_v11 = vld [vmem:[#allocation2 + $0x18] sm:$0xf] }
  0xff   : > { %v785_v17 = vor.u32 %v783_v13, %v782_v12  ;;  %v786_v18 = vrot.slane %v782_v12, 4  ;;  %v761_v20 = vmax.f32 %v750_v14, 0.0  ;;  %v858_v12 = vld [vmem:[#allocation2 + $0x1c] sm:$0x1] }
 0x101   : > { %v873_v22 = vld [vmem:[#allocation2] sm:$0x1]  ;;  %v844_v23 = vsel %vm4041_vm4, %v785_v17, %v843_v16  ;;  %v767_v25 = vpack.c.bf16 %v761_v20, %v761_v20  ;;  %v847_v29 = vsel %vm4046_vm5, %v786_v18, %v846_v19 }
 0x102   : > { %v874_v27 = vsel %vm4046_vm5, 0, %v873_v22  ;;  %v892_v28 = vld [vmem:[#allocation2 + $0x4] sm:$0x1]  ;;  %845 = vst [vmem:[#allocation2 + $0x8] sm:$0xf] %v844_v23  ;;  %v727_v30 = vpop.f32.mrf.mxu2  ;;  %v682_v35 = vpop.f32.mrf.mxu0 }
 0x103   : > { %v751_v31 = vpop.f32.mrf.mxu3  ;;  %875 = vst [vmem:[#allocation2] sm:$0x1] %v874_v27  ;;  %v893_v32 = vsel %vm4057_vm6, 0, %v892_v28  ;;  %v788_v33 = vshrl.u32 %v767_v25, 16  ;;  %v728_v34 = vadd.f32 %v727_v30, %v704_v26  ;;  %v683_v36 = vadd.f32 %v4035_v24, %v682_v35  ;;  %v706_v42 = vpop.f32.mrf.mxu1 }
 0x104   : > { %894 = vst [vmem:[#allocation2 + $0x4] sm:$0x1] %v893_v32  ;;  %v791_v38 = vshll.u32 %v767_v25, 16 }
 0x105   : > { %848 = vst [vmem:[#allocation2 + $0xc] sm:$0x1] %v847_v29  ;;  %v790_v37 = vrot.slane %v788_v33, 7  ;;  %v752_v39 = vadd.f32 %v751_v31, %v728_v34  ;;  %v707_v46 = vadd.f32 %v706_v42, %v683_v36  ;;  %v861_v33 = vld [vmem:[#allocation2 + $0x20] sm:$0xf] }
 0x106   : > { %v864_v34 = vld [vmem:[#allocation2 + $0x24] sm:$0x1] }
 0x107   : > { %v793_v43 = vor.u32 %v791_v38, %v790_v37  ;;  %v794_v44 = vrot.slane %v790_v37, 4  ;;  %v762_v45 = vmax.f32 %v752_v39, 0.0 }
 0x109   : > { %v876_v47 = vld [vmem:[#allocation2 + $0x8] sm:$0x1]  ;;  %v850_v49 = vsel %vm4041_vm4, %v793_v43, %v849_v40  ;;  %v853_v50 = vsel %vm4046_vm5, %v794_v44, %v852_v41  ;;  %v768_v52 = vpack.c.bf16 %v762_v45, %v762_v45 }
 0x10a   : > { %v877_v53 = vsel %vm4046_vm5, 0, %v876_v47  ;;  %851 = vst [vmem:[#allocation2 + $0x10] sm:$0xf] %v850_v49  ;;  %v730_v54 = vpop.f32.mrf.mxu2  ;;  %v684_v58 = vpop.f32.mrf.mxu0  ;;  %v867_v49 = vld [vmem:[#allocation2 + $0x28] sm:$0xf] }
 0x10b   : > { %v754_v55 = vpop.f32.mrf.mxu3  ;;  %878 = vst [vmem:[#allocation2 + $0x8] sm:$0x1] %v877_v53  ;;  %v796_v56 = vshrl.u32 %v768_v52, 16  ;;  %v731_v57 = vadd.f32 %v730_v54, %v707_v46  ;;  %v799_v60 = vshll.u32 %v768_v52, 16  ;;  %v685_v10 = vadd.f32 %v4035_v24, %v684_v58  ;;  %v708_v16 = vpop.f32.mrf.mxu1 }
 0x10c   : > { %v895_v59 = vld [vmem:[#allocation2 + $0xc] sm:$0x1]  ;;  %854 = vst [vmem:[#allocation2 + $0x14] sm:$0x1] %v853_v50 }
 0x10d   : > { %v896_v61 = vsel %vm4057_vm6, 0, %v895_v59  ;;  %v798_v62 = vrot.slane %v796_v56, 7  ;;  %v755_v63 = vadd.f32 %v754_v55, %v731_v57  ;;  %v709_v22 = vadd.f32 %v708_v16, %v685_v10  ;;  %v870_v50 = vld [vmem:[#allocation2 + $0x2c] sm:$0x1] }
 0x10e   : > { %897 = vst [vmem:[#allocation2 + $0xc] sm:$0x1] %v896_v61 }
 0x10f   : > { %v801_v13 = vor.u32 %v799_v60, %v798_v62  ;;  %v802_v14 = vrot.slane %v798_v62, 4  ;;  %v763_v15 = vmax.f32 %v755_v63, 0.0 }
 0x111   : > { %v879_v17 = vld [vmem:[#allocation2 + $0x10] sm:$0x1]  ;;  %v856_v18 = vsel %vm4041_vm4, %v801_v13, %v855_v11  ;;  %v859_v19 = vsel %vm4046_vm5, %v802_v14, %v858_v12  ;;  %v769_v20 = vpack.c.bf16 %v763_v15, %v763_v15 }
 0x112   : > { %v880_v23 = vsel %vm4046_vm5, 0, %v879_v17  ;;  %857 = vst [vmem:[#allocation2 + $0x18] sm:$0xf] %v856_v18  ;;  %v732_v24 = vpop.f32.mrf.mxu2 }
 0x113   : > { %881 = vst [vmem:[#allocation2 + $0x10] sm:$0x1] %v880_v23  ;;  %v898_v25 = vld [vmem:[#allocation2 + $0x14] sm:$0x1]  ;;  %v804_v26 = vshrl.u32 %v769_v20, 16  ;;  %v733_v27 = vadd.f32 %v732_v24, %v709_v22  ;;  %v756_v29 = vpop.f32.mrf.mxu3  ;;  %v807_v31 = vshll.u32 %v769_v20, 16 }
 0x114   : > { %v899_v28 = vsel %vm4057_vm6, 0, %v898_v25  ;;  %860 = vst [vmem:[#allocation2 + $0x1c] sm:$0x1] %v859_v19 }
 0x115   : > { %900 = vst [vmem:[#allocation2 + $0x14] sm:$0x1] %v899_v28  ;;  %v806_v30 = vrot.slane %v804_v26, 7  ;;  %v757_v32 = vadd.f32 %v756_v29, %v733_v27 }
 0x117   : > { %v809_v35 = vor.u32 %v807_v31, %v806_v30  ;;  %v810_v36 = vrot.slane %v806_v30, 4  ;;  %v764_v37 = vmax.f32 %v757_v32, 0.0 }
 0x119   : > { %v882_v38 = vld [vmem:[#allocation2 + $0x18] sm:$0x1]  ;;  %v862_v39 = vsel %vm4041_vm4, %v809_v35, %v861_v33  ;;  %v865_v40 = vsel %vm4046_vm5, %v810_v36, %v864_v34  ;;  %v770_v41 = vpack.c.bf16 %v764_v37, %v764_v37 }
 0x11a   : > { %v883_v42 = vsel %vm4046_vm5, 0, %v882_v38  ;;  %863 = vst [vmem:[#allocation2 + $0x20] sm:$0xf] %v862_v39 }
 0x11b   : > { %884 = vst [vmem:[#allocation2 + $0x18] sm:$0x1] %v883_v42  ;;  %v901_v43 = vld [vmem:[#allocation2 + $0x1c] sm:$0x1]  ;;  %v812_v44 = vshrl.u32 %v770_v41, 16  ;;  %v815_v47 = vshll.u32 %v770_v41, 16 }
 0x11c   : > { %v902_v45 = vsel %vm4057_vm6, 0, %v901_v43  ;;  %866 = vst [vmem:[#allocation2 + $0x24] sm:$0x1] %v865_v40 }
 0x11d   : > { %903 = vst [vmem:[#allocation2 + $0x1c] sm:$0x1] %v902_v45  ;;  %v814_v46 = vrot.slane %v812_v44, 7 }
 0x11f   : > { %v817_v52 = vor.u32 %v815_v47, %v814_v46  ;;  %v818_v53 = vrot.slane %v814_v46, 4 }
 0x121   : > { %v885_v54 = vld [vmem:[#allocation2 + $0x20] sm:$0x1]  ;;  %v868_v55 = vsel %vm4041_vm4, %v817_v52, %v867_v49  ;;  %v871_v56 = vsel %vm4046_vm5, %v818_v53, %v870_v50 }
 0x122   : > { %v886_v57 = vsel %vm4046_vm5, 0, %v885_v54  ;;  %869 = vst [vmem:[#allocation2 + $0x28] sm:$0xf] %v868_v55 }
 0x123   : > { %887 = vst [vmem:[#allocation2 + $0x20] sm:$0x1] %v886_v57  ;;  %v904_v58 = vld [vmem:[#allocation2 + $0x24] sm:$0x1] }
 0x124   : > { %v905_v59 = vsel %vm4057_vm6, 0, %v904_v58  ;;  %872 = vst [vmem:[#allocation2 + $0x2c] sm:$0x1] %v871_v56 }
 0x125   : > { %906 = vst [vmem:[#allocation2 + $0x24] sm:$0x1] %v905_v59 }
 0x129   : > { %v888_v60 = vld [vmem:[#allocation2 + $0x28] sm:$0x1]  ;;  %913 = sbr.rel (%p2774_p1) target bundleno = 305 (0x131), region = 64 }
 0x12a   : > { %v889_v48 = vsel %vm4046_vm5, 0, %v888_v60 }
 0x12b   : > { %890 = vst [vmem:[#allocation2 + $0x28] sm:$0x1] %v889_v48  ;;  %v907_v61 = vld [vmem:[#allocation2 + $0x2c] sm:$0x1] }
 0x12c   : > { %v908_v62 = vsel %vm4057_vm6, 0, %v907_v61 }
 0x12d   : > { %909 = vst [vmem:[#allocation2 + $0x2c] sm:$0x1] %v908_v62 }
 0x12e   : > { %v3796_v63 = vmov 0  }
 0x12f   : > { %914 = vst [vmem:[#allocation2] sm:$0xf] %v3796_v63 }
 0x130   : > { %915 = vst [vmem:[#allocation2 + $0x4] sm:$0x1] %v3796_v63 }
 0x131 PF: > { %p2775_p3 = scmp.ne.s32.totalorder %s3770_s21, 1 }
 0x133   : > { %919 = sbr.rel (%p2775_p3) target bundleno = 315 (0x13b), region = 68 }
 0x138   : > { %v3797_v51 = vmov 0  }
 0x139   : > { %921 = vst [vmem:[#allocation2 + $0x28] sm:$0xf] %v3797_v51 }
 0x13a   : > { %922 = vst [vmem:[#allocation2 + $0x2c] sm:$0x1] %v3797_v51 }
 0x13b PF: > { %v3296_v21 = vld [vmem:[#allocation8 + $0x78] sm:$0xff]  ;;  %v3295_v13 = vld [vmem:[#allocation8 + $0x70] sm:$0xff]  ;;  %v3294_v17 = vld [vmem:[#allocation8 + $0x68] sm:$0xff]  ;;  %vm947_vm7 = vsmask.f32 3328  ;;  %vm1189_vm9 = vcmask 1042432  }
 0x13c   : > { %v3288_v10 = vld [vmem:[#allocation8 + $0x38] sm:$0xff]  ;;  %1079 = vmatpush.bf16.msrb.mxu0 %v3296_v21  ;;  %v3287_v14 = vld [vmem:[#allocation8 + $0x30] sm:$0xff]  ;;  %v3286_v18 = vld [vmem:[#allocation8 + $0x28] sm:$0xff]  ;;  %vm948_vm8 = vsmask.f32 7440  ;;  %vm1190_vm10 = vcmask 1046532  }
 0x13d   : > { %v3304_v11 = vld [vmem:[#allocation8 + $0xb8] sm:$0xff]  ;;  %1158 = vmatpush.bf16.msrb.mxu1 %v3288_v10  ;;  %v3303_v15 = vld [vmem:[#allocation8 + $0xb0] sm:$0xff]  ;;  %v3302_v19 = vld [vmem:[#allocation8 + $0xa8] sm:$0xff]  ;;  %s3389_s25 = sshll.u32 %s3770_s21, 4  ;;  %s3231_s28 = sshll.u32 %s3774_s22, 5 }
 0x13e   : > { %v3314_v12 = vld [vmem:[#allocation8 + $0xf8] sm:$0xff]  ;;  %1281 = vmatpush.bf16.msrb.mxu2 %v3304_v11  ;;  %v3313_v16 = vld [vmem:[#allocation8 + $0xf0] sm:$0xff]  ;;  %v3312_v20 = vld [vmem:[#allocation8 + $0xe8] sm:$0xff]  ;;  %s2449_s29 = sadd.s32 %s3389_s25, %s3231_s28  ;;  %s2452_s14 = sshll.u32 %s4109_s23, 4  ;;  %s2453_s14 = int_to_ptr.vmem [resolvable:$true] %s2452_s14 }
 0x13f   : > { %1386 = vmatpush.bf16.msrb.mxu3 %v3314_v12  ;;  %v3293_v22 = vld [vmem:[#allocation8 + $0x60] sm:$0xff]  ;;  %v923_v26 = vld [vmem:[#allocation2] sm:$0xf]  ;;  %v924_v27 = vld [vmem:[#allocation2 + $0x8] sm:$0xf]  ;;  %s3232_s21 = sshll.u32 %s2449_s29, 3 }
 0x140   : > { %1080 = vmatpush.bf16.msrb.mxu0 %v3295_v13  ;;  %v3285_v23 = vld [vmem:[#allocation8 + $0x20] sm:$0xff]  ;;  %v943_v28 = vld [vmem:[#allocation2 + $0x4] sm:$0x1]  ;;  %v944_v29 = vld [vmem:[#allocation2 + $0xc] sm:$0x1]  ;;  %v951_v30 = vshrl.u32 %v923_v26, 16  ;;  %s2451_s9 = scalar_lea.hbm %s4395_s5, %s3232_s21 }
 0x141   : > { %1159 = vmatpush.bf16.msrb.mxu1 %v3287_v14  ;;  %v3301_v24 = vld [vmem:[#allocation8 + $0xa0] sm:$0xff]  ;;  %v954_v31 = vshll.u32 %v923_v26, 16  ;;  %v965_v32 = vshrl.u32 %v924_v27, 16  ;;  %v960_v33 = vshll.u32 %v943_v28, 16  ;;  %v968_v34 = vshll.u32 %v924_v27, 16  ;;  %v3292_v35 = vld [vmem:[#allocation8 + $0x58] sm:$0xff]  ;;  %vm4115_vm11 = vmor %vm947_vm7, %vm948_vm8 }
 0x142   : > { %1282 = vmatpush.bf16.msrb.mxu2 %v3303_v15  ;;  %v3311_v25 = vld [vmem:[#allocation8 + $0xe0] sm:$0xff]  ;;  %v3284_v36 = vld [vmem:[#allocation8 + $0x18] sm:$0xff]  ;;  %v953_v37 = vrot.slane %v951_v30, 4  ;;  %v974_v40 = vshll.u32 %v944_v29, 16  ;;  %v1177_v44 = vld [vmem:[#allocation2] sm:$0xe] }
 0x143   : > { %1387 = vmatpush.bf16.msrb.mxu3 %v3313_v16  ;;  %v956_v38 = vrot.slane %v954_v31, 5  ;;  %v967_v39 = vrot.slane %v965_v32, 4  ;;  %v3300_v41 = vld [vmem:[#allocation8 + $0x98] sm:$0xff]  ;;  %v970_v43 = vrot.slane %v968_v34, 5  ;;  %v3291_v49 = vld [vmem:[#allocation8 + $0x50] sm:$0xff]  ;;  %v962_v53 = vrot.slane %v960_v33, 5  ;;  %vm4121_vm12 = vmor %vm1189_vm9, %vm1190_vm10 }
 0x144   : > { %1081 = vmatpush.bf16.msrb.mxu0 %v3294_v17  ;;  %v3310_v42 = vld [vmem:[#allocation8 + $0xd8] sm:$0xff]  ;;  %v3283_v50 = vld [vmem:[#allocation8 + $0x10] sm:$0xff]  ;;  %v976_v54 = vrot.slane %v974_v40, 5  ;;  %v2848_v55 = vrot.slane %v1177_v44, 9  ;;  %v1194_v60 = vrot.slane %v943_v28, 5  ;;  %v1198_v61 = vrot.slane %v944_v29, 5 }
 0x145   : > { %1160 = vmatpush.bf16.msrb.mxu1 %v3286_v18  ;;  %v957_v45 = vor.u32 %v956_v38, %v953_v37  ;;  %v1178_v46 = vld [vmem:[#allocation2 + $0x8] sm:$0xe]  ;;  %v971_v47 = vor.u32 %v970_v43, %v967_v39  ;;  %v3299_v56 = vld [vmem:[#allocation8 + $0x90] sm:$0xff]  ;;  %v925_v63 = vld [vmem:[#allocation2 + $0x10] sm:$0xf]  ;;  %s2454_s1 = sshll.u32 %s2451_s9, 4  ;;  %s2455_s1 = int_to_ptr.hbm [resolvable:$true] %s2454_s1 }
 0x146   : > { %1283 = vmatpush.bf16.msrb.mxu2 %v3302_v19  ;;  %v3309_v57 = vld [vmem:[#allocation8 + $0xd0] sm:$0xff]  ;;  %v2849_v48 = vrot.slane %v1178_v46, 9  ;;  %v926_v51 = vld [vmem:[#allocation2 + $0x18] sm:$0xf]  ;;  %v979_v13 = vshrl.u32 %v925_v63, 16  ;;  %v982_v14 = vshll.u32 %v925_v63, 16  ;;  %v1195_v17 = vsel %vm4121_vm12, %v2848_v55, %v1194_v60 }
 0x147   : > { %1388 = vmatpush.bf16.msrb.mxu3 %v3312_v20  ;;  %v958_v52 = vrot.slane %v957_v45, 4  ;;  %v972_v59 = vrot.slane %v971_v47, 4  ;;  %v3290_v21 = vld [vmem:[#allocation8 + $0x48] sm:$0xff]  ;;  %v993_v19 = vshrl.u32 %v926_v51, 16  ;;  %v996_v20 = vshll.u32 %v926_v51, 16  ;;  %v3297_v32 = vld [vmem:[#allocation8 + $0x80] sm:$0xff] }
 0x148   : > { %1082 = vmatpush.bf16.msrb.mxu0 %v3293_v22  ;;  %v3282_v10 = vld [vmem:[#allocation8 + $0x8] sm:$0xff]  ;;  %v1199_v18 = vsel %vm4121_vm12, %v2849_v48, %v1198_v61  ;;  %v3289_v22 = vld [vmem:[#allocation8 + $0x40] sm:$0xff]  ;;  %v2810_v33 = vld [vmem:[#allocation2] sm:$0xf]  ;;  %s2437_s16 = scalar_lea.sflag [#allocation5], %s3964_s26  ;;  %s3694_s12 = sshra.s32 %s2455_s1, 4  ;;  %s3695_s12 = int_to_ptr.hbm [resolvable:$true] %s3694_s12 }
 0x149   : > { %1161 = vmatpush.bf16.msrb.mxu1 %v3285_v23  ;;  %v963_v11 = vsel %vm4115_vm11, %v958_v52, %v962_v53  ;;  %v977_v12 = vsel %vm4115_vm11, %v972_v59, %v976_v54  ;;  %v3298_v15 = vld [vmem:[#allocation8 + $0x88] sm:$0xff]  ;;  %v3281_v23 = vld [vmem:[#allocation8] sm:$0xff]  ;;  %v995_v30 = vrot.slane %v993_v19, 4  ;;  %v998_v31 = vrot.slane %v996_v20, 5  ;;  %v3279_v34 = vld [vmem:[#allocation2 + $0x4] sm:$0xf0]  ;;  %p3701_p12 = scmp.lt.s32.totalorder %s3695_s12, %s4395_s5 }
 0x14a   : > { %1284 = vmatpush.bf16.msrb.mxu2 %v3301_v24  ;;  %v3308_v16 = vld [vmem:[#allocation8 + $0xc8] sm:$0xff]  ;;  %v981_v24 = vrot.slane %v979_v13, 4  ;;  %v1023_v26 = vunpack.c.l.b16 %v963_v11  ;;  %v1024_v27 = vunpack.c.l.b16 %v977_v12  ;;  %v4133_v28 = vld [vmem:[#allocation2 + $0x14] sm:$0x1]  ;;  %v2886_v38 = vld [vmem:[#allocation2 + $0x8] sm:$0xf]  ;;  %v2811_v47 = vor.u32 %v3279_v34, %v2810_v33 }
 0x14b   : > { %1389 = vmatpush.bf16.msrb.mxu3 %v3311_v25  ;;  %v984_v25 = vrot.slane %v982_v14, 5  ;;  %v4135_v29 = vld [vmem:[#allocation2 + $0x1c] sm:$0x1]  ;;  %v3307_v37 = vld [vmem:[#allocation8 + $0xc0] sm:$0xff]  ;;  %v3322_v40 = vld [vmem:[#allocation8 + $0x138] sm:$0xff]  ;;  %v988_v43 = vshll.u32 %v4133_v28, 16  ;;  %v999_v44 = vor.u32 %v998_v31, %v995_v30 }
 0x14c   : > { %1083 = vmatpush.bf16.msrb.mxu0 %v3292_v35  ;;  %v1225_v35 = vunpack.c.l.b16 %v1195_v17  ;;  %v3305_v39 = vld [vmem:[#allocation2 + $0xc] sm:$0xf0]  ;;  %v1002_v45 = vshll.u32 %v4135_v29, 16  ;;  %v1027_v46 = vpack.c.b16 %v1024_v27, %v1023_v26  ;;  %v3330_v52 = vld [vmem:[#allocation8 + $0x178] sm:$0xff]  ;;  %v3321_v54 = vld [vmem:[#allocation8 + $0x130] sm:$0xff]  ;;  %v1202_v12 = vrot.slane %v4133_v28, 5 }
 0x14d   : > { %1162 = vmatpush.bf16.msrb.mxu1 %v3284_v36  ;;  %v1226_v36 = vunpack.c.l.b16 %v1199_v18  ;;  %v3348_v53 = vld [vmem:[#allocation8 + $0x1f8] sm:$0xff]  ;;  %v3339_v55 = vld [vmem:[#allocation8 + $0x1b0] sm:$0xff]  ;;  %v990_v59 = vrot.slane %v988_v43, 5  ;;  %v1000_v60 = vrot.slane %v999_v44, 4  ;;  %v1180_v61 = vld [vmem:[#allocation2 + $0x18] sm:$0xe] }
 0x14e   : > { %1285 = vmatpush.bf16.msrb.mxu2 %v3300_v41  ;;  %v3340_v41 = vld [vmem:[#allocation8 + $0x1b8] sm:$0xff]  ;;  %v1004_v48 = vrot.slane %v1002_v45, 5  ;;  %v1411_v51 = vld [vmem:[#allocation2 + $0x10] sm:$0xf]  ;;  %v2851_v13 = vrot.slane %v1180_v61, 9  ;;  %v1206_v14 = vrot.slane %v4135_v29, 5 }
 0x14f   : > { %1390 = vmatpush.bf16.msrb.mxu3 %v3310_v42  ;;  %v985_v42 = vor.u32 %v984_v25, %v981_v24  ;;  %v1409_v63 = vld [vmem:[#allocation2 + $0x8] sm:$0xf]  ;;  %v1798_v24 = vld [vmem:[#allocation2 + $0x10] sm:$0xf]  ;;  %v3328_v25 = vld [vmem:[#allocation8 + $0x168] sm:$0xff]  ;;  %s3696_s17 = scalar_lea.hbm %s3695_s12, 128 }
 0x150   : > { %1084 = vmatpush.bf16.msrb.mxu0 %v3291_v49  ;;  %v1229_v49 = vpack.c.b16 %v1226_v36, %v1225_v35  ;;  %v1005_v18 = vsel %vm4115_vm11, %v1000_v60, %v1004_v48  ;;  %v1418_v19 = vshrl.u32 %v1409_v63, 16  ;;  %v1421_v20 = vshll.u32 %v1409_v63, 16  ;;  %v3346_v26 = vld [vmem:[#allocation8 + $0x1e8] sm:$0xff]  ;;  %v3319_v27 = vld [vmem:[#allocation8 + $0x120] sm:$0xff]  ;;  %p3697_p7 = scmp.ne.s32.totalorder %s3695_s12, %s3696_s17  ;;  %s3700_s27 = scalar_lea.hbm %s4395_s5, 512 }
 0x151   : > { %1163 = vmatpush.bf16.msrb.mxu1 %v3283_v50  ;;  %v2887_v50 = vor.u32 %v3305_v39, %v2886_v38  ;;  %v3337_v28 = vld [vmem:[#allocation8 + $0x1a0] sm:$0xff]  ;;  %v1207_v30 = vsel %vm4121_vm12, %v2851_v13, %v1206_v14  ;;  %v1800_v31 = vld [vmem:[#allocation2 + $0x18] sm:$0xf]  ;;  %v1810_v33 = vshll.u32 %v1798_v24, 16  ;;  %v1026_v35 = vunpack.c.l.b16 %v1005_v18  ;;  %v4157_v61 = vld [vmem:[#allocation2 + $0x1c] sm:$0x1]  ;;  %p3702_p13 = scmp.lt.s32.totalorder %s3700_s27, %s3696_s17 }
 0x152   : > { %1286 = vmatpush.bf16.msrb.mxu2 %v3299_v56  ;;  %v1179_v56 = vld [vmem:[#allocation2 + $0x10] sm:$0xe]  ;;  %v4151_v38 = vld [vmem:[#allocation2 + $0x14] sm:$0x1]  ;;  %v1423_v43 = vrot.slane %v1421_v20, 5  ;;  %v3344_v18 = vld [vmem:[#allocation8 + $0x1d8] sm:$0xff]  ;;  %p3698_p10 = pnand %p3697_p7, %p3940_p2 }
 0x153   : > { %1391 = vmatpush.bf16.msrb.mxu3 %v3309_v57  ;;  %v986_v57 = vrot.slane %v985_v42, 4  ;;  %v2850_v11 = vrot.slane %v1179_v56, 9  ;;  %v2814_v36 = vld [vmem:[#allocation2 + $0x10] sm:$0xf]  ;;  %v1420_v42 = vrot.slane %v1418_v19, 4  ;;  %v1812_v60 = vrot.slane %v1810_v33, 5  ;;  %p3703_p0 = por %p3702_p13, %p3701_p12 }
 0x154   : > { %1085 = vmatpush.bf16.msrb.mxu0 %v3290_v21  ;;  %v3329_v21 = vld [vmem:[#allocation8 + $0x170] sm:$0xff]  ;;  %v3327_v39 = vld [vmem:[#allocation8 + $0x160] sm:$0xff]  ;;  %v1569_v13 = vld [vmem:[#allocation2 + $0x8] sm:$0xe]  ;;  %v1587_v33 = vrot.slane %v4151_v38, 5  ;;  %p3699_p11 = pneg %p3698_p10 }
 0x155   : > { %1164 = vmatpush.bf16.msrb.mxu1 %v3282_v10  ;;  %v3347_v10 = vld [vmem:[#allocation8 + $0x1f0] sm:$0xff]  ;;  %v991_v17 = vsel %vm4115_vm11, %v986_v57, %v990_v59  ;;  %v1203_v29 = vsel %vm4121_vm12, %v2850_v11, %v1202_v12  ;;  %v1441_v57 = vshll.u32 %v4151_v38, 16  ;;  %v4155_v48 = vld [vmem:[#allocation2 + $0x14] sm:$0x1]  ;;  %v1424_v11 = vor.u32 %v1423_v43, %v1420_v42 }
 0x156   : > { %1287 = vmatpush.bf16.msrb.mxu2 %v3298_v15  ;;  %v3320_v15 = vld [vmem:[#allocation8 + $0x128] sm:$0xff]  ;;  %v1025_v34 = vunpack.c.l.b16 %v991_v17  ;;  %v3326_v17 = vld [vmem:[#allocation8 + $0x158] sm:$0xff]  ;;  %v1816_v20 = vshll.u32 %v4155_v48, 16  ;;  %v1415_v43 = vld [vmem:[#allocation2 + $0x20] sm:$0xf]  ;;  %v1972_v58 = vrot.slane %v4155_v48, 5  ;;  %p3704_p4 = pnand %p3703_p0, %p3699_p11 }
 0x157   : > { %1392 = vmatpush.bf16.msrb.mxu3 %v3308_v16  ;;  %v3338_v16 = vld [vmem:[#allocation8 + $0x1a8] sm:$0xff]  ;;  %v3385_v62 = vld [vmem:[#allocation9 + $0xe4] sm:$0xf] }
 0x158   : > { %1086 = vmatpush.bf16.msrb.mxu0 %v3289_v22  ;;  %v1432_v22 = vshrl.u32 %v1411_v51, 16 }
 0x159   : > { %1165 = vmatpush.bf16.msrb.mxu1 %v3281_v23  ;;  %v1435_v23 = vshll.u32 %v1411_v51, 16 }
 0x15a   : > { %1288 = vmatpush.bf16.msrb.mxu2 %v3297_v32  ;;  %v1807_v32 = vshrl.u32 %v1798_v24, 16  ;;  %v1434_v44 = vrot.slane %v1432_v22, 4  ;;  %v3317_v24 = vld [vmem:[#allocation8 + $0x110] sm:$0xff] }
 0x15b   : > { %1393 = vmatpush.bf16.msrb.mxu3 %v3307_v37  ;;  %1087 = vmatmul.bf16.vlgmr.msrb.gmra.mxu0 %v1027_v46  ;;  %v4149_v37 = vld [vmem:[#allocation2 + $0xc] sm:$0x1]  ;;  %v1437_v45 = vrot.slane %v1435_v23, 5  ;;  %v1227_v46 = vunpack.c.l.b16 %v1203_v29  ;;  %v1830_v23 = vshll.u32 %v4157_v61, 16 }
 0x15c   : > { %1546 = vmatpush.bf16.msra.mxu0 %v3322_v40  ;;  %1166 = vmatmul.bf16.vlgmr.msrb.gmra.mxu1 %v2811_v47  ;;  %v3345_v40 = vld [vmem:[#allocation8 + $0x1e0] sm:$0xff]  ;;  %v1228_v47 = vunpack.c.l.b16 %v1207_v30  ;;  %v1427_v56 = vshll.u32 %v4149_v37, 16  ;;  %v1809_v59 = vrot.slane %v1807_v32, 4  ;;  %v1583_v29 = vrot.slane %v4149_v37, 5  ;;  %v3316_v37 = vld [vmem:[#allocation8 + $0x108] sm:$0xff] }
 0x15d   : > { %1289 = vmatmul.bf16.vlgmr.msrb.gmra.mxu2 %v1229_v49  ;;  %1670 = vmatpush.bf16.msra.mxu1 %v3330_v52  ;;  %v3318_v49 = vld [vmem:[#allocation8 + $0x118] sm:$0xff]  ;;  %v2890_v52 = vld [vmem:[#allocation2 + $0x18] sm:$0xf]  ;;  %v1438_v12 = vor.u32 %v1437_v45, %v1434_v44  ;;  %v1425_v30 = vrot.slane %v1424_v11, 4  ;;  %v1832_v42 = vrot.slane %v1830_v23, 5 }
 0x15e   : > { %1775 = vmatpush.bf16.msra.mxu2 %v3340_v41  ;;  %1394 = vmatmul.bf16.vlgmr.msrb.gmra.mxu3 %v2887_v50  ;;  %v3280_v41 = vld [vmem:[#allocation2 + $0x14] sm:$0xf0]  ;;  %v3336_v50 = vld [vmem:[#allocation8 + $0x198] sm:$0xff]  ;;  %v1230_v14 = vpack.c.b16 %v1228_v47, %v1227_v46  ;;  %v1813_v19 = vor.u32 %v1812_v60, %v1809_v59 }
 0x15f   : > { %1935 = vmatpush.bf16.msra.mxu3 %v3348_v53  ;;  %v1821_v53 = vshrl.u32 %v1800_v31, 16  ;;  %v3334_v44 = vld [vmem:[#allocation8 + $0x188] sm:$0xff] }
 0x160   : > { %1547 = vmatpush.bf16.msra.mxu0 %v3321_v54  ;;  %v1824_v54 = vshll.u32 %v1800_v31, 16  ;;  %v1439_v31 = vrot.slane %v1438_v12, 4 }
 0x161   : > { %1671 = vmatpush.bf16.msra.mxu1 %v3329_v21  ;;  %v1823_v63 = vrot.slane %v1821_v53, 4  ;;  %v1028_v21 = vpack.c.b16 %v1026_v35, %v1025_v34  ;;  %v3325_v34 = vld [vmem:[#allocation8 + $0x150] sm:$0xff] }
 0x162   : > { %1776 = vmatpush.bf16.msra.mxu2 %v3339_v55  ;;  %v3306_v55 = vld [vmem:[#allocation2 + $0x1c] sm:$0xf0]  ;;  %v1826_v51 = vrot.slane %v1824_v54, 5  ;;  %v1460_v54 = vshrl.u32 %v1415_v43, 16 }
 0x163   : > { %1936 = vmatpush.bf16.msra.mxu3 %v3347_v10  ;;  %v2815_v10 = vor.u32 %v3280_v41, %v2814_v36  ;;  %v3343_v35 = vld [vmem:[#allocation8 + $0x1d0] sm:$0xff]  ;;  %v1413_v36 = vld [vmem:[#allocation2 + $0x18] sm:$0xf] }
 0x164   : > { %1548 = vmatpush.bf16.msra.mxu0 %v3320_v15  ;;  %v2891_v15 = vor.u32 %v3306_v55, %v2890_v52  ;;  %v1827_v22 = vor.u32 %v1826_v51, %v1823_v63  ;;  %v1446_v52 = vshrl.u32 %v1413_v36, 16  ;;  %v1449_v53 = vshll.u32 %v1413_v36, 16  ;;  %v3315_v63 = vld [vmem:[#allocation8 + $0x100] sm:$0xff] }
 0x165   : > { %1672 = vmatpush.bf16.msra.mxu1 %v3328_v25  ;;  %v3335_v25 = vld [vmem:[#allocation8 + $0x190] sm:$0xff]  ;;  %v1463_v55 = vshll.u32 %v1415_v43, 16  ;;  %v3333_v51 = vld [vmem:[#allocation8 + $0x180] sm:$0xff] }
 0x166   : > { %1777 = vmatpush.bf16.msra.mxu2 %v3338_v16  ;;  %v1570_v16 = vld [vmem:[#allocation2 + $0x10] sm:$0xe]  ;;  %v1828_v41 = vrot.slane %v1827_v22, 4  ;;  %v1448_v22 = vrot.slane %v1446_v52, 4  ;;  %v1451_v23 = vrot.slane %v1449_v53, 5 }
 0x167   : > { %1937 = vmatpush.bf16.msra.mxu3 %v3346_v26  ;;  %v1429_v26 = vrot.slane %v1427_v56, 5  ;;  %v2957_v32 = vrot.slane %v1570_v16, 9  ;;  %v3324_v56 = vld [vmem:[#allocation8 + $0x148] sm:$0xff]  ;;  %v2994_v16 = vld [vmem:[#allocation2 + $0x10] sm:$0xf] }
 0x168   : > { %1549 = vmatpush.bf16.msra.mxu0 %v3319_v27  ;;  %v1443_v27 = vrot.slane %v1441_v57, 5  ;;  %v3342_v57 = vld [vmem:[#allocation8 + $0x1c8] sm:$0xff]  ;;  %v1833_v60 = vsel %vm4115_vm11, %v1828_v41, %v1832_v42  ;;  %v4177_v41 = vld [vmem:[#allocation2 + $0x2c] sm:$0x1]  ;;  %v1452_v42 = vor.u32 %v1451_v23, %v1448_v22 }
 0x169   : > { %1673 = vmatpush.bf16.msra.mxu1 %v3327_v39  ;;  %v1814_v39 = vrot.slane %v1813_v19, 4  ;;  %v1430_v45 = vsel %vm4115_vm11, %v1425_v30, %v1429_v26  ;;  %v1588_v47 = vsel %vm4121_vm12, %v2957_v32, %v1587_v33  ;;  %v3341_v26 = vld [vmem:[#allocation8 + $0x1c0] sm:$0xff]  ;;  %v1416_v30 = vld [vmem:[#allocation2 + $0x24] sm:$0x1]  ;;  %v1858_v53 = vshll.u32 %v4177_v41, 16 }
 0x16a   : > { %1778 = vmatpush.bf16.msra.mxu2 %v3337_v28  ;;  %v2956_v28 = vrot.slane %v1569_v13, 9  ;;  %v1444_v38 = vsel %vm4115_vm11, %v1439_v31, %v1443_v27  ;;  %v3323_v13 = vld [vmem:[#allocation8 + $0x140] sm:$0xff]  ;;  %v1615_v19 = vunpack.c.l.b16 %v1588_v47  ;;  %v1572_v47 = vld [vmem:[#allocation2 + $0x20] sm:$0xe] }
 0x16b   : > { %1938 = vmatpush.bf16.msra.mxu3 %v3345_v40  ;;  %1092 = vmatmul.bf16.gmra.mxu0 %v1028_v21  ;;  %v1818_v40 = vrot.slane %v1816_v20, 5  ;;  %v3331_v20 = vld [vmem:[#allocation2 + $0x14] sm:$0xf0] }
 0x16c   : > { %1550 = vmatpush.bf16.msra.mxu0 %v3318_v49  ;;  %1171 = vmatmul.bf16.gmra.mxu1 %v2815_v10  ;;  %v1584_v46 = vsel %vm4121_vm12, %v2956_v28, %v1583_v29  ;;  %v1802_v49 = vld [vmem:[#allocation2 + $0x20] sm:$0xf]  ;;  %v1880_v28 = vunpack.c.l.b16 %v1833_v60  ;;  %v1414_v29 = vld [vmem:[#allocation2 + $0x1c] sm:$0x1]  ;;  %v2995_v36 = vor.u32 %v3331_v20, %v2994_v16  ;;  %v3353_v16 = vld [vmem:[#allocation8 + $0x220] sm:$0xff] }
 0x16d   : > { %1294 = vmatmul.bf16.gmra.mxu2 %v1230_v14  ;;  %1674 = vmatpush.bf16.msra.mxu1 %v3326_v17  ;;  %v1819_v59 = vsel %vm4115_vm11, %v1814_v39, %v1818_v40  ;;  %v1835_v21 = vshrl.u32 %v1802_v49, 16  ;;  %v1838_v10 = vshll.u32 %v1802_v49, 16  ;;  %v1490_v14 = vunpack.c.l.b16 %v1430_v45  ;;  %v3356_v17 = vld [vmem:[#allocation8 + $0x238] sm:$0xff]  ;;  %v4175_v40 = vld [vmem:[#allocation2 + $0x24] sm:$0x1] }
 0x16e   : > { %1779 = vmatpush.bf16.msra.mxu2 %v3336_v50  ;;  %1399 = vmatmul.bf16.gmra.mxu3 %v2891_v15  ;;  %v1804_v50 = vld [vmem:[#allocation2 + $0x28] sm:$0xf]  ;;  %v1491_v15 = vunpack.c.l.b16 %v1444_v38  ;;  %v1879_v27 = vunpack.c.l.b16 %v1819_v59  ;;  %v1455_v43 = vshll.u32 %v1414_v29, 16  ;;  %v3355_v38 = vld [vmem:[#allocation8 + $0x230] sm:$0xff]  ;;  %v3354_v59 = vld [vmem:[#allocation8 + $0x228] sm:$0xff] }
 0x16f   : > { %1939 = vmatpush.bf16.msra.mxu3 %v3344_v18  ;;  %v1849_v11 = vshrl.u32 %v1804_v50, 16  ;;  %v1852_v12 = vshll.u32 %v1804_v50, 16  ;;  %v1614_v18 = vunpack.c.l.b16 %v1584_v46  ;;  %v1837_v31 = vrot.slane %v1835_v21, 4  ;;  %v1571_v46 = vld [vmem:[#allocation2 + $0x18] sm:$0xe] }
 0x170   : > { %1551 = vmatpush.bf16.msra.mxu0 %v3317_v24  ;;  %v1462_v24 = vrot.slane %v1460_v54, 4  ;;  %v1840_v32 = vrot.slane %v1838_v10, 5  ;;  %v1883_v45 = vpack.c.b16 %v1880_v28, %v1879_v27  ;;  %v1844_v50 = vshll.u32 %v4175_v40, 16  ;;  %v3332_v27 = vld [vmem:[#allocation2 + $0x24] sm:$0xf0] }
 0x171   : > { %1675 = vmatpush.bf16.msra.mxu1 %v3325_v34  ;;  %v1851_v33 = vrot.slane %v1849_v11, 4  ;;  %v1854_v34 = vrot.slane %v1852_v12, 5  ;;  %v1618_v39 = vpack.c.b16 %v1615_v19, %v1614_v18  ;;  %v1453_v54 = vrot.slane %v1452_v42, 4  ;;  %v3352_v28 = vld [vmem:[#allocation8 + $0x218] sm:$0xff] }
 0x172   : > { %1780 = vmatpush.bf16.msra.mxu2 %v3335_v25  ;;  %v1465_v25 = vrot.slane %v1463_v55, 5  ;;  %v1841_v49 = vor.u32 %v1840_v32, %v1837_v31  ;;  %v1457_v55 = vrot.slane %v1455_v43, 5  ;;  %v2958_v60 = vrot.slane %v1571_v46, 9  ;;  %v3349_v46 = vld [vmem:[#allocation8 + $0x200] sm:$0xff] }
 0x173   : > { %1940 = vmatpush.bf16.msra.mxu3 %v3343_v35  ;;  %v1494_v35 = vpack.c.b16 %v1491_v15, %v1490_v14  ;;  %v1855_v52 = vor.u32 %v1854_v34, %v1851_v33  ;;  %v1595_v21 = vrot.slane %v1416_v30, 5  ;;  %v1846_v11 = vrot.slane %v1844_v50, 5  ;;  %v1961_v50 = vld [vmem:[#allocation2 + $0x28] sm:$0xe] }
 0x174   : > { %1552 = vmatpush.bf16.msra.mxu0 %v3316_v37  ;;  %v1466_v37 = vor.u32 %v1465_v25, %v1462_v24  ;;  %v1842_v10 = vrot.slane %v1841_v49, 4  ;;  %v1458_v14 = vsel %vm4115_vm11, %v1453_v54, %v1457_v55  ;;  %v1976_v42 = vrot.slane %v4157_v61, 5  ;;  %v1960_v61 = vld [vmem:[#allocation2 + $0x20] sm:$0xe] }
 0x175   : > { %1676 = vmatpush.bf16.msra.mxu1 %v3324_v56  ;;  %v1856_v12 = vrot.slane %v1855_v52, 4  ;;  %v1492_v22 = vunpack.c.l.b16 %v1458_v14  ;;  %v3066_v52 = vrot.slane %v1960_v61, 9  ;;  %v3067_v54 = vrot.slane %v1961_v50, 9  ;;  %v3378_v61 = vld [vmem:[#allocation9 + $0xac] sm:$0xf] }
 0x176   : > { %1781 = vmatpush.bf16.msra.mxu2 %v3334_v44  ;;  %v1469_v44 = vshll.u32 %v1416_v30, 16  ;;  %v1467_v56 = vrot.slane %v1466_v37, 4  ;;  %v1847_v19 = vsel %vm4115_vm11, %v1842_v10, %v1846_v11  ;;  %v1984_v55 = vrot.slane %v4177_v41, 5  ;;  %v3192_v50 = vld [vmem:[#allocation9 + $0xb8] sm:$0xf0] }
 0x177   : > { %1941 = vmatpush.bf16.msra.mxu3 %v3342_v57 }
 0x178   : > { %1553 = vmatpush.bf16.msra.mxu0 %v3315_v63  ;;  %v1471_v57 = vrot.slane %v1469_v44, 5  ;;  %v1591_v63 = vrot.slane %v1414_v29, 5  ;;  %v1881_v29 = vunpack.c.l.b16 %v1847_v19  ;;  %v3350_v44 = vld [vmem:[#allocation8 + $0x208] sm:$0xff] }
 0x179   : > { %1677 = vmatpush.bf16.msra.mxu1 %v3323_v13  ;;  %v1860_v13 = vrot.slane %v1858_v53, 5  ;;  %v1980_v53 = vrot.slane %v4175_v40, 5 }
 0x17a   : > { %1782 = vmatpush.bf16.msra.mxu2 %v3333_v51  ;;  %v2959_v51 = vrot.slane %v1572_v47, 9  ;;  %v1472_v15 = vsel %vm4115_vm11, %v1467_v56, %v1471_v57  ;;  %v1985_v57 = vsel %vm4121_vm12, %v3067_v54, %v1984_v55  ;;  %v3375_v54 = vld [vmem:[#allocation9 + $0x8c] sm:$0xf0] }
 0x17b   : > { %1942 = vmatpush.bf16.msra.mxu3 %v3341_v26  ;;  %1554 = vmatmul.bf16.vlgmr.msra.gmra.mxu0 %v1494_v35  ;;  %v1861_v20 = vsel %vm4115_vm11, %v1856_v12, %v1860_v13  ;;  %v1493_v23 = vunpack.c.l.b16 %v1472_v15  ;;  %v2998_v26 = vld [vmem:[#allocation2 + $0x20] sm:$0xf]  ;;  %v1981_v56 = vsel %vm4121_vm12, %v3066_v52, %v1980_v53  ;;  %v3214_v12 = vld [vmem:[#allocation9 + $0xe0] sm:$0xf]  ;;  %v3216_v15 = vld [vmem:[#allocation9 + $0xf0] sm:$0xf0]  ;;  %v4231_v52 = vor.u32 %v3378_v61, %v3192_v50 }
 0x17c   : > { %2059 = vmatpush.bf16.msrb.mxu0 %v3356_v17  ;;  %1678 = vmatmul.bf16.vlgmr.msra.gmra.mxu1 %v1618_v39  ;;  %v1592_v17 = vsel %vm4121_vm12, %v2958_v60, %v1591_v63  ;;  %v1596_v18 = vsel %vm4121_vm12, %v2959_v51, %v1595_v21  ;;  %v1882_v30 = vunpack.c.l.b16 %v1861_v20  ;;  %v2999_v32 = vor.u32 %v3332_v27, %v2998_v26  ;;  %v3351_v35 = vld [vmem:[#allocation8 + $0x210] sm:$0xff]  ;;  %v1959_v39 = vld [vmem:[#allocation2 + $0x18] sm:$0xe]  ;;  %v3386_v20 = vld [vmem:[#allocation9 + $0xec] sm:$0xf] }
 0x17d   : > { %1783 = vmatmul.bf16.vlgmr.msra.gmra.mxu2 %v2995_v36  ;;  %v1616_v24 = vunpack.c.l.b16 %v1592_v17  ;;  %v1617_v25 = vunpack.c.l.b16 %v1596_v18  ;;  %v1495_v31 = vpack.c.b16 %v1493_v23, %v1492_v22  ;;  %v1958_v36 = vld [vmem:[#allocation2 + $0x10] sm:$0xe]  ;;  %v3065_v37 = vrot.slane %v1959_v39, 9  ;;  %v3387_v13 = vld [vmem:[#allocation9 + $0xec] sm:$0xf0] }
 0x17e   : > { %1943 = vmatmul.bf16.vlgmr.msra.gmra.mxu3 %v1883_v45  ;;  %v1884_v34 = vpack.c.b16 %v1882_v30, %v1881_v29  ;;  %v3064_v43 = vrot.slane %v1958_v36, 9  ;;  %v2006_v60 = vunpack.c.l.b16 %v1985_v57  ;;  %v3215_v14 = vor.u32 %v3387_v13, %v3214_v12  ;;  %v3388_v17 = vld [vmem:[#allocation9 + $0xf4] sm:$0xf0]  ;;  %v3224_v22 = vld [vmem:[#allocation9 + $0xf8] sm:$0xf0] }
 0x17f   : > { %v1619_v33 = vpack.c.b16 %v1617_v25, %v1616_v24  ;;  %v3219_v18 = vor.u32 %v3385_v62, %v3216_v15  ;;  %v4219_v24 = vor.u32 %v3386_v20, %v3224_v22  ;;  %v3198_v25 = vld [vmem:[#allocation9 + $0xc0] sm:$0xf]  ;;  %v3383_v26 = vld [vmem:[#allocation9 + $0xcc] sm:$0xf0]  ;;  %v3381_v29 = vld [vmem:[#allocation9 + $0xc4] sm:$0xf] }
 0x180   : > { %2060 = vmatpush.bf16.msrb.mxu0 %v3355_v38  ;;  %v1973_v45 = vsel %vm4121_vm12, %v3064_v43, %v1972_v58  ;;  %v1977_v38 = vsel %vm4121_vm12, %v3065_v37, %v1976_v42  ;;  %2312 = vmatpush.bf16.msrb.mxu1 %v3215_v14  ;;  %v3200_v30 = vld [vmem:[#allocation9 + $0xd0] sm:$0xf0]  ;;  %v3182_v43 = vld [vmem:[#allocation9 + $0xa0] sm:$0xf]  ;;  %v3379_v37 = vld [vmem:[#allocation9 + $0xac] sm:$0xf0] }
 0x181   : > { %v2003_v47 = vunpack.c.l.b16 %v1973_v45  ;;  %v2004_v49 = vunpack.c.l.b16 %v1977_v38  ;;  %2331 = vmatpush.bf16.msrb.mxu2 %v3219_v18  ;;  %v3183_v45 = vor.u32 %v3379_v37, %v3182_v43  ;;  %v3184_v38 = vld [vmem:[#allocation9 + $0xb0] sm:$0xf0]  ;;  %v3166_v53 = vld [vmem:[#allocation9 + $0x80] sm:$0xf]  ;;  %v3376_v12 = vld [vmem:[#allocation9 + $0x94] sm:$0xf0] }
 0x182   : > { %v3167_v55 = vor.u32 %v3375_v54, %v3166_v53  ;;  %v3168_v57 = vld [vmem:[#allocation9 + $0x90] sm:$0xf0]  ;;  %v3374_v13 = vld [vmem:[#allocation9 + $0x8c] sm:$0xf]  ;;  %v3176_v62 = vld [vmem:[#allocation9 + $0x98] sm:$0xf0] }
 0x183   : > { %v2007_v48 = vpack.c.b16 %v2004_v49, %v2003_v47  ;;  %v3380_v47 = vld [vmem:[#allocation9 + $0xb4] sm:$0xf0]  ;;  %v3150_v18 = vld [vmem:[#allocation9 + $0x60] sm:$0xf]  ;;  %v3369_v20 = vld [vmem:[#allocation9 + $0x64] sm:$0xf] }
 0x184   : > { %2061 = vmatpush.bf16.msrb.mxu0 %v3354_v59  ;;  %v2005_v59 = vunpack.c.l.b16 %v1981_v56  ;;  %v3373_v56 = vld [vmem:[#allocation9 + $0x84] sm:$0xf] }
 0x185   : > { %v3365_v43 = vld [vmem:[#allocation9 + $0x44] sm:$0xf] }
 0x186   : > { %v2008_v63 = vpack.c.b16 %v2006_v60, %v2005_v59  ;;  %v3174_v59 = vld [vmem:[#allocation9 + $0x88] sm:$0xf] }
 0x187   : > { %v3175_v15 = vor.u32 %v3376_v12, %v3174_v59  ;;  %v3126_v12 = vld [vmem:[#allocation9 + $0x28] sm:$0xf] }
 0x188   : > { %2062 = vmatpush.bf16.msrb.mxu0 %v3353_v16  ;;  %v3222_v16 = vld [vmem:[#allocation9 + $0xe8] sm:$0xf] }
 0x189   : > { %v3223_v19 = vor.u32 %v3388_v17, %v3222_v16  ;;  %v4238_v16 = vor.u32 %v3374_v13, %v3176_v62  ;;  %v3364_v13 = vld [vmem:[#allocation9 + $0x34] sm:$0xf0] }
 0x18b   : > { %1559 = vmatmul.bf16.gmra.mxu0 %v1495_v31  ;;  %2350 = vmatpush.bf16.msrb.mxu3 %v3223_v19  ;;  %v3206_v31 = vld [vmem:[#allocation9 + $0xc8] sm:$0xf]  ;;  %v3371_v19 = vld [vmem:[#allocation9 + $0x6c] sm:$0xf0] }
 0x18c   : > { %2063 = vmatpush.bf16.msrb.mxu0 %v3352_v28  ;;  %1683 = vmatmul.bf16.gmra.mxu1 %v1619_v33  ;;  %v3199_v28 = vor.u32 %v3383_v26, %v3198_v25  ;;  %v3384_v33 = vld [vmem:[#allocation9 + $0xd4] sm:$0xf0]  ;;  %v3151_v22 = vor.u32 %v3371_v19, %v3150_v18  ;;  %v3152_v25 = vld [vmem:[#allocation9 + $0x70] sm:$0xf0]  ;;  %v3158_v26 = vld [vmem:[#allocation9 + $0x68] sm:$0xf] }
 0x18d   : > { %1788 = vmatmul.bf16.gmra.mxu2 %v2999_v32  ;;  %v3203_v32 = vor.u32 %v3381_v29, %v3200_v30  ;;  %v3207_v36 = vor.u32 %v3384_v33, %v3206_v31  ;;  %v3155_v30 = vor.u32 %v3369_v20, %v3152_v25  ;;  %v3160_v33 = vld [vmem:[#allocation9 + $0x78] sm:$0xf0]  ;;  %v3362_v18 = vld [vmem:[#allocation9 + $0x2c] sm:$0xf]  ;;  %v3102_v25 = vld [vmem:[#allocation9] sm:$0xf] }
 0x18e   : > { %1948 = vmatmul.bf16.gmra.mxu3 %v1884_v34  ;;  %v3382_v34 = vld [vmem:[#allocation9 + $0xcc] sm:$0xf]  ;;  %2313 = vmatpush.bf16.msrb.mxu1 %v3199_v28  ;;  %v3372_v28 = vld [vmem:[#allocation9 + $0x74] sm:$0xf0]  ;;  %v3128_v19 = vld [vmem:[#allocation9 + $0x38] sm:$0xf0] }
 0x18f   : > { %2332 = vmatpush.bf16.msrb.mxu2 %v3203_v32  ;;  %2351 = vmatpush.bf16.msrb.mxu3 %v3207_v36  ;;  %v3159_v31 = vor.u32 %v3372_v28, %v3158_v26  ;;  %v3370_v32 = vld [vmem:[#allocation9 + $0x6c] sm:$0xf]  ;;  %v3367_v36 = vld [vmem:[#allocation9 + $0x4c] sm:$0xf0]  ;;  %v4255_v20 = vor.u32 %v3362_v18, %v3128_v19  ;;  %v3357_v28 = vld [vmem:[#allocation9 + $0x4] sm:$0xf] }
 0x190   : > { %2064 = vmatpush.bf16.msrb.mxu0 %v3351_v35  ;;  %v3208_v35 = vld [vmem:[#allocation9 + $0xd8] sm:$0xf0]  ;;  %v3359_v26 = vld [vmem:[#allocation9 + $0xc] sm:$0xf0] }
 0x191   : > { %v4224_v39 = vor.u32 %v3382_v34, %v3208_v35  ;;  %v4245_v34 = vor.u32 %v3370_v32, %v3160_v33  ;;  %v3134_v35 = vld [vmem:[#allocation9 + $0x40] sm:$0xf]  ;;  %v3110_v32 = vld [vmem:[#allocation9 + $0x8] sm:$0xf]  ;;  %v3360_v33 = vld [vmem:[#allocation9 + $0x14] sm:$0xf0] }
 0x192   : > { %2314 = vmatpush.bf16.msrb.mxu1 %v3183_v45  ;;  %v3135_v37 = vor.u32 %v3367_v36, %v3134_v35  ;;  %v3142_v45 = vld [vmem:[#allocation9 + $0x48] sm:$0xf]  ;;  %v3111_v36 = vor.u32 %v3360_v33, %v3110_v32 }
 0x194   : > { %2065 = vmatpush.bf16.msrb.mxu0 %v3350_v44  ;;  %v3377_v44 = vld [vmem:[#allocation9 + $0xa4] sm:$0xf] }
 0x195   : > { %v3187_v49 = vor.u32 %v3377_v44, %v3184_v38  ;;  %v3136_v44 = vld [vmem:[#allocation9 + $0x50] sm:$0xf0]  ;;  %v3368_v38 = vld [vmem:[#allocation9 + $0x54] sm:$0xf0] }
 0x196   : > { %2315 = vmatpush.bf16.msrb.mxu1 %v3167_v55  ;;  %v3118_v55 = vld [vmem:[#allocation9 + $0x20] sm:$0xf] }
 0x197   : > { %2333 = vmatpush.bf16.msrb.mxu2 %v3187_v49  ;;  %v3366_v49 = vld [vmem:[#allocation9 + $0x4c] sm:$0xf] }
 0x198   : > { %2066 = vmatpush.bf16.msrb.mxu0 %v3349_v46  ;;  %v3190_v46 = vld [vmem:[#allocation9 + $0xa8] sm:$0xf] }
 0x19a   : > { %2316 = vmatpush.bf16.msrb.mxu1 %v3151_v22 }
 0x19b   : > { %2067 = vmatmul.bf16.vlgmr.msrb.gmra.mxu0 %v2007_v48  ;;  %v3191_v48 = vor.u32 %v3380_v47, %v3190_v46  ;;  %v3139_v46 = vor.u32 %v3365_v43, %v3136_v44  ;;  %v3143_v47 = vor.u32 %v3368_v38, %v3142_v45  ;;  %v3358_v43 = vld [vmem:[#allocation9 + $0xc] sm:$0xf] }
 0x19c   : > { %2369 = vmatpush.bf16.msra.mxu0 %v4219_v24 }
 0x19d   : > { %2352 = vmatpush.bf16.msrb.mxu3 %v3191_v48  ;;  %v3144_v48 = vld [vmem:[#allocation9 + $0x58] sm:$0xf0] }
 0x19e   : > { %2317 = vmatpush.bf16.msrb.mxu1 %v3135_v37  ;;  %v4250_v50 = vor.u32 %v3366_v49, %v3144_v48  ;;  %v3112_v37 = vld [vmem:[#allocation9 + $0x18] sm:$0xf0] }
 0x19f   : > { %v3115_v44 = vor.u32 %v3358_v43, %v3112_v37 }
 0x1a0   : > { %2370 = vmatpush.bf16.msra.mxu0 %v4224_v39 }
 0x1a1   : > { %2353 = vmatpush.bf16.msrb.mxu3 %v3175_v15  ;;  %v3127_v15 = vor.u32 %v3364_v13, %v3126_v12 }
 0x1a4   : > { %2371 = vmatpush.bf16.msra.mxu0 %v4231_v52 }
 0x1a5   : > { %2354 = vmatpush.bf16.msrb.mxu3 %v3159_v31  ;;  %v3104_v31 = vld [vmem:[#allocation9 + $0x10] sm:$0xf0] }
 0x1a6   : > { %v3107_v35 = vor.u32 %v3357_v28, %v3104_v31 }
 0x1a8   : > { %2372 = vmatpush.bf16.msra.mxu0 %v4238_v16 }
 0x1a9   : > { %2355 = vmatpush.bf16.msrb.mxu3 %v3143_v47 }
 0x1ab   : > { %2072 = vmatmul.bf16.gmra.mxu0 %v2008_v63  ;;  %v3171_v63 = vor.u32 %v3373_v56, %v3168_v57  ;;  %v3363_v56 = vld [vmem:[#allocation9 + $0x2c] sm:$0xf0]  ;;  %v3361_v57 = vld [vmem:[#allocation9 + $0x24] sm:$0xf] }
 0x1ac   : > { %2373 = vmatpush.bf16.msra.mxu0 %v4245_v34  ;;  %v3119_v59 = vor.u32 %v3363_v56, %v3118_v55 }
 0x1ad   : > { %2334 = vmatpush.bf16.msrb.mxu2 %v3171_v63  ;;  %v3120_v63 = vld [vmem:[#allocation9 + $0x30] sm:$0xf0]  ;;  %2356 = vmatpush.bf16.msrb.mxu3 %v3127_v15 }
 0x1ae   : > { %v3123_v62 = vor.u32 %v3361_v57, %v3120_v63  ;;  %2318 = vmatpush.bf16.msrb.mxu1 %v3119_v59 }
 0x1b0   : > { %2374 = vmatpush.bf16.msra.mxu0 %v4250_v50 }
 0x1b1   : > { %2335 = vmatpush.bf16.msrb.mxu2 %v3155_v30  ;;  %v3103_v30 = vor.u32 %v3359_v26, %v3102_v25  ;;  %2357 = vmatpush.bf16.msrb.mxu3 %v3111_v36 }
 0x1b3   : > { %2319 = vmatpush.bf16.msrb.mxu1 %v3103_v30 }
 0x1b4   : > { %2375 = vmatpush.bf16.msra.mxu0 %v4255_v20 }
 0x1b5   : > { %2336 = vmatpush.bf16.msrb.mxu2 %v3139_v46 }
 0x1b7   : > { %3390 = vmatpush.bf16.msra.mxu1 %v4219_v24 }
 0x1b8   : > { %2376 = vmatpush.bf16.msra.mxu0 %v3115_v44 }
 0x1b9   : > { %2337 = vmatpush.bf16.msrb.mxu2 %v3123_v62 }
 0x1bb   : > { %3391 = vmatpush.bf16.msra.mxu1 %v4224_v39 }
 0x1bd   : > { %2338 = vmatpush.bf16.msrb.mxu2 %v3107_v35 }
 0x1bf   : > { %3392 = vmatpush.bf16.msra.mxu1 %v4231_v52 }
 0x1c3   : > { %3393 = vmatpush.bf16.msra.mxu1 %v4238_v16  ;;  %v2083_v16 = vperm.slane %v3983_v0, 0 }
 0x1c7   : > { %3394 = vmatpush.bf16.msra.mxu1 %v4245_v34 }
 0x1cb   : > { %3395 = vmatpush.bf16.msra.mxu1 %v4250_v50 }
 0x1cf   : > { %3396 = vmatpush.bf16.msra.mxu1 %v4255_v20 }
 0x1d3   : > { %3397 = vmatpush.bf16.msra.mxu1 %v3115_v44 }
 0x1d8   : > { %v4205_v51 = vpop.f32.mrf.mxu0 }
 0x1d9   : > { %v4209_v10 = vpop.f32.mrf.mxu1 }
 0x1da   : > { %v1168_v46 = vadd.f32 %v4209_v10, %v4205_v51 }
 0x1e0   : > { %v4207_v21 = vpop.f32.mrf.mxu0  ;;  %v4211_v40 = vpop.f32.mrf.mxu2 }
 0x1e1   : > { %v4213_v11 = vpop.f32.mrf.mxu3  ;;  %v4217_v23 = vpop.f32.mrf.mxu1  ;;  %v1300_v49 = vadd.f32 %v4211_v40, %v1168_v46 }
 0x1e2   : > { %v1170_v48 = vadd.f32 %v4217_v23, %v4207_v21 }
 0x1e3   : > { %v1405_v56 = vadd.f32 %v4213_v11, %v1300_v49 }
 0x1e8   : > { %v4215_v41 = vpop.f32.mrf.mxu0  ;;  %v4221_v27 = vpop.f32.mrf.mxu2 }
 0x1e9   : > { %v4226_v58 = vpop.f32.mrf.mxu3  ;;  %v4233_v60 = vpop.f32.mrf.mxu1  ;;  %v1301_v57 = vadd.f32 %v4221_v27, %v1170_v48 }
 0x1ea   : > { %v1173_v11 = vadd.f32 %v4233_v60, %v4215_v41 }
 0x1eb   : > { %v1406_v10 = vadd.f32 %v4226_v58, %v1301_v57  ;;  %v2127_v57 = vunpack.c.l.bf16 %v3988_v2 }
 0x1f0   : > { %v4228_v42 = vpop.f32.mrf.mxu0  ;;  %v4236_v14 = vpop.f32.mrf.mxu2 }
 0x1f1   : > { %v4243_v29 = vpop.f32.mrf.mxu3  ;;  %v4248_v61 = vpop.f32.mrf.mxu1 }
 0x1f2   : > { %v1175_v58 = vadd.f32 %v4248_v61, %v4228_v42 }
 0x1f8   : > { %v4240_v17 = vpop.f32.mrf.mxu0  ;;  %v4252_v53 = vpop.f32.mrf.mxu2 }
 0x1f9   : > { %v4257_v22 = vpop.f32.mrf.mxu3  ;;  %v1679_v45 = vpop.f32.mrf.mxu1  ;;  %v1565_v63 = vadd.f32 %v4240_v17, %v1405_v56  ;;  %v1302_v17 = vadd.f32 %v4236_v14, %v1173_v11  ;;  %v1303_v41 = vadd.f32 %v4252_v53, %v1175_v58  ;;  %v4289_v56 = vperm.slane %v3985_v1, 3 }
 0x1fa   : > { %v2128_v11 = vunpack.c.h.bf16 %v3988_v2  ;;  %v2131_v58 = vunpack.c.l.bf16 %v3994_v4 }
 0x1fb   : > { %v1689_v40 = vadd.f32 %v1679_v45, %v1565_v63  ;;  %v1407_v18 = vadd.f32 %v4243_v29, %v1302_v17  ;;  %v1408_v42 = vadd.f32 %v4257_v22, %v1303_v41  ;;  %v2130_v63 = vunpack.c.h.bf16 %v3991_v3 }
 0x200   : > { %v1557_v54 = vpop.f32.mrf.mxu0  ;;  %v1784_v47 = vpop.f32.mrf.mxu2 }
 0x201   : > { %v1944_v55 = vpop.f32.mrf.mxu3  ;;  %v1681_v51 = vpop.f32.mrf.mxu1  ;;  %v1566_v12 = vadd.f32 %v1557_v54, %v1406_v10  ;;  %v1794_v21 = vadd.f32 %v1784_v47, %v1689_v40 }
 0x203   : > { %v1690_v27 = vadd.f32 %v1681_v51, %v1566_v12  ;;  %v1954_v52 = vadd.f32 %v1944_v55, %v1794_v21  ;;  %v4286_v55 = vperm.slane %v3985_v1, 0  ;;  %v4296_v12 = vperm.slane %v3985_v1, 1 }
 0x208   : > { %v1560_v38 = vpop.f32.mrf.mxu0  ;;  %v1786_v24 = vpop.f32.mrf.mxu2 }
 0x209   : > { %v1946_v23 = vpop.f32.mrf.mxu3  ;;  %v1795_v13 = vadd.f32 %v1786_v24, %v1690_v27  ;;  %v1684_v62 = vpop.f32.mrf.mxu1  ;;  %v1567_v19 = vadd.f32 %v1560_v38, %v1407_v18 }
 0x20b   : > { %v1955_v60 = vadd.f32 %v1946_v23, %v1795_v13  ;;  %v1691_v28 = vadd.f32 %v1684_v62, %v1567_v19  ;;  %v4299_v23 = vperm.slane %v3985_v1, 2 }
 0x210   : > { %v1562_v59 = vpop.f32.mrf.mxu0  ;;  %v1789_v15 = vpop.f32.mrf.mxu2 }
 0x211   : > { %v1949_v26 = vpop.f32.mrf.mxu3  ;;  %v1568_v0 = vadd.f32 %v1562_v59, %v1408_v42  ;;  %v1686_v31 = vpop.f32.mrf.mxu1  ;;  %v1796_v29 = vadd.f32 %v1789_v15, %v1691_v28  ;;  %v2133_v28 = vunpack.c.l.bf16 %v3997_v5 }
 0x213   : > { %v1692_v35 = vadd.f32 %v1686_v31, %v1568_v0  ;;  %v1956_v20 = vadd.f32 %v1949_v26, %v1796_v29  ;;  %v2132_v26 = vunpack.c.h.bf16 %v3994_v4 }
 0x218   : > { %v2068_v39 = vpop.f32.mrf.mxu0  ;;  %v1791_v53 = vpop.f32.mrf.mxu2 }
 0x219   : > { %v2078_v54 = vadd.f32 %v2068_v39, %v1954_v52  ;;  %v1797_v36 = vadd.f32 %v1791_v53, %v1692_v35  ;;  %v1951_v43 = vpop.f32.mrf.mxu3  ;;  %v2129_v52 = vunpack.c.l.bf16 %v3991_v3 }
 0x21b   : > { %v2085_v14 = vadd.f32 %v2083_v16, %v2078_v54  ;;  %v1957_v37 = vadd.f32 %v1951_v43, %v1797_v36  ;;  %v2136_v36 = vunpack.c.h.bf16 %v4000_v6 }
 0x21d   : > { %v2089_v30 = vmax.f32 %v2085_v14, 0.0 }
 0x220   : > { %v2070_v34 = vpop.f32.mrf.mxu0 }
 0x221   : > { %v2079_v25 = vadd.f32 %v2070_v34, %v1955_v60 }
 0x223   : > { %v2086_v61 = vadd.f32 %v2083_v16, %v2079_v25 }
 0x225   : > { %v2090_v50 = vmax.f32 %v2086_v61, 0.0 }
 0x227   : > { %v2093_v32 = vpack.c.bf16 %v2090_v50, %v2089_v30  ;;  %v2135_v50 = vunpack.c.l.bf16 %v4000_v6 }
 0x228   : > { %v2073_v33 = vpop.f32.mrf.mxu0 }
 0x229   : > { %2320 = vmatmul.bf16.vlgmr.msrb.gmra.mxu1 %v2093_v32  ;;  %2339 = vmatmul.bf16.vlgmr.msrb.gmra.mxu2 %v2093_v32  ;;  %v2080_v22 = vadd.f32 %v2073_v33, %v1956_v20 }
 0x22a   : > { %2358 = vmatmul.bf16.vlgmr.msrb.gmra.mxu3 %v2093_v32  ;;  %2377 = vmatmul.bf16.vlgmr.msra.gmra.mxu0 %v2093_v32 }
 0x22b   : > { %v2087_v38 = vadd.f32 %v2083_v16, %v2080_v22  ;;  %v2137_v22 = vunpack.c.l.bf16 %v4003_v7 }
 0x22d   : > { %v2091_v44 = vmax.f32 %v2087_v38, 0.0  ;;  %v2139_v38 = vunpack.c.l.bf16 %v4006_v8 }
 0x230   : > { %v2075_v45 = vpop.f32.mrf.mxu0 }
 0x231   : > { %v2081_v46 = vadd.f32 %v2075_v45, %v1957_v37 }
 0x233   : > { %v2088_v47 = vadd.f32 %v2083_v16, %v2081_v46  ;;  %v2134_v16 = vunpack.c.h.bf16 %v3997_v5 }
 0x235   : > { %v2092_v49 = vmax.f32 %v2088_v47, 0.0 }
 0x237   : > { %v2094_v48 = vpack.c.bf16 %v2092_v49, %v2091_v44 }
 0x239   : > { %2325 = vmatmul.bf16.gmra.mxu1 %v2094_v48  ;;  %2344 = vmatmul.bf16.gmra.mxu2 %v2094_v48 }
 0x23a   : > { %2363 = vmatmul.bf16.gmra.mxu3 %v2094_v48 }
 0x249   : > { %2382 = vmatmul.bf16.vlgmr.msra.gmra.mxu1 %v2094_v48 }
 0x2a6   : > { %v2321_v59 = vpop.f32.mrf.mxu1 }
 0x2a7   : > { %v2322_v51 = vadd.f32 %v2321_v59, %v4286_v55  ;;  %v2378_v10 = vpop.f32.mrf.mxu0 }
 0x2a8   : > { %v2379_v24 = vadd.f32 %v2378_v10, %v4289_v56 }
 0x2a9   : > { %v2388_v40 = vadd.f32 %v2322_v51, %v2127_v57  ;;  %v2140_v51 = vunpack.c.h.bf16 %v4006_v8 }
 0x2aa   : > { %v2391_v21 = vadd.f32 %v2379_v24, %v2130_v63  ;;  %v2141_v24 = vunpack.c.l.bf16 %v4009_v9 }
 0x2ab   : > { %v2404_v39 = vmax.f32 %v2388_v40, 0.0 }
 0x2ac   : > { %v2407_v27 = vmax.f32 %v2391_v21, 0.0  ;;  %v2340_v17 = vpop.f32.mrf.mxu2  ;;  %v2138_v21 = vunpack.c.h.bf16 %v4003_v7  ;;  %v2142_v7 = vunpack.c.h.bf16 %v4009_v9 }
 0x2ad   : > { %2420 = vst [vmem:[%s4109_s23] sm:$0xff] %v2404_v39  ;;  %v2341_v13 = vadd.f32 %v2340_v17, %v4296_v12  ;;  %v2359_v62 = vpop.f32.mrf.mxu3 }
 0x2ae   : > { %2423 = vst [vmem:[%s4109_s23 + $0x18] sm:$0xff] %v2407_v27  ;;  %v2360_v54 = vadd.f32 %v2359_v62, %v4299_v23  ;;  %v2323_v1 = vpop.f32.mrf.mxu1 }
 0x2af   : > { %v2389_v15 = vadd.f32 %v2341_v13, %v2128_v11  ;;  %v2324_v2 = vadd.f32 %v2323_v1, %v4286_v55  ;;  %v2380_v18 = vpop.f32.mrf.mxu0 }
 0x2b0   : > { %v2390_v3 = vadd.f32 %v2360_v54, %v2129_v52  ;;  %v2381_v41 = vadd.f32 %v2380_v18, %v4289_v56 }
 0x2b1   : > { %v2405_v60 = vmax.f32 %v2389_v15, 0.0  ;;  %v2392_v34 = vadd.f32 %v2324_v2, %v2131_v58 }
 0x2b2   : > { %v2406_v19 = vmax.f32 %v2390_v3, 0.0  ;;  %v2395_v14 = vadd.f32 %v2381_v41, %v2134_v16 }
 0x2b3   : > { %2421 = vst [vmem:[%s4109_s23 + $0x8] sm:$0xff] %v2405_v60  ;;  %v2408_v25 = vmax.f32 %v2392_v34, 0.0 }
 0x2b4   : > { %2422 = vst [vmem:[%s4109_s23 + $0x10] sm:$0xff] %v2406_v19  ;;  %v2411_v42 = vmax.f32 %v2395_v14, 0.0  ;;  %v2342_v61 = vpop.f32.mrf.mxu2 }
 0x2b5   : > { %2424 = vst [vmem:[%s4109_s23 + $0x20] sm:$0xff] %v2408_v25  ;;  %v2343_v0 = vadd.f32 %v2342_v61, %v4296_v12  ;;  %v2361_v30 = vpop.f32.mrf.mxu3 }
 0x2b6   : > { %2427 = vst [vmem:[%s4109_s23 + $0x38] sm:$0xff] %v2411_v42  ;;  %v2362_v31 = vadd.f32 %v2361_v30, %v4299_v23  ;;  %v2326_v29 = vpop.f32.mrf.mxu1 }
 0x2b7   : > { %v2393_v32 = vadd.f32 %v2343_v0, %v2132_v26  ;;  %v2327_v4 = vadd.f32 %v2326_v29, %v4286_v55 }
 0x2b8   : > { %v2394_v53 = vadd.f32 %v2362_v31, %v2133_v28 }
 0x2b9   : > { %v2409_v33 = vmax.f32 %v2393_v32, 0.0  ;;  %v2396_v35 = vadd.f32 %v2327_v4, %v2135_v50 }
 0x2ba   : > { %v2410_v20 = vmax.f32 %v2394_v53, 0.0 }
 0x2bb   : > { %2425 = vst [vmem:[%s4109_s23 + $0x28] sm:$0xff] %v2409_v33  ;;  %v2412_v5 = vmax.f32 %v2396_v35, 0.0 }
 0x2bc   : > { %2426 = vst [vmem:[%s4109_s23 + $0x30] sm:$0xff] %v2410_v20  ;;  %v2345_v43 = vpop.f32.mrf.mxu2 }
 0x2bd   : > { %2428 = vst [vmem:[%s4109_s23 + $0x40] sm:$0xff] %v2412_v5  ;;  %v2346_v37 = vadd.f32 %v2345_v43, %v4296_v12  ;;  %v2364_v45 = vpop.f32.mrf.mxu3 }
 0x2be   : > { %v2365_v46 = vadd.f32 %v2364_v45, %v4299_v23  ;;  %v2328_v47 = vpop.f32.mrf.mxu1 }
 0x2bf   : > { %v2397_v44 = vadd.f32 %v2346_v37, %v2136_v36  ;;  %v2329_v6 = vadd.f32 %v2328_v47, %v4286_v55 }
 0x2c0   : > { %v2398_v49 = vadd.f32 %v2365_v46, %v2137_v22 }
 0x2c1   : > { %v2413_v48 = vmax.f32 %v2397_v44, 0.0  ;;  %v2400_v57 = vadd.f32 %v2329_v6, %v2139_v38 }
 0x2c2   : > { %v2414_v59 = vmax.f32 %v2398_v49, 0.0 }
 0x2c3   : > { %2429 = vst [vmem:[%s4109_s23 + $0x48] sm:$0xff] %v2413_v48  ;;  %v2416_v63 = vmax.f32 %v2400_v57, 0.0 }
 0x2c4   : > { %2430 = vst [vmem:[%s4109_s23 + $0x50] sm:$0xff] %v2414_v59  ;;  %v2347_v10 = vpop.f32.mrf.mxu2 }
 0x2c5   : > { %2432 = vst [vmem:[%s4109_s23 + $0x60] sm:$0xff] %v2416_v63  ;;  %v2348_v40 = vadd.f32 %v2347_v10, %v4296_v12  ;;  %v2366_v55 = vpop.f32.mrf.mxu3 }
 0x2c6   : > { %v2367_v39 = vadd.f32 %v2366_v55, %v4299_v23  ;;  %v2383_v11 = vpop.f32.mrf.mxu1 }
 0x2c7   : > { %v2401_v8 = vadd.f32 %v2348_v40, %v2140_v51  ;;  %v2384_v27 = vadd.f32 %v2383_v11, %v4289_v56 }
 0x2c8   : > { %v2402_v17 = vadd.f32 %v2367_v39, %v2141_v24 }
 0x2c9   : > { %v2417_v52 = vmax.f32 %v2401_v8, 0.0  ;;  %v2399_v13 = vadd.f32 %v2384_v27, %v2138_v21 }
 0x2ca   : > { %v2418_v62 = vmax.f32 %v2402_v17, 0.0 }
 0x2cb   : > { %2433 = vst [vmem:[%s4109_s23 + $0x68] sm:$0xff] %v2417_v52  ;;  %v2415_v12 = vmax.f32 %v2399_v13, 0.0 }
 0x2cc   : > { %2434 = vst [vmem:[%s4109_s23 + $0x70] sm:$0xff] %v2418_v62 }
 0x2cd   : > { %2431 = vst [vmem:[%s4109_s23 + $0x58] sm:$0xff] %v2415_v12 }
 0x2ce   : > { %v2385_v23 = vpop.f32.mrf.mxu1 }
 0x2cf   : > { %v2386_v58 = vadd.f32 %v2385_v23, %v4289_v56 }
 0x2d1   : > { %v2403_v54 = vadd.f32 %v2386_v58, %v2142_v7 }
 0x2d3   : > { %v2419_v1 = vmax.f32 %v2403_v54, 0.0 }
 0x2d5   : > { %2435 = vst [vmem:[%s4109_s23 + $0x78] sm:$0xff] %v2419_v1 }
 0x2d6   : > { %3707 = shalt.err (!%p3704_p4)
}
 0x2d7   : > { %s3798_s13 = smov 512   ;;  %s3799_s26 = smov 32  }
 0x2d8   : > { %3420 = dma.vmem_to_hbm [thread:$0]  (%p3940_p2), %s2453_s14, 2048, %s2455_s1, %s2437_s16, %s3798_s13, %s3798_s13, %s3799_s26  }
 0x2d9 PF: > { %s4439_s10 = sld [smem:[#allocation19_spill]] }
 0x2da   : > { %s4440_s4 = sld [smem:[#allocation17_spill]] }
 0x2df   : > { %p3452_p6 = scmp.ge.s32.totalorder %s4439_s10, 2 }
 0x2e0   : > { %s2469_s18 = sand.u32 1, %s4440_s4  }
 0x2e1   : > { %p3440_p8 = pnand %p3452_p6, %p3887_p5  ;;  %s2470_s23 = scalar_lea.sflag [#allocation5], %s2469_s18 }
 0x2e3   : > { %p3441_p9 = pneg %p3440_p8 }
 0x2e5   : > { %3753 = dma.done.wait (%p3441_p9), %s2470_s23, 2048  }
 0x2e6   : > { %3755 = vsyncadd (%p3441_p9), %s2470_s23, 4294965248  ;;  %s23_s25 = sadd.s32 1, %s4439_s10   ;;  %s4442_s21 = sld [smem:[#allocation18_spill]] }
 0x2e7   : > { %p20_p1 = scmp.ge.s32.totalorder %s23_s25, 6   ;;  %s4443_s23 = sld [smem:[#allocation21_spill]] }
 0x2e8   : > { %s4444_s3 = sld [smem:[#allocation22_spill]]  ;;  %s4445_s18 = smov %s3762_s19 }
 0x2e9   : > { %s4446_s19 = smov %s3766_s20  ;;  %s4447_s20 = smov %s3953_s7 }
 0x2ea   : > { %s4448_s22 = smov %s3782_s24  ;;  %22 = sbr.rel (!%p20_p1) target bundleno = 14 (0xe), region = 120 }
 0x2ee   : > { %s4449_s24 = smov %s4444_s3 }
 0x2ef   :  { %2476 = vsyncpa [#allocation4], 1 }
 0x2f0   :  { %2478 = vsyncpa [#allocation4 + $0x1], 1 }
 0x2f1   :  { %2479 = vsyncpa [#allocation7], 1 }
 0x2f2   :  { %2480 = vsyncpa [#allocation10], 1 }
 0x2f3   :  { %2481 = vsyncpa [#allocation5], 1 }
 0x2f4   :  { %2483 = vsyncpa [#allocation5 + $0x1], 1 }

// kernel: tpu_custom_call.1
= control target key start
LH: loop header
LB: loop body
LE: loop exit
PB: predicated region body
PF: predicated region fallthrough
CT: control target
= control target key end

     0   :  { %s4390_s0 = inlined_call_operand.hbm [shape: bf16[2,2,48,512], index: 0, kind: input, shape index: {}]   ;;  %s4391_s1 = inlined_call_operand.hbm [shape: bf16[512,128], index: 1, kind: input, shape index: {}]   ;;  %s4392_s2 = inlined_call_operand.hbm [shape: bf16[9,128,128], index: 2, kind: input, shape index: {}]   ;;  %s4393_s3 = inlined_call_operand.hbm [shape: bf16[128,512], index: 3, kind: input, shape index: {}]   ;;  %s4394_s4 = inlined_call_operand.hbm [shape: f32[1,768], index: 4, kind: input, shape index: {}]   ;;  %s4395_s5 = inlined_call_operand.hbm [shape: f32[2,64,512], index: 5, kind: output, shape index: {}]  }
   0x1   :  { %4406 = sst [smem:[#allocation23_spill]] %s4391_s1 }
   0x2   :  { %4407 = sst [smem:[#allocation24_spill]] %s4392_s2 }
   0x3   :  { %4408 = sst [smem:[#allocation25_spill]] %s4393_s3 }
   0x4   :  { %4409 = sst [smem:[#allocation26_spill]] %s4394_s4 }
   0x5   :  { %10 = vsyncpa [#allocation4], 0 }
   0x6   :  { %12 = vsyncpa [#allocation4 + $0x1], 0 }
   0x7   :  { %13 = vsyncpa [#allocation7], 0 }
   0x8   :  { %14 = vsyncpa [#allocation10], 0 }
   0x9   :  { %15 = vsyncpa [#allocation5], 0 }
   0xa   :  { %17 = vsyncpa [#allocation5 + $0x1], 0  ;;  %s3830_s18 = smov 0   ;;  %s3832_s19 = smov 0  }
   0xb   :  { %s3834_s20 = smov 0   ;;  %s3836_s21 = smov 0  }
   0xc   :  { %s3838_s22 = smov 0   ;;  %s3840_s23 = smov 0  }
   0xd   :  { %s3842_s24 = smov 0   ;;  %s3844_s25 = smov 0  }
   0xe LB: > { %4410 = sst [smem:[#allocation17_spill]] %s3758_s18  ;;  %s4396_s26 = sadd.s32 4294967295, %s3786_s25   ;;  %s3786_s25 = sphi %s3844_s25, %s23_s25   ;;  %s3782_s24 = sphi %s3842_s24, %s4449_s24   ;;  %s3778_s23 = sphi %s3840_s23, %s4443_s23   ;;  %s3774_s22 = sphi %s3838_s22, %s4448_s22   ;;  %s3770_s21 = sphi %s3836_s21, %s4442_s21   ;;  %s3766_s20 = sphi %s3834_s20, %s4447_s20   ;;  %s3762_s19 = sphi %s3832_s19, %s4446_s19   ;;  %s3758_s18 = sphi %s3830_s18, %s4445_s18  }
   0xf   : > { %4411 = sst [smem:[#allocation18_spill]] %s3778_s23  ;;  %s2584_s27 = sadd.s32 4294967294, %s3786_s25  }
  0x10   : > { %4412 = sst [smem:[#allocation19_spill]] %s3786_s25  ;;  %p57_p0 = scmp.ne.s32.totalorder %s3762_s19, %s3758_s18 }
  0x11   : > { %p3876_p1 = scmp.eq.s32.totalorder %s4396_s26, 0  ;;  %p173_p2 = scmp.eq.s32.totalorder %s2584_s27, 3 }
  0x12   : > { %p2585_p4 = scmp.ge.s32.totalorder %s3786_s25, 1  ;;  %p180_p6 = scmp.lt.s32.totalorder %s3786_s25, 5 }
  0x13   : > { %p3882_p3 = por %p3876_p1, %p57_p0  ;;  %p3887_p5 = por %p173_p2, %p57_p0 }
  0x14   : > { %s4417_s1 = sld [smem:[#allocation23_spill]]  ;;  %p3895_p7 = pnand %p2585_p4, %p180_p6 }
  0x15   : > { %s4415_s30 = scalar_select %p3887_p5, 1, 0 }
  0x16   : > { %p3422_p8 = pneg %p3895_p7  ;;  %s3788_s10 = smov [#allocation6]  }
  0x17   : > { %4416 = sst [smem:[#allocation20_spill]] %s4415_s30  ;;  %s193_s11 = sshll.u32 %s3788_s10, 4  ;;  %s194_s11 = int_to_ptr.vmem [resolvable:$true] %s193_s11 }
  0x18   : > { %p3903_p9 = pnand %p3422_p8, %p3876_p1  ;;  %s4420_s3 = sld [smem:[#allocation25_spill]] }
  0x19   : > { %s3789_s16 = smov 64   ;;  %s3790_s17 = smov 4  }
  0x1a   : > { %s191_s8 = sshll.u32 %s4417_s1, 4  ;;  %s3791_s27 = smov [#allocation9]   ;;  %s192_s8 = int_to_ptr.hbm [resolvable:$true] %s191_s8 }
  0x1b   : > { %3425 = dma.hbm_to_vmem [thread:$0]  (!%p3903_p9), %s192_s8, 4096, %s194_s11, [#allocation7], %s3789_s16, %s3789_s16, %s3790_s17  }
  0x1c   : > { %s221_s6 = sshll.u32 %s3791_s27, 4  ;;  %s4397_s7 = smov 256   ;;  %s222_s6 = int_to_ptr.vmem [resolvable:$true] %s221_s6 }
  0x1d   : > { %s4398_s10 = smov 16   ;;  %s4421_s2 = sld [smem:[#allocation24_spill]] }
  0x1e   : > { %s219_s15 = sshll.u32 %s4420_s3, 4  ;;  %s3794_s8 = smov [#allocation8]   ;;  %s220_s15 = int_to_ptr.hbm [resolvable:$true] %s219_s15 }
  0x1f   : > { %3431 = dma.hbm_to_vmem [thread:$0]  (!%p3903_p9), %s220_s15, 4096, %s222_s6, [#allocation10], %s4397_s7, %s4397_s7, %s4398_s10  }
  0x20   : > { %s207_s11 = sshll.u32 %s3794_s8, 4  ;;  %s4422_s4 = sld [smem:[#allocation26_spill]]  ;;  %s208_s11 = int_to_ptr.vmem [resolvable:$true] %s207_s11 }
  0x21   : > { %s3795_s15 = smov [#allocation11]   ;;  %s4423_s13 = sadd.s32 4294967295, %s3786_s25  }
  0x22   : > { %s236_s6 = sshll.u32 %s3795_s15, 4  ;;  %p167_p10 = scmp.eq.s32.totalorder %s4423_s13, 3  ;;  %s237_s6 = int_to_ptr.vmem [resolvable:$true] %s236_s6 }
  0x23   : > { %s205_s26 = sshll.u32 %s4421_s2, 4  ;;  %s32_s14 = sadd.s32 1, %s3778_s23  ;;  %s206_s26 = int_to_ptr.hbm [resolvable:$true] %s205_s26 }
  0x24   : > { %3428 = dma.hbm_to_vmem [thread:$0]  (!%p3903_p9), %s206_s26, 9216, %s208_s11, [#allocation7], %s3789_s16, %s3789_s16, %s3790_s17  }
  0x25   : > { %p33_p11 = scmp.ge.s32.totalorder %s32_s14, 2  ;;  %s35_s1 = sadd.s32 1, %s3782_s24 }
  0x26   : > { %s234_s3 = sshll.u32 %s4422_s4, 4  ;;  %p51_p12 = scmp.ne.s32.totalorder %s3766_s20, %s3762_s19  ;;  %s235_s3 = int_to_ptr.hbm [resolvable:$true] %s234_s3 }
  0x27   : > { %3434 = dma.hbm_to_vmem [thread:$0]  (!%p3903_p9), %s235_s3, 96, %s237_s6, [#allocation10]  }
  0x28   : > { %p52_p13 = scmp.eq.s32.totalorder %s3786_s25, 0  ;;  %s4451_s14 = smov (%p33_p11, %s32_s14), 0 }
  0x29   : > { %4424 = sst [smem:[#allocation21_spill]] %s4451_s14  ;;  %s4453_s1 = smov (!%p33_p11, %s35_s1), %s3782_s24 }
  0x2a   : > { %s40_s26 = ssub.s32 %s3778_s23, %s4451_s14  ;;  %s44_s16 = sadd.s32 1, %s3766_s20 }
  0x2b   : > { %p37_p0 = scmp.ge.s32.totalorder %s4453_s1, 2  ;;  %p3940_p2 = por %p167_p10, %p51_p12 }
  0x2c   : > { %p53_p4 = por %p52_p13, %p51_p12  ;;  %s247_s12 = sand.u32 1, %s3766_s20  }
  0x2d   : > { %s4455_s1 = smov (%p37_p0, %s4453_s1), 0  ;;  %p3447_p6 = scmp.lt.s32.totalorder %s3786_s25, 4 }
  0x2e   : > { %4426 = sst [smem:[#allocation22_spill]] %s4455_s1  ;;  %s3398_s17 = smul.u32 96, %s247_s12 }
  0x2f   : > { %s39_s8 = ssub.s32 %s3782_s24, %s4455_s1  ;;  %s3399_s11 = smul.u32 24, %s3778_s23 }
  0x30   : > { %s41_s27 = sor.u32 %s40_s26, %s39_s8  ;;  %s3400_s15 = smul.u32 48, %s3782_s24 }
  0x31   : > { %p42_p8 = scmp.eq.s32.totalorder %s41_s27, 0  ;;  %s251_s6 = scalar_lea.vmem [#allocation3], %s3398_s17 }
  0x32   : > { %s261_s13 = sshll.u32 %s251_s6, 4  ;;  %p3436_p9 = pnand %p3447_p6, %p53_p4  ;;  %s262_s13 = int_to_ptr.vmem [resolvable:$true] %s261_s13 }
  0x33   : > { %s3953_s7 = scalar_select %p42_p8, %s3766_s20, %s44_s16  }
  0x34   : > { %s256_s10 = sadd.s32 %s3400_s15, %s3399_s11  ;;  %s248_s25 = scalar_lea.sflag [#allocation4], %s247_s12 }
  0x35   : > { %s2591_s2 = sshll.u32 %s256_s10, 2  ;;  %s4427_s1 = smov 16  }
  0x36   : > { %s258_s30 = scalar_lea.hbm %s4390_s0, %s2591_s2  ;;  %s4428_s23 = smov 256  }
  0x37   : > { %s259_s18 = sshll.u32 %s258_s30, 4  ;;  %273 = sbr.rel (%p3895_p7) target bundleno = 729 (0x2d9), region = 40  ;;  %s260_s18 = int_to_ptr.hbm [resolvable:$true] %s259_s18 }
  0x38   : > { %3438 = dma.hbm_to_vmem [thread:$0]  (!%p3436_p9), %s260_s18, 1536, %s262_s13, %s248_s25, %s4428_s23, %s4428_s23, %s4427_s1  }
  0x39   : > { %s3964_s26 = sand.u32 (!%p3895_p7), 1, %s3762_s19  }
  0x3a   : > { %s3401_s10 = smul.u32 (!%p3895_p7), 96, %s3964_s26  ;;  %s276_s4 = scalar_lea.sflag (!%p3895_p7), [#allocation4], %s3964_s26 }
  0x3c   : > { %s3968_s2 = scalar_lea.vmem [#allocation3], %s3401_s10 }
  0x3d   : > { %3741 = dma.done.wait (%p3882_p3), %s276_s4, 1536  }
  0x3e   : > { %3743 = vsyncadd (%p3882_p3), %s276_s4, 4294965760 }
  0x3f   : > { %3745 = dma.done.wait (%p3876_p1), [#allocation7], 13312  }
  0x40   : > { %3747 = vsyncadd (%p3876_p1), [#allocation7], 4294953984 }
  0x41   : > { %3749 = dma.done.wait (%p3876_p1), [#allocation10], 4192  }
  0x42   : > { %3751 = vsyncadd (%p3876_p1), [#allocation10], 4294963104  ;;  %s2597_s18 = sshll.u32 %s3964_s26, 7  ;;  %v3983_v0 = vld [vmem:[#allocation11 + $0x1] sm:$0x1]  ;;  %v3988_v2 = vld [vmem:[%s3968_s2 + $0x10] sm:$0xff] }
  0x43   : > { %v3985_v1 = vld [vmem:[#allocation11 + $0x2] sm:$0xf]  ;;  %v3991_v3 = vld [vmem:[%s3968_s2 + $0x18] sm:$0xff]  ;;  %v3997_v5 = vld [vmem:[%s3968_s2 + $0x28] sm:$0xff]  ;;  %vm831_vm0 = vcmask 1043456   ;;  %vm837_vm2 = vcmask 1040384  }
  0x44   : > { %v3994_v4 = vld [vmem:[%s3968_s2 + $0x20] sm:$0xff]  ;;  %v4000_v6 = vld [vmem:[%s3968_s2 + $0x30] sm:$0xff]  ;;  %v4003_v7 = vld [vmem:[%s3968_s2 + $0x38] sm:$0xff]  ;;  %vm832_vm1 = vsmask.f32 7938  ;;  %s4109_s23 = scalar_lea.vmem [#allocation12], %s2597_s18 }
  0x45   : > { %v4006_v8 = vld [vmem:[%s3968_s2 + $0x40] sm:$0xff]  ;;  %v4009_v9 = vld [vmem:[%s3968_s2 + $0x48] sm:$0xff]  ;;  %v3254_v10 = vld [vmem:[#allocation6 + $0x38] sm:$0xff]  ;;  %vm838_vm3 = vsmask.f32 256  ;;  %p2774_p1 = scmp.ne.s32.totalorder %s3770_s21, 0 }
  0x46   : > { %v3262_v11 = vld [vmem:[#allocation6 + $0x78] sm:$0xff]  ;;  %663 = vmatpush.bf16.msra.mxu0 %v3254_v10  ;;  %v3253_v14 = vld [vmem:[#allocation6 + $0x30] sm:$0xff]  ;;  %v3252_v18 = vld [vmem:[#allocation6 + $0x28] sm:$0xff] }
  0x47   : > { %v3270_v12 = vld [vmem:[#allocation6 + $0xb8] sm:$0xff]  ;;  %687 = vmatpush.bf16.msra.mxu1 %v3262_v11  ;;  %v3261_v15 = vld [vmem:[#allocation6 + $0x70] sm:$0xff]  ;;  %v3260_v19 = vld [vmem:[#allocation6 + $0x68] sm:$0xff] }
  0x48   : > { %v3278_v13 = vld [vmem:[#allocation6 + $0xf8] sm:$0xff]  ;;  %711 = vmatpush.bf16.msra.mxu2 %v3270_v12  ;;  %v3269_v16 = vld [vmem:[#allocation6 + $0xb0] sm:$0xff]  ;;  %v3268_v20 = vld [vmem:[#allocation6 + $0xa8] sm:$0xff] }
  0x49   : > { %735 = vmatpush.bf16.msra.mxu3 %v3278_v13  ;;  %v3277_v17 = vld [vmem:[#allocation6 + $0xf0] sm:$0xff]  ;;  %v3276_v21 = vld [vmem:[#allocation6 + $0xe8] sm:$0xff]  ;;  %v3251_v22 = vld [vmem:[#allocation6 + $0x20] sm:$0xff] }
  0x4a   : > { %664 = vmatpush.bf16.msra.mxu0 %v3253_v14  ;;  %v3259_v23 = vld [vmem:[#allocation6 + $0x60] sm:$0xff]  ;;  %v3250_v26 = vld [vmem:[#allocation6 + $0x18] sm:$0xff]  ;;  %v3249_v30 = vld [vmem:[#allocation6 + $0x10] sm:$0xff] }
  0x4b   : > { %688 = vmatpush.bf16.msra.mxu1 %v3261_v15  ;;  %v3267_v24 = vld [vmem:[#allocation6 + $0xa0] sm:$0xff]  ;;  %v3258_v27 = vld [vmem:[#allocation6 + $0x58] sm:$0xff]  ;;  %v3257_v31 = vld [vmem:[#allocation6 + $0x50] sm:$0xff] }
  0x4c   : > { %712 = vmatpush.bf16.msra.mxu2 %v3269_v16  ;;  %v3275_v25 = vld [vmem:[#allocation6 + $0xe0] sm:$0xff]  ;;  %v3266_v28 = vld [vmem:[#allocation6 + $0x98] sm:$0xff]  ;;  %v3265_v32 = vld [vmem:[#allocation6 + $0x90] sm:$0xff] }
  0x4d   : > { %736 = vmatpush.bf16.msra.mxu3 %v3277_v17  ;;  %v3274_v29 = vld [vmem:[#allocation6 + $0xd8] sm:$0xff]  ;;  %v3273_v33 = vld [vmem:[#allocation6 + $0xd0] sm:$0xff]  ;;  %v3248_v34 = vld [vmem:[#allocation6 + $0x8] sm:$0xff] }
  0x4e   : > { %665 = vmatpush.bf16.msra.mxu0 %v3252_v18  ;;  %v3256_v35 = vld [vmem:[#allocation6 + $0x48] sm:$0xff]  ;;  %v3247_v38 = vld [vmem:[#allocation6] sm:$0xff]  ;;  %v3237_v43 = vld [vmem:[%s3968_s2 + $0xc] sm:$0xf0] }
  0x4f   : > { %689 = vmatpush.bf16.msra.mxu1 %v3260_v19  ;;  %v3264_v36 = vld [vmem:[#allocation6 + $0x88] sm:$0xff]  ;;  %v3255_v39 = vld [vmem:[#allocation6 + $0x40] sm:$0xff]  ;;  %v2602_v45 = vld [vmem:[%s3968_s2 + $0x10] sm:$0xf0] }
  0x50   : > { %713 = vmatpush.bf16.msra.mxu2 %v3268_v20  ;;  %v3272_v37 = vld [vmem:[#allocation6 + $0xc8] sm:$0xff]  ;;  %v3263_v40 = vld [vmem:[#allocation6 + $0x80] sm:$0xff]  ;;  %v3238_v47 = vld [vmem:[%s3968_s2 + $0x14] sm:$0xf0] }
  0x51   : > { %737 = vmatpush.bf16.msra.mxu3 %v3276_v21  ;;  %v3271_v41 = vld [vmem:[#allocation6 + $0xc0] sm:$0xff]  ;;  %v2608_v46 = vld [vmem:[%s3968_s2 + $0x8] sm:$0xf]  ;;  %v3236_v48 = vld [vmem:[%s3968_s2 + $0xc] sm:$0xf] }
  0x52   : > { %666 = vmatpush.bf16.msra.mxu0 %v3251_v22  ;;  %v2600_v42 = vld [vmem:[%s3968_s2] sm:$0xf]  ;;  %v3235_v44 = vld [vmem:[%s3968_s2 + $0x4] sm:$0xf]  ;;  %v2610_v49 = vld [vmem:[%s3968_s2 + $0x18] sm:$0xf0]  ;;  %v2609_v52 = vor.u32 %v3238_v47, %v2608_v46 }
  0x53   : > { %690 = vmatpush.bf16.msra.mxu1 %v3259_v23  ;;  %v2601_v50 = vor.u32 %v3237_v43, %v2600_v42  ;;  %v2605_v51 = vor.u32 %v3235_v44, %v2602_v45  ;;  %v2613_v53 = vor.u32 %v3236_v48, %v2610_v49  ;;  %v2616_v54 = vld [vmem:[%s3968_s2 + $0x20] sm:$0xf]  ;;  %v3241_v55 = vld [vmem:[%s3968_s2 + $0x2c] sm:$0xf0]  ;;  %v3239_v56 = vld [vmem:[%s3968_s2 + $0x24] sm:$0xf] }
  0x54   : > { %714 = vmatpush.bf16.msra.mxu2 %v3267_v24  ;;  %v2618_v57 = vld [vmem:[%s3968_s2 + $0x30] sm:$0xf0]  ;;  %v2624_v58 = vld [vmem:[%s3968_s2 + $0x28] sm:$0xf]  ;;  %v3242_v59 = vld [vmem:[%s3968_s2 + $0x34] sm:$0xf0]  ;;  %v2617_v62 = vor.u32 %v3241_v55, %v2616_v54 }
  0x55   : > { %738 = vmatpush.bf16.msra.mxu3 %v3275_v25  ;;  %v3240_v60 = vld [vmem:[%s3968_s2 + $0x2c] sm:$0xf]  ;;  %v2626_v61 = vld [vmem:[%s3968_s2 + $0x38] sm:$0xf0]  ;;  %v2621_v63 = vor.u32 %v3239_v56, %v2618_v57  ;;  %v2625_v10 = vor.u32 %v3242_v59, %v2624_v58  ;;  %v2632_v12 = vld [vmem:[%s3968_s2 + $0x40] sm:$0xf] }
  0x56   : > { %667 = vmatpush.bf16.msra.mxu0 %v3250_v26  ;;  %v2629_v11 = vor.u32 %v3240_v60, %v2626_v61  ;;  %v3245_v13 = vld [vmem:[%s3968_s2 + $0x4c] sm:$0xf0]  ;;  %v3243_v14 = vld [vmem:[%s3968_s2 + $0x44] sm:$0xf]  ;;  %v2634_v15 = vld [vmem:[%s3968_s2 + $0x50] sm:$0xf0] }
  0x57   : > { %691 = vmatpush.bf16.msra.mxu1 %v3258_v27  ;;  %v2640_v16 = vld [vmem:[%s3968_s2 + $0x48] sm:$0xf]  ;;  %v3246_v17 = vld [vmem:[%s3968_s2 + $0x54] sm:$0xf0]  ;;  %v3244_v18 = vld [vmem:[%s3968_s2 + $0x4c] sm:$0xf]  ;;  %v2633_v20 = vor.u32 %v3245_v13, %v2632_v12  ;;  %v2637_v21 = vor.u32 %v3243_v14, %v2634_v15 }
  0x58   : > { %715 = vmatpush.bf16.msra.mxu2 %v3266_v28  ;;  %v2642_v19 = vld [vmem:[%s3968_s2 + $0x58] sm:$0xf0]  ;;  %v2641_v22 = vor.u32 %v3246_v17, %v2640_v16  ;;  %v4035_v24 = vld [vmem:[#allocation11] ss:$0 sm:$0xff]  ;;  %vm4041_vm4 = vmand %vm831_vm0, %vm832_vm1 }
  0x59   : > { %739 = vmatpush.bf16.msra.mxu3 %v3274_v29  ;;  %v2645_v23 = vor.u32 %v3244_v18, %v2642_v19  ;;  %vm4046_vm5 = vmand %vm837_vm2, %vm838_vm3  ;;  %v843_v16 = vld [vmem:[#allocation2 + $0x8] sm:$0xf]  ;;  %v846_v19 = vld [vmem:[#allocation2 + $0xc] sm:$0x1] }
  0x5a   : > { %668 = vmatpush.bf16.msra.mxu0 %v3249_v30  ;;  %vm4057_vm6 = vmand %vm837_vm2, %vm832_vm1 }
  0x5b   : > { %692 = vmatpush.bf16.msra.mxu1 %v3257_v31 }
  0x5c   : > { %716 = vmatpush.bf16.msra.mxu2 %v3265_v32 }
  0x5d   : > { %740 = vmatpush.bf16.msra.mxu3 %v3273_v33 }
  0x5e   : > { %669 = vmatpush.bf16.msra.mxu0 %v3248_v34 }
  0x5f   : > { %693 = vmatpush.bf16.msra.mxu1 %v3256_v35 }
  0x60   : > { %717 = vmatpush.bf16.msra.mxu2 %v3264_v36 }
  0x61   : > { %741 = vmatpush.bf16.msra.mxu3 %v3272_v37 }
  0x62   : > { %670 = vmatpush.bf16.msra.mxu0 %v3247_v38 }
  0x63   : > { %694 = vmatpush.bf16.msra.mxu1 %v3255_v39 }
  0x64   : > { %718 = vmatpush.bf16.msra.mxu2 %v3263_v40 }
  0x65   : > { %742 = vmatpush.bf16.msra.mxu3 %v3271_v41  ;;  %671 = vmatmul.bf16.vlgmr.msra.gmra.mxu0 %v2601_v50  ;;  %v834_v50 = vld [vmem:[#allocation2] sm:$0xf] }
  0x66   : > { %695 = vmatmul.bf16.vlgmr.msra.gmra.mxu1 %v2605_v51 }
  0x67   : > { %719 = vmatmul.bf16.vlgmr.msra.gmra.mxu2 %v2609_v52  ;;  %v840_v52 = vld [vmem:[#allocation2 + $0x4] sm:$0x1] }
  0x68   : > { %743 = vmatmul.bf16.vlgmr.msra.gmra.mxu3 %v2613_v53 }
  0x75   : > { %676 = vmatmul.bf16.gmra.mxu0 %v2617_v62 }
  0x76   : > { %700 = vmatmul.bf16.gmra.mxu1 %v2621_v63 }
  0x77   : > { %724 = vmatmul.bf16.gmra.mxu2 %v2625_v10 }
  0x78   : > { %748 = vmatmul.bf16.gmra.mxu3 %v2629_v11 }
  0x85   : > { %681 = vmatmul.bf16.gmra.mxu0 %v2633_v20 }
  0x86   : > { %705 = vmatmul.bf16.gmra.mxu1 %v2637_v21 }
  0x87   : > { %729 = vmatmul.bf16.gmra.mxu2 %v2641_v22 }
  0x88   : > { %753 = vmatmul.bf16.gmra.mxu3 %v2645_v23 }
  0xe2   : > { %v672_v25 = vpop.f32.mrf.mxu0 }
  0xe3   : > { %v696_v26 = vpop.f32.mrf.mxu1  ;;  %v673_v27 = vadd.f32 %v4035_v24, %v672_v25 }
  0xe5   : > { %v697_v28 = vadd.f32 %v696_v26, %v673_v27 }
  0xea   : > { %v720_v29 = vpop.f32.mrf.mxu2  ;;  %v674_v32 = vpop.f32.mrf.mxu0 }
  0xeb   : > { %v744_v30 = vpop.f32.mrf.mxu3  ;;  %v721_v31 = vadd.f32 %v720_v29, %v697_v28  ;;  %v698_v33 = vpop.f32.mrf.mxu1  ;;  %v675_v35 = vadd.f32 %v4035_v24, %v674_v32 }
  0xed   : > { %v745_v34 = vadd.f32 %v744_v30, %v721_v31  ;;  %v699_v38 = vadd.f32 %v698_v33, %v675_v35 }
  0xef   : > { %v759_v36 = vmax.f32 %v745_v34, 0.0 }
  0xf1   : > { %v765_v37 = vpack.c.bf16 %v759_v36, %v759_v36 }
  0xf2   : > { %v722_v39 = vpop.f32.mrf.mxu2  ;;  %v677_v43 = vpop.f32.mrf.mxu0 }
  0xf3   : > { %v746_v40 = vpop.f32.mrf.mxu3  ;;  %v772_v41 = vshrl.u32 %v765_v37, 16  ;;  %v723_v42 = vadd.f32 %v722_v39, %v699_v38  ;;  %v701_v44 = vpop.f32.mrf.mxu1  ;;  %v678_v45 = vadd.f32 %v4035_v24, %v677_v43  ;;  %v775_v47 = vshll.u32 %v765_v37, 16 }
  0xf5   : > { %v774_v46 = vrot.slane %v772_v41, 7  ;;  %v747_v49 = vadd.f32 %v746_v40, %v723_v42  ;;  %v702_v56 = vadd.f32 %v701_v44, %v678_v45  ;;  %v849_v40 = vld [vmem:[#allocation2 + $0x10] sm:$0xf]  ;;  %v852_v41 = vld [vmem:[#allocation2 + $0x14] sm:$0x1] }
  0xf7   : > { %v777_v53 = vor.u32 %v775_v47, %v774_v46  ;;  %v778_v54 = vrot.slane %v774_v46, 4  ;;  %v760_v55 = vmax.f32 %v747_v49, 0.0 }
  0xf9   : > { %v835_v57 = vsel %vm4041_vm4, %v777_v53, %v834_v50  ;;  %v841_v58 = vsel %vm4046_vm5, %v778_v54, %v840_v52  ;;  %v766_v59 = vpack.c.bf16 %v760_v55, %v760_v55 }
  0xfa   : > { %836 = vst [vmem:[#allocation2] sm:$0xf] %v835_v57  ;;  %v725_v60 = vpop.f32.mrf.mxu2  ;;  %v679_v10 = vpop.f32.mrf.mxu0 }
  0xfb   : > { %v749_v61 = vpop.f32.mrf.mxu3  ;;  %842 = vst [vmem:[#allocation2 + $0x4] sm:$0x1] %v841_v58  ;;  %v780_v62 = vshrl.u32 %v766_v59, 16  ;;  %v726_v63 = vadd.f32 %v725_v60, %v702_v56  ;;  %v703_v11 = vpop.f32.mrf.mxu1  ;;  %v783_v13 = vshll.u32 %v766_v59, 16  ;;  %v680_v15 = vadd.f32 %v4035_v24, %v679_v10 }
  0xfd   : > { %v782_v12 = vrot.slane %v780_v62, 7  ;;  %v750_v14 = vadd.f32 %v749_v61, %v726_v63  ;;  %v704_v26 = vadd.f32 %v703_v11, %v680_v15  ;;  %v855_v11 = vld [vmem:[#allocation2 + $0x18] sm:$0xf] }
  0xff   : > { %v785_v17 = vor.u32 %v783_v13, %v782_v12  ;;  %v786_v18 = vrot.slane %v782_v12, 4  ;;  %v761_v20 = vmax.f32 %v750_v14, 0.0  ;;  %v858_v12 = vld [vmem:[#allocation2 + $0x1c] sm:$0x1] }
 0x101   : > { %v873_v22 = vld [vmem:[#allocation2] sm:$0x1]  ;;  %v844_v23 = vsel %vm4041_vm4, %v785_v17, %v843_v16  ;;  %v767_v25 = vpack.c.bf16 %v761_v20, %v761_v20  ;;  %v847_v29 = vsel %vm4046_vm5, %v786_v18, %v846_v19 }
 0x102   : > { %v874_v27 = vsel %vm4046_vm5, 0, %v873_v22  ;;  %v892_v28 = vld [vmem:[#allocation2 + $0x4] sm:$0x1]  ;;  %845 = vst [vmem:[#allocation2 + $0x8] sm:$0xf] %v844_v23  ;;  %v727_v30 = vpop.f32.mrf.mxu2  ;;  %v682_v35 = vpop.f32.mrf.mxu0 }
 0x103   : > { %v751_v31 = vpop.f32.mrf.mxu3  ;;  %875 = vst [vmem:[#allocation2] sm:$0x1] %v874_v27  ;;  %v893_v32 = vsel %vm4057_vm6, 0, %v892_v28  ;;  %v788_v33 = vshrl.u32 %v767_v25, 16  ;;  %v728_v34 = vadd.f32 %v727_v30, %v704_v26  ;;  %v683_v36 = vadd.f32 %v4035_v24, %v682_v35  ;;  %v706_v42 = vpop.f32.mrf.mxu1 }
 0x104   : > { %894 = vst [vmem:[#allocation2 + $0x4] sm:$0x1] %v893_v32  ;;  %v791_v38 = vshll.u32 %v767_v25, 16 }
 0x105   : > { %848 = vst [vmem:[#allocation2 + $0xc] sm:$0x1] %v847_v29  ;;  %v790_v37 = vrot.slane %v788_v33, 7  ;;  %v752_v39 = vadd.f32 %v751_v31, %v728_v34  ;;  %v707_v46 = vadd.f32 %v706_v42, %v683_v36  ;;  %v861_v33 = vld [vmem:[#allocation2 + $0x20] sm:$0xf] }
 0x106   : > { %v864_v34 = vld [vmem:[#allocation2 + $0x24] sm:$0x1] }
 0x107   : > { %v793_v43 = vor.u32 %v791_v38, %v790_v37  ;;  %v794_v44 = vrot.slane %v790_v37, 4  ;;  %v762_v45 = vmax.f32 %v752_v39, 0.0 }
 0x109   : > { %v876_v47 = vld [vmem:[#allocation2 + $0x8] sm:$0x1]  ;;  %v850_v49 = vsel %vm4041_vm4, %v793_v43, %v849_v40  ;;  %v853_v50 = vsel %vm4046_vm5, %v794_v44, %v852_v41  ;;  %v768_v52 = vpack.c.bf16 %v762_v45, %v762_v45 }
 0x10a   : > { %v877_v53 = vsel %vm4046_vm5, 0, %v876_v47  ;;  %851 = vst [vmem:[#allocation2 + $0x10] sm:$0xf] %v850_v49  ;;  %v730_v54 = vpop.f32.mrf.mxu2  ;;  %v684_v58 = vpop.f32.mrf.mxu0  ;;  %v867_v49 = vld [vmem:[#allocation2 + $0x28] sm:$0xf] }
 0x10b   : > { %v754_v55 = vpop.f32.mrf.mxu3  ;;  %878 = vst [vmem:[#allocation2 + $0x8] sm:$0x1] %v877_v53  ;;  %v796_v56 = vshrl.u32 %v768_v52, 16  ;;  %v731_v57 = vadd.f32 %v730_v54, %v707_v46  ;;  %v799_v60 = vshll.u32 %v768_v52, 16  ;;  %v685_v10 = vadd.f32 %v4035_v24, %v684_v58  ;;  %v708_v16 = vpop.f32.mrf.mxu1 }
 0x10c   : > { %v895_v59 = vld [vmem:[#allocation2 + $0xc] sm:$0x1]  ;;  %854 = vst [vmem:[#allocation2 + $0x14] sm:$0x1] %v853_v50 }
 0x10d   : > { %v896_v61 = vsel %vm4057_vm6, 0, %v895_v59  ;;  %v798_v62 = vrot.slane %v796_v56, 7  ;;  %v755_v63 = vadd.f32 %v754_v55, %v731_v57  ;;  %v709_v22 = vadd.f32 %v708_v16, %v685_v10  ;;  %v870_v50 = vld [vmem:[#allocation2 + $0x2c] sm:$0x1] }
 0x10e   : > { %897 = vst [vmem:[#allocation2 + $0xc] sm:$0x1] %v896_v61 }
 0x10f   : > { %v801_v13 = vor.u32 %v799_v60, %v798_v62  ;;  %v802_v14 = vrot.slane %v798_v62, 4  ;;  %v763_v15 = vmax.f32 %v755_v63, 0.0 }
 0x111   : > { %v879_v17 = vld [vmem:[#allocation2 + $0x10] sm:$0x1]  ;;  %v856_v18 = vsel %vm4041_vm4, %v801_v13, %v855_v11  ;;  %v859_v19 = vsel %vm4046_vm5, %v802_v14, %v858_v12  ;;  %v769_v20 = vpack.c.bf16 %v763_v15, %v763_v15 }
 0x112   : > { %v880_v23 = vsel %vm4046_vm5, 0, %v879_v17  ;;  %857 = vst [vmem:[#allocation2 + $0x18] sm:$0xf] %v856_v18  ;;  %v732_v24 = vpop.f32.mrf.mxu2 }
 0x113   : > { %881 = vst [vmem:[#allocation2 + $0x10] sm:$0x1] %v880_v23  ;;  %v898_v25 = vld [vmem:[#allocation2 + $0x14] sm:$0x1]  ;;  %v804_v26 = vshrl.u32 %v769_v20, 16  ;;  %v733_v27 = vadd.f32 %v732_v24, %v709_v22  ;;  %v756_v29 = vpop.f32.mrf.mxu3  ;;  %v807_v31 = vshll.u32 %v769_v20, 16 }
 0x114   : > { %v899_v28 = vsel %vm4057_vm6, 0, %v898_v25  ;;  %860 = vst [vmem:[#allocation2 + $0x1c] sm:$0x1] %v859_v19 }
 0x115   : > { %900 = vst [vmem:[#allocation2 + $0x14] sm:$0x1] %v899_v28  ;;  %v806_v30 = vrot.slane %v804_v26, 7  ;;  %v757_v32 = vadd.f32 %v756_v29, %v733_v27 }
 0x117   : > { %v809_v35 = vor.u32 %v807_v31, %v806_v30  ;;  %v810_v36 = vrot.slane %v806_v30, 4  ;;  %v764_v37 = vmax.f32 %v757_v32, 0.0 }
 0x119   : > { %v882_v38 = vld [vmem:[#allocation2 + $0x18] sm:$0x1]  ;;  %v862_v39 = vsel %vm4041_vm4, %v809_v35, %v861_v33  ;;  %v865_v40 = vsel %vm4046_vm5, %v810_v36, %v864_v34  ;;  %v770_v41 = vpack.c.bf16 %v764_v37, %v764_v37 }
 0x11a   : > { %v883_v42 = vsel %vm4046_vm5, 0, %v882_v38  ;;  %863 = vst [vmem:[#allocation2 + $0x20] sm:$0xf] %v862_v39 }
 0x11b   : > { %884 = vst [vmem:[#allocation2 + $0x18] sm:$0x1] %v883_v42  ;;  %v901_v43 = vld [vmem:[#allocation2 + $0x1c] sm:$0x1]  ;;  %v812_v44 = vshrl.u32 %v770_v41, 16  ;;  %v815_v47 = vshll.u32 %v770_v41, 16 }
 0x11c   : > { %v902_v45 = vsel %vm4057_vm6, 0, %v901_v43  ;;  %866 = vst [vmem:[#allocation2 + $0x24] sm:$0x1] %v865_v40 }
 0x11d   : > { %903 = vst [vmem:[#allocation2 + $0x1c] sm:$0x1] %v902_v45  ;;  %v814_v46 = vrot.slane %v812_v44, 7 }
 0x11f   : > { %v817_v52 = vor.u32 %v815_v47, %v814_v46  ;;  %v818_v53 = vrot.slane %v814_v46, 4 }
 0x121   : > { %v885_v54 = vld [vmem:[#allocation2 + $0x20] sm:$0x1]  ;;  %v868_v55 = vsel %vm4041_vm4, %v817_v52, %v867_v49  ;;  %v871_v56 = vsel %vm4046_vm5, %v818_v53, %v870_v50 }
 0x122   : > { %v886_v57 = vsel %vm4046_vm5, 0, %v885_v54  ;;  %869 = vst [vmem:[#allocation2 + $0x28] sm:$0xf] %v868_v55 }
 0x123   : > { %887 = vst [vmem:[#allocation2 + $0x20] sm:$0x1] %v886_v57  ;;  %v904_v58 = vld [vmem:[#allocation2 + $0x24] sm:$0x1] }
 0x124   : > { %v905_v59 = vsel %vm4057_vm6, 0, %v904_v58  ;;  %872 = vst [vmem:[#allocation2 + $0x2c] sm:$0x1] %v871_v56 }
 0x125   : > { %906 = vst [vmem:[#allocation2 + $0x24] sm:$0x1] %v905_v59 }
 0x129   : > { %v888_v60 = vld [vmem:[#allocation2 + $0x28] sm:$0x1]  ;;  %913 = sbr.rel (%p2774_p1) target bundleno = 305 (0x131), region = 64 }
 0x12a   : > { %v889_v48 = vsel %vm4046_vm5, 0, %v888_v60 }
 0x12b   : > { %890 = vst [vmem:[#allocation2 + $0x28] sm:$0x1] %v889_v48  ;;  %v907_v61 = vld [vmem:[#allocation2 + $0x2c] sm:$0x1] }
 0x12c   : > { %v908_v62 = vsel %vm4057_vm6, 0, %v907_v61 }
 0x12d   : > { %909 = vst [vmem:[#allocation2 + $0x2c] sm:$0x1] %v908_v62 }
 0x12e   : > { %v3796_v63 = vmov 0  }
 0x12f   : > { %914 = vst [vmem:[#allocation2] sm:$0xf] %v3796_v63 }
 0x130   : > { %915 = vst [vmem:[#allocation2 + $0x4] sm:$0x1] %v3796_v63 }
 0x131 PF: > { %p2775_p3 = scmp.ne.s32.totalorder %s3770_s21, 1 }
 0x133   : > { %919 = sbr.rel (%p2775_p3) target bundleno = 315 (0x13b), region = 68 }
 0x138   : > { %v3797_v51 = vmov 0  }
 0x139   : > { %921 = vst [vmem:[#allocation2 + $0x28] sm:$0xf] %v3797_v51 }
 0x13a   : > { %922 = vst [vmem:[#allocation2 + $0x2c] sm:$0x1] %v3797_v51 }
 0x13b PF: > { %v3296_v21 = vld [vmem:[#allocation8 + $0x78] sm:$0xff]  ;;  %v3295_v13 = vld [vmem:[#allocation8 + $0x70] sm:$0xff]  ;;  %v3294_v17 = vld [vmem:[#allocation8 + $0x68] sm:$0xff]  ;;  %vm947_vm7 = vsmask.f32 3328  ;;  %vm1189_vm9 = vcmask 1042432  }
 0x13c   : > { %v3288_v10 = vld [vmem:[#allocation8 + $0x38] sm:$0xff]  ;;  %1079 = vmatpush.bf16.msrb.mxu0 %v3296_v21  ;;  %v3287_v14 = vld [vmem:[#allocation8 + $0x30] sm:$0xff]  ;;  %v3286_v18 = vld [vmem:[#allocation8 + $0x28] sm:$0xff]  ;;  %vm948_vm8 = vsmask.f32 7440  ;;  %vm1190_vm10 = vcmask 1046532  }
 0x13d   : > { %v3304_v11 = vld [vmem:[#allocation8 + $0xb8] sm:$0xff]  ;;  %1158 = vmatpush.bf16.msrb.mxu1 %v3288_v10  ;;  %v3303_v15 = vld [vmem:[#allocation8 + $0xb0] sm:$0xff]  ;;  %v3302_v19 = vld [vmem:[#allocation8 + $0xa8] sm:$0xff]  ;;  %s3389_s25 = sshll.u32 %s3770_s21, 4  ;;  %s3231_s28 = sshll.u32 %s3774_s22, 5 }
 0x13e   : > { %v3314_v12 = vld [vmem:[#allocation8 + $0xf8] sm:$0xff]  ;;  %1281 = vmatpush.bf16.msrb.mxu2 %v3304_v11  ;;  %v3313_v16 = vld [vmem:[#allocation8 + $0xf0] sm:$0xff]  ;;  %v3312_v20 = vld [vmem:[#allocation8 + $0xe8] sm:$0xff]  ;;  %s2449_s29 = sadd.s32 %s3389_s25, %s3231_s28  ;;  %s2452_s14 = sshll.u32 %s4109_s23, 4  ;;  %s2453_s14 = int_to_ptr.vmem [resolvable:$true] %s2452_s14 }
 0x13f   : > { %1386 = vmatpush.bf16.msrb.mxu3 %v3314_v12  ;;  %v3293_v22 = vld [vmem:[#allocation8 + $0x60] sm:$0xff]  ;;  %v923_v26 = vld [vmem:[#allocation2] sm:$0xf]  ;;  %v924_v27 = vld [vmem:[#allocation2 + $0x8] sm:$0xf]  ;;  %s3232_s21 = sshll.u32 %s2449_s29, 3 }
 0x140   : > { %1080 = vmatpush.bf16.msrb.mxu0 %v3295_v13  ;;  %v3285_v23 = vld [vmem:[#allocation8 + $0x20] sm:$0xff]  ;;  %v943_v28 = vld [vmem:[#allocation2 + $0x4] sm:$0x1]  ;;  %v944_v29 = vld [vmem:[#allocation2 + $0xc] sm:$0x1]  ;;  %v951_v30 = vshrl.u32 %v923_v26, 16  ;;  %s2451_s9 = scalar_lea.hbm %s4395_s5, %s3232_s21 }
 0x141   : > { %1159 = vmatpush.bf16.msrb.mxu1 %v3287_v14  ;;  %v3301_v24 = vld [vmem:[#allocation8 + $0xa0] sm:$0xff]  ;;  %v954_v31 = vshll.u32 %v923_v26, 16  ;;  %v965_v32 = vshrl.u32 %v924_v27, 16  ;;  %v960_v33 = vshll.u32 %v943_v28, 16  ;;  %v968_v34 = vshll.u32 %v924_v27, 16  ;;  %v3292_v35 = vld [vmem:[#allocation8 + $0x58] sm:$0xff]  ;;  %vm4115_vm11 = vmor %vm947_vm7, %vm948_vm8 }
 0x142   : > { %1282 = vmatpush.bf16.msrb.mxu2 %v3303_v15  ;;  %v3311_v25 = vld [vmem:[#allocation8 + $0xe0] sm:$0xff]  ;;  %v3284_v36 = vld [vmem:[#allocation8 + $0x18] sm:$0xff]  ;;  %v953_v37 = vrot.slane %v951_v30, 4  ;;  %v974_v40 = vshll.u32 %v944_v29, 16  ;;  %v1177_v44 = vld [vmem:[#allocation2] sm:$0xe] }
 0x143   : > { %1387 = vmatpush.bf16.msrb.mxu3 %v3313_v16  ;;  %v956_v38 = vrot.slane %v954_v31, 5  ;;  %v967_v39 = vrot.slane %v965_v32, 4  ;;  %v3300_v41 = vld [vmem:[#allocation8 + $0x98] sm:$0xff]  ;;  %v970_v43 = vrot.slane %v968_v34, 5  ;;  %v3291_v49 = vld [vmem:[#allocation8 + $0x50] sm:$0xff]  ;;  %v962_v53 = vrot.slane %v960_v33, 5  ;;  %vm4121_vm12 = vmor %vm1189_vm9, %vm1190_vm10 }
 0x144   : > { %1081 = vmatpush.bf16.msrb.mxu0 %v3294_v17  ;;  %v3310_v42 = vld [vmem:[#allocation8 + $0xd8] sm:$0xff]  ;;  %v3283_v50 = vld [vmem:[#allocation8 + $0x10] sm:$0xff]  ;;  %v976_v54 = vrot.slane %v974_v40, 5  ;;  %v2848_v55 = vrot.slane %v1177_v44, 9  ;;  %v1194_v60 = vrot.slane %v943_v28, 5  ;;  %v1198_v61 = vrot.slane %v944_v29, 5 }
 0x145   : > { %1160 = vmatpush.bf16.msrb.mxu1 %v3286_v18  ;;  %v957_v45 = vor.u32 %v956_v38, %v953_v37  ;;  %v1178_v46 = vld [vmem:[#allocation2 + $0x8] sm:$0xe]  ;;  %v971_v47 = vor.u32 %v970_v43, %v967_v39  ;;  %v3299_v56 = vld [vmem:[#allocation8 + $0x90] sm:$0xff]  ;;  %v925_v63 = vld [vmem:[#allocation2 + $0x10] sm:$0xf]  ;;  %s2454_s1 = sshll.u32 %s2451_s9, 4  ;;  %s2455_s1 = int_to_ptr.hbm [resolvable:$true] %s2454_s1 }
 0x146   : > { %1283 = vmatpush.bf16.msrb.mxu2 %v3302_v19  ;;  %v3309_v57 = vld [vmem:[#allocation8 + $0xd0] sm:$0xff]  ;;  %v2849_v48 = vrot.slane %v1178_v46, 9  ;;  %v926_v51 = vld [vmem:[#allocation2 + $0x18] sm:$0xf]  ;;  %v979_v13 = vshrl.u32 %v925_v63, 16  ;;  %v982_v14 = vshll.u32 %v925_v63, 16  ;;  %v1195_v17 = vsel %vm4121_vm12, %v2848_v55, %v1194_v60 }
 0x147   : > { %1388 = vmatpush.bf16.msrb.mxu3 %v3312_v20  ;;  %v958_v52 = vrot.slane %v957_v45, 4  ;;  %v972_v59 = vrot.slane %v971_v47, 4  ;;  %v3290_v21 = vld [vmem:[#allocation8 + $0x48] sm:$0xff]  ;;  %v993_v19 = vshrl.u32 %v926_v51, 16  ;;  %v996_v20 = vshll.u32 %v926_v51, 16  ;;  %v3297_v32 = vld [vmem:[#allocation8 + $0x80] sm:$0xff] }
 0x148   : > { %1082 = vmatpush.bf16.msrb.mxu0 %v3293_v22  ;;  %v3282_v10 = vld [vmem:[#allocation8 + $0x8] sm:$0xff]  ;;  %v1199_v18 = vsel %vm4121_vm12, %v2849_v48, %v1198_v61  ;;  %v3289_v22 = vld [vmem:[#allocation8 + $0x40] sm:$0xff]  ;;  %v2810_v33 = vld [vmem:[#allocation2] sm:$0xf]  ;;  %s2437_s16 = scalar_lea.sflag [#allocation5], %s3964_s26  ;;  %s3694_s12 = sshra.s32 %s2455_s1, 4  ;;  %s3695_s12 = int_to_ptr.hbm [resolvable:$true] %s3694_s12 }
 0x149   : > { %1161 = vmatpush.bf16.msrb.mxu1 %v3285_v23  ;;  %v963_v11 = vsel %vm4115_vm11, %v958_v52, %v962_v53  ;;  %v977_v12 = vsel %vm4115_vm11, %v972_v59, %v976_v54  ;;  %v3298_v15 = vld [vmem:[#allocation8 + $0x88] sm:$0xff]  ;;  %v3281_v23 = vld [vmem:[#allocation8] sm:$0xff]  ;;  %v995_v30 = vrot.slane %v993_v19, 4  ;;  %v998_v31 = vrot.slane %v996_v20, 5  ;;  %v3279_v34 = vld [vmem:[#allocation2 + $0x4] sm:$0xf0]  ;;  %p3701_p12 = scmp.lt.s32.totalorder %s3695_s12, %s4395_s5 }
 0x14a   : > { %1284 = vmatpush.bf16.msrb.mxu2 %v3301_v24  ;;  %v3308_v16 = vld [vmem:[#allocation8 + $0xc8] sm:$0xff]  ;;  %v981_v24 = vrot.slane %v979_v13, 4  ;;  %v1023_v26 = vunpack.c.l.b16 %v963_v11  ;;  %v1024_v27 = vunpack.c.l.b16 %v977_v12  ;;  %v4133_v28 = vld [vmem:[#allocation2 + $0x14] sm:$0x1]  ;;  %v2886_v38 = vld [vmem:[#allocation2 + $0x8] sm:$0xf]  ;;  %v2811_v47 = vor.u32 %v3279_v34, %v2810_v33 }
 0x14b   : > { %1389 = vmatpush.bf16.msrb.mxu3 %v3311_v25  ;;  %v984_v25 = vrot.slane %v982_v14, 5  ;;  %v4135_v29 = vld [vmem:[#allocation2 + $0x1c] sm:$0x1]  ;;  %v3307_v37 = vld [vmem:[#allocation8 + $0xc0] sm:$0xff]  ;;  %v3322_v40 = vld [vmem:[#allocation8 + $0x138] sm:$0xff]  ;;  %v988_v43 = vshll.u32 %v4133_v28, 16  ;;  %v999_v44 = vor.u32 %v998_v31, %v995_v30 }
 0x14c   : > { %1083 = vmatpush.bf16.msrb.mxu0 %v3292_v35  ;;  %v1225_v35 = vunpack.c.l.b16 %v1195_v17  ;;  %v3305_v39 = vld [vmem:[#allocation2 + $0xc] sm:$0xf0]  ;;  %v1002_v45 = vshll.u32 %v4135_v29, 16  ;;  %v1027_v46 = vpack.c.b16 %v1024_v27, %v1023_v26  ;;  %v3330_v52 = vld [vmem:[#allocation8 + $0x178] sm:$0xff]  ;;  %v3321_v54 = vld [vmem:[#allocation8 + $0x130] sm:$0xff]  ;;  %v1202_v12 = vrot.slane %v4133_v28, 5 }
 0x14d   : > { %1162 = vmatpush.bf16.msrb.mxu1 %v3284_v36  ;;  %v1226_v36 = vunpack.c.l.b16 %v1199_v18  ;;  %v3348_v53 = vld [vmem:[#allocation8 + $0x1f8] sm:$0xff]  ;;  %v3339_v55 = vld [vmem:[#allocation8 + $0x1b0] sm:$0xff]  ;;  %v990_v59 = vrot.slane %v988_v43, 5  ;;  %v1000_v60 = vrot.slane %v999_v44, 4  ;;  %v1180_v61 = vld [vmem:[#allocation2 + $0x18] sm:$0xe] }
 0x14e   : > { %1285 = vmatpush.bf16.msrb.mxu2 %v3300_v41  ;;  %v3340_v41 = vld [vmem:[#allocation8 + $0x1b8] sm:$0xff]  ;;  %v1004_v48 = vrot.slane %v1002_v45, 5  ;;  %v1411_v51 = vld [vmem:[#allocation2 + $0x10] sm:$0xf]  ;;  %v2851_v13 = vrot.slane %v1180_v61, 9  ;;  %v1206_v14 = vrot.slane %v4135_v29, 5 }
 0x14f   : > { %1390 = vmatpush.bf16.msrb.mxu3 %v3310_v42  ;;  %v985_v42 = vor.u32 %v984_v25, %v981_v24  ;;  %v1409_v63 = vld [vmem:[#allocation2 + $0x8] sm:$0xf]  ;;  %v1798_v24 = vld [vmem:[#allocation2 + $0x10] sm:$0xf]  ;;  %v3328_v25 = vld [vmem:[#allocation8 + $0x168] sm:$0xff]  ;;  %s3696_s17 = scalar_lea.hbm %s3695_s12, 128 }
 0x150   : > { %1084 = vmatpush.bf16.msrb.mxu0 %v3291_v49  ;;  %v1229_v49 = vpack.c.b16 %v1226_v36, %v1225_v35  ;;  %v1005_v18 = vsel %vm4115_vm11, %v1000_v60, %v1004_v48  ;;  %v1418_v19 = vshrl.u32 %v1409_v63, 16  ;;  %v1421_v20 = vshll.u32 %v1409_v63, 16  ;;  %v3346_v26 = vld [vmem:[#allocation8 + $0x1e8] sm:$0xff]  ;;  %v3319_v27 = vld [vmem:[#allocation8 + $0x120] sm:$0xff]  ;;  %p3697_p7 = scmp.ne.s32.totalorder %s3695_s12, %s3696_s17  ;;  %s3700_s27 = scalar_lea.hbm %s4395_s5, 512 }
 0x151   : > { %1163 = vmatpush.bf16.msrb.mxu1 %v3283_v50  ;;  %v2887_v50 = vor.u32 %v3305_v39, %v2886_v38  ;;  %v3337_v28 = vld [vmem:[#allocation8 + $0x1a0] sm:$0xff]  ;;  %v1207_v30 = vsel %vm4121_vm12, %v2851_v13, %v1206_v14  ;;  %v1800_v31 = vld [vmem:[#allocation2 + $0x18] sm:$0xf]  ;;  %v1810_v33 = vshll.u32 %v1798_v24, 16  ;;  %v1026_v35 = vunpack.c.l.b16 %v1005_v18  ;;  %v4157_v61 = vld [vmem:[#allocation2 + $0x1c] sm:$0x1]  ;;  %p3702_p13 = scmp.lt.s32.totalorder %s3700_s27, %s3696_s17 }
 0x152   : > { %1286 = vmatpush.bf16.msrb.mxu2 %v3299_v56  ;;  %v1179_v56 = vld [vmem:[#allocation2 + $0x10] sm:$0xe]  ;;  %v4151_v38 = vld [vmem:[#allocation2 + $0x14] sm:$0x1]  ;;  %v1423_v43 = vrot.slane %v1421_v20, 5  ;;  %v3344_v18 = vld [vmem:[#allocation8 + $0x1d8] sm:$0xff]  ;;  %p3698_p10 = pnand %p3697_p7, %p3940_p2 }
 0x153   : > { %1391 = vmatpush.bf16.msrb.mxu3 %v3309_v57  ;;  %v986_v57 = vrot.slane %v985_v42, 4  ;;  %v2850_v11 = vrot.slane %v1179_v56, 9  ;;  %v2814_v36 = vld [vmem:[#allocation2 + $0x10] sm:$0xf]  ;;  %v1420_v42 = vrot.slane %v1418_v19, 4  ;;  %v1812_v60 = vrot.slane %v1810_v33, 5  ;;  %p3703_p0 = por %p3702_p13, %p3701_p12 }
 0x154   : > { %1085 = vmatpush.bf16.msrb.mxu0 %v3290_v21  ;;  %v3329_v21 = vld [vmem:[#allocation8 + $0x170] sm:$0xff]  ;;  %v3327_v39 = vld [vmem:[#allocation8 + $0x160] sm:$0xff]  ;;  %v1569_v13 = vld [vmem:[#allocation2 + $0x8] sm:$0xe]  ;;  %v1587_v33 = vrot.slane %v4151_v38, 5  ;;  %p3699_p11 = pneg %p3698_p10 }
 0x155   : > { %1164 = vmatpush.bf16.msrb.mxu1 %v3282_v10  ;;  %v3347_v10 = vld [vmem:[#allocation8 + $0x1f0] sm:$0xff]  ;;  %v991_v17 = vsel %vm4115_vm11, %v986_v57, %v990_v59  ;;  %v1203_v29 = vsel %vm4121_vm12, %v2850_v11, %v1202_v12  ;;  %v1441_v57 = vshll.u32 %v4151_v38, 16  ;;  %v4155_v48 = vld [vmem:[#allocation2 + $0x14] sm:$0x1]  ;;  %v1424_v11 = vor.u32 %v1423_v43, %v1420_v42 }
 0x156   : > { %1287 = vmatpush.bf16.msrb.mxu2 %v3298_v15  ;;  %v3320_v15 = vld [vmem:[#allocation8 + $0x128] sm:$0xff]  ;;  %v1025_v34 = vunpack.c.l.b16 %v991_v17  ;;  %v3326_v17 = vld [vmem:[#allocation8 + $0x158] sm:$0xff]  ;;  %v1816_v20 = vshll.u32 %v4155_v48, 16  ;;  %v1415_v43 = vld [vmem:[#allocation2 + $0x20] sm:$0xf]  ;;  %v1972_v58 = vrot.slane %v4155_v48, 5  ;;  %p3704_p4 = pnand %p3703_p0, %p3699_p11 }
 0x157   : > { %1392 = vmatpush.bf16.msrb.mxu3 %v3308_v16  ;;  %v3338_v16 = vld [vmem:[#allocation8 + $0x1a8] sm:$0xff]  ;;  %v3385_v62 = vld [vmem:[#allocation9 + $0xe4] sm:$0xf] }
 0x158   : > { %1086 = vmatpush.bf16.msrb.mxu0 %v3289_v22  ;;  %v1432_v22 = vshrl.u32 %v1411_v51, 16 }
 0x159   : > { %1165 = vmatpush.bf16.msrb.mxu1 %v3281_v23  ;;  %v1435_v23 = vshll.u32 %v1411_v51, 16 }
 0x15a   : > { %1288 = vmatpush.bf16.msrb.mxu2 %v3297_v32  ;;  %v1807_v32 = vshrl.u32 %v1798_v24, 16  ;;  %v1434_v44 = vrot.slane %v1432_v22, 4  ;;  %v3317_v24 = vld [vmem:[#allocation8 + $0x110] sm:$0xff] }
 0x15b   : > { %1393 = vmatpush.bf16.msrb.mxu3 %v3307_v37  ;;  %1087 = vmatmul.bf16.vlgmr.msrb.gmra.mxu0 %v1027_v46  ;;  %v4149_v37 = vld [vmem:[#allocation2 + $0xc] sm:$0x1]  ;;  %v1437_v45 = vrot.slane %v1435_v23, 5  ;;  %v1227_v46 = vunpack.c.l.b16 %v1203_v29  ;;  %v1830_v23 = vshll.u32 %v4157_v61, 16 }
 0x15c   : > { %1546 = vmatpush.bf16.msra.mxu0 %v3322_v40  ;;  %1166 = vmatmul.bf16.vlgmr.msrb.gmra.mxu1 %v2811_v47  ;;  %v3345_v40 = vld [vmem:[#allocation8 + $0x1e0] sm:$0xff]  ;;  %v1228_v47 = vunpack.c.l.b16 %v1207_v30  ;;  %v1427_v56 = vshll.u32 %v4149_v37, 16  ;;  %v1809_v59 = vrot.slane %v1807_v32, 4  ;;  %v1583_v29 = vrot.slane %v4149_v37, 5  ;;  %v3316_v37 = vld [vmem:[#allocation8 + $0x108] sm:$0xff] }
 0x15d   : > { %1289 = vmatmul.bf16.vlgmr.msrb.gmra.mxu2 %v1229_v49  ;;  %1670 = vmatpush.bf16.msra.mxu1 %v3330_v52  ;;  %v3318_v49 = vld [vmem:[#allocation8 + $0x118] sm:$0xff]  ;;  %v2890_v52 = vld [vmem:[#allocation2 + $0x18] sm:$0xf]  ;;  %v1438_v12 = vor.u32 %v1437_v45, %v1434_v44  ;;  %v1425_v30 = vrot.slane %v1424_v11, 4  ;;  %v1832_v42 = vrot.slane %v1830_v23, 5 }
 0x15e   : > { %1775 = vmatpush.bf16.msra.mxu2 %v3340_v41  ;;  %1394 = vmatmul.bf16.vlgmr.msrb.gmra.mxu3 %v2887_v50  ;;  %v3280_v41 = vld [vmem:[#allocation2 + $0x14] sm:$0xf0]  ;;  %v3336_v50 = vld [vmem:[#allocation8 + $0x198] sm:$0xff]  ;;  %v1230_v14 = vpack.c.b16 %v1228_v47, %v1227_v46  ;;  %v1813_v19 = vor.u32 %v1812_v60, %v1809_v59 }
 0x15f   : > { %1935 = vmatpush.bf16.msra.mxu3 %v3348_v53  ;;  %v1821_v53 = vshrl.u32 %v1800_v31, 16  ;;  %v3334_v44 = vld [vmem:[#allocation8 + $0x188] sm:$0xff] }
 0x160   : > { %1547 = vmatpush.bf16.msra.mxu0 %v3321_v54  ;;  %v1824_v54 = vshll.u32 %v1800_v31, 16  ;;  %v1439_v31 = vrot.slane %v1438_v12, 4 }
 0x161   : > { %1671 = vmatpush.bf16.msra.mxu1 %v3329_v21  ;;  %v1823_v63 = vrot.slane %v1821_v53, 4  ;;  %v1028_v21 = vpack.c.b16 %v1026_v35, %v1025_v34  ;;  %v3325_v34 = vld [vmem:[#allocation8 + $0x150] sm:$0xff] }
 0x162   : > { %1776 = vmatpush.bf16.msra.mxu2 %v3339_v55  ;;  %v3306_v55 = vld [vmem:[#allocation2 + $0x1c] sm:$0xf0]  ;;  %v1826_v51 = vrot.slane %v1824_v54, 5  ;;  %v1460_v54 = vshrl.u32 %v1415_v43, 16 }
 0x163   : > { %1936 = vmatpush.bf16.msra.mxu3 %v3347_v10  ;;  %v2815_v10 = vor.u32 %v3280_v41, %v2814_v36  ;;  %v3343_v35 = vld [vmem:[#allocation8 + $0x1d0] sm:$0xff]  ;;  %v1413_v36 = vld [vmem:[#allocation2 + $0x18] sm:$0xf] }
 0x164   : > { %1548 = vmatpush.bf16.msra.mxu0 %v3320_v15  ;;  %v2891_v15 = vor.u32 %v3306_v55, %v2890_v52  ;;  %v1827_v22 = vor.u32 %v1826_v51, %v1823_v63  ;;  %v1446_v52 = vshrl.u32 %v1413_v36, 16  ;;  %v1449_v53 = vshll.u32 %v1413_v36, 16  ;;  %v3315_v63 = vld [vmem:[#allocation8 + $0x100] sm:$0xff] }
 0x165   : > { %1672 = vmatpush.bf16.msra.mxu1 %v3328_v25  ;;  %v3335_v25 = vld [vmem:[#allocation8 + $0x190] sm:$0xff]  ;;  %v1463_v55 = vshll.u32 %v1415_v43, 16  ;;  %v3333_v51 = vld [vmem:[#allocation8 + $0x180] sm:$0xff] }
 0x166   : > { %1777 = vmatpush.bf16.msra.mxu2 %v3338_v16  ;;  %v1570_v16 = vld [vmem:[#allocation2 + $0x10] sm:$0xe]  ;;  %v1828_v41 = vrot.slane %v1827_v22, 4  ;;  %v1448_v22 = vrot.slane %v1446_v52, 4  ;;  %v1451_v23 = vrot.slane %v1449_v53, 5 }
 0x167   : > { %1937 = vmatpush.bf16.msra.mxu3 %v3346_v26  ;;  %v1429_v26 = vrot.slane %v1427_v56, 5  ;;  %v2957_v32 = vrot.slane %v1570_v16, 9  ;;  %v3324_v56 = vld [vmem:[#allocation8 + $0x148] sm:$0xff]  ;;  %v2994_v16 = vld [vmem:[#allocation2 + $0x10] sm:$0xf] }
 0x168   : > { %1549 = vmatpush.bf16.msra.mxu0 %v3319_v27  ;;  %v1443_v27 = vrot.slane %v1441_v57, 5  ;;  %v3342_v57 = vld [vmem:[#allocation8 + $0x1c8] sm:$0xff]  ;;  %v1833_v60 = vsel %vm4115_vm11, %v1828_v41, %v1832_v42  ;;  %v4177_v41 = vld [vmem:[#allocation2 + $0x2c] sm:$0x1]  ;;  %v1452_v42 = vor.u32 %v1451_v23, %v1448_v22 }
 0x169   : > { %1673 = vmatpush.bf16.msra.mxu1 %v3327_v39  ;;  %v1814_v39 = vrot.slane %v1813_v19, 4  ;;  %v1430_v45 = vsel %vm4115_vm11, %v1425_v30, %v1429_v26  ;;  %v1588_v47 = vsel %vm4121_vm12, %v2957_v32, %v1587_v33  ;;  %v3341_v26 = vld [vmem:[#allocation8 + $0x1c0] sm:$0xff]  ;;  %v1416_v30 = vld [vmem:[#allocation2 + $0x24] sm:$0x1]  ;;  %v1858_v53 = vshll.u32 %v4177_v41, 16 }
 0x16a   : > { %1778 = vmatpush.bf16.msra.mxu2 %v3337_v28  ;;  %v2956_v28 = vrot.slane %v1569_v13, 9  ;;  %v1444_v38 = vsel %vm4115_vm11, %v1439_v31, %v1443_v27  ;;  %v3323_v13 = vld [vmem:[#allocation8 + $0x140] sm:$0xff]  ;;  %v1615_v19 = vunpack.c.l.b16 %v1588_v47  ;;  %v1572_v47 = vld [vmem:[#allocation2 + $0x20] sm:$0xe] }
 0x16b   : > { %1938 = vmatpush.bf16.msra.mxu3 %v3345_v40  ;;  %1092 = vmatmul.bf16.gmra.mxu0 %v1028_v21  ;;  %v1818_v40 = vrot.slane %v1816_v20, 5  ;;  %v3331_v20 = vld [vmem:[#allocation2 + $0x14] sm:$0xf0] }
 0x16c   : > { %1550 = vmatpush.bf16.msra.mxu0 %v3318_v49  ;;  %1171 = vmatmul.bf16.gmra.mxu1 %v2815_v10  ;;  %v1584_v46 = vsel %vm4121_vm12, %v2956_v28, %v1583_v29  ;;  %v1802_v49 = vld [vmem:[#allocation2 + $0x20] sm:$0xf]  ;;  %v1880_v28 = vunpack.c.l.b16 %v1833_v60  ;;  %v1414_v29 = vld [vmem:[#allocation2 + $0x1c] sm:$0x1]  ;;  %v2995_v36 = vor.u32 %v3331_v20, %v2994_v16  ;;  %v3353_v16 = vld [vmem:[#allocation8 + $0x220] sm:$0xff] }
 0x16d   : > { %1294 = vmatmul.bf16.gmra.mxu2 %v1230_v14  ;;  %1674 = vmatpush.bf16.msra.mxu1 %v3326_v17  ;;  %v1819_v59 = vsel %vm4115_vm11, %v1814_v39, %v1818_v40  ;;  %v1835_v21 = vshrl.u32 %v1802_v49, 16  ;;  %v1838_v10 = vshll.u32 %v1802_v49, 16  ;;  %v1490_v14 = vunpack.c.l.b16 %v1430_v45  ;;  %v3356_v17 = vld [vmem:[#allocation8 + $0x238] sm:$0xff]  ;;  %v4175_v40 = vld [vmem:[#allocation2 + $0x24] sm:$0x1] }
 0x16e   : > { %1779 = vmatpush.bf16.msra.mxu2 %v3336_v50  ;;  %1399 = vmatmul.bf16.gmra.mxu3 %v2891_v15  ;;  %v1804_v50 = vld [vmem:[#allocation2 + $0x28] sm:$0xf]  ;;  %v1491_v15 = vunpack.c.l.b16 %v1444_v38  ;;  %v1879_v27 = vunpack.c.l.b16 %v1819_v59  ;;  %v1455_v43 = vshll.u32 %v1414_v29, 16  ;;  %v3355_v38 = vld [vmem:[#allocation8 + $0x230] sm:$0xff]  ;;  %v3354_v59 = vld [vmem:[#allocation8 + $0x228] sm:$0xff] }
 0x16f   : > { %1939 = vmatpush.bf16.msra.mxu3 %v3344_v18  ;;  %v1849_v11 = vshrl.u32 %v1804_v50, 16  ;;  %v1852_v12 = vshll.u32 %v1804_v50, 16  ;;  %v1614_v18 = vunpack.c.l.b16 %v1584_v46  ;;  %v1837_v31 = vrot.slane %v1835_v21, 4  ;;  %v1571_v46 = vld [vmem:[#allocation2 + $0x18] sm:$0xe] }
 0x170   : > { %1551 = vmatpush.bf16.msra.mxu0 %v3317_v24  ;;  %v1462_v24 = vrot.slane %v1460_v54, 4  ;;  %v1840_v32 = vrot.slane %v1838_v10, 5  ;;  %v1883_v45 = vpack.c.b16 %v1880_v28, %v1879_v27  ;;  %v1844_v50 = vshll.u32 %v4175_v40, 16  ;;  %v3332_v27 = vld [vmem:[#allocation2 + $0x24] sm:$0xf0] }
 0x171   : > { %1675 = vmatpush.bf16.msra.mxu1 %v3325_v34  ;;  %v1851_v33 = vrot.slane %v1849_v11, 4  ;;  %v1854_v34 = vrot.slane %v1852_v12, 5  ;;  %v1618_v39 = vpack.c.b16 %v1615_v19, %v1614_v18  ;;  %v1453_v54 = vrot.slane %v1452_v42, 4  ;;  %v3352_v28 = vld [vmem:[#allocation8 + $0x218] sm:$0xff] }
 0x172   : > { %1780 = vmatpush.bf16.msra.mxu2 %v3335_v25  ;;  %v1465_v25 = vrot.slane %v1463_v55, 5  ;;  %v1841_v49 = vor.u32 %v1840_v32, %v1837_v31  ;;  %v1457_v55 = vrot.slane %v1455_v43, 5  ;;  %v2958_v60 = vrot.slane %v1571_v46, 9  ;;  %v3349_v46 = vld [vmem:[#allocation8 + $0x200] sm:$0xff] }
 0x173   : > { %1940 = vmatpush.bf16.msra.mxu3 %v3343_v35  ;;  %v1494_v35 = vpack.c.b16 %v1491_v15, %v1490_v14  ;;  %v1855_v52 = vor.u32 %v1854_v34, %v1851_v33  ;;  %v1595_v21 = vrot.slane %v1416_v30, 5  ;;  %v1846_v11 = vrot.slane %v1844_v50, 5  ;;  %v1961_v50 = vld [vmem:[#allocation2 + $0x28] sm:$0xe] }
 0x174   : > { %1552 = vmatpush.bf16.msra.mxu0 %v3316_v37  ;;  %v1466_v37 = vor.u32 %v1465_v25, %v1462_v24  ;;  %v1842_v10 = vrot.slane %v1841_v49, 4  ;;  %v1458_v14 = vsel %vm4115_vm11, %v1453_v54, %v1457_v55  ;;  %v1976_v42 = vrot.slane %v4157_v61, 5  ;;  %v1960_v61 = vld [vmem:[#allocation2 + $0x20] sm:$0xe] }
 0x175   : > { %1676 = vmatpush.bf16.msra.mxu1 %v3324_v56  ;;  %v1856_v12 = vrot.slane %v1855_v52, 4  ;;  %v1492_v22 = vunpack.c.l.b16 %v1458_v14  ;;  %v3066_v52 = vrot.slane %v1960_v61, 9  ;;  %v3067_v54 = vrot.slane %v1961_v50, 9  ;;  %v3378_v61 = vld [vmem:[#allocation9 + $0xac] sm:$0xf] }
 0x176   : > { %1781 = vmatpush.bf16.msra.mxu2 %v3334_v44  ;;  %v1469_v44 = vshll.u32 %v1416_v30, 16  ;;  %v1467_v56 = vrot.slane %v1466_v37, 4  ;;  %v1847_v19 = vsel %vm4115_vm11, %v1842_v10, %v1846_v11  ;;  %v1984_v55 = vrot.slane %v4177_v41, 5  ;;  %v3192_v50 = vld [vmem:[#allocation9 + $0xb8] sm:$0xf0] }
 0x177   : > { %1941 = vmatpush.bf16.msra.mxu3 %v3342_v57 }
 0x178   : > { %1553 = vmatpush.bf16.msra.mxu0 %v3315_v63  ;;  %v1471_v57 = vrot.slane %v1469_v44, 5  ;;  %v1591_v63 = vrot.slane %v1414_v29, 5  ;;  %v1881_v29 = vunpack.c.l.b16 %v1847_v19  ;;  %v3350_v44 = vld [vmem:[#allocation8 + $0x208] sm:$0xff] }
 0x179   : > { %1677 = vmatpush.bf16.msra.mxu1 %v3323_v13  ;;  %v1860_v13 = vrot.slane %v1858_v53, 5  ;;  %v1980_v53 = vrot.slane %v4175_v40, 5 }
 0x17a   : > { %1782 = vmatpush.bf16.msra.mxu2 %v3333_v51  ;;  %v2959_v51 = vrot.slane %v1572_v47, 9  ;;  %v1472_v15 = vsel %vm4115_vm11, %v1467_v56, %v1471_v57  ;;  %v1985_v57 = vsel %vm4121_vm12, %v3067_v54, %v1984_v55  ;;  %v3375_v54 = vld [vmem:[#allocation9 + $0x8c] sm:$0xf0] }
 0x17b   : > { %1942 = vmatpush.bf16.msra.mxu3 %v3341_v26  ;;  %1554 = vmatmul.bf16.vlgmr.msra.gmra.mxu0 %v1494_v35  ;;  %v1861_v20 = vsel %vm4115_vm11, %v1856_v12, %v1860_v13  ;;  %v1493_v23 = vunpack.c.l.b16 %v1472_v15  ;;  %v2998_v26 = vld [vmem:[#allocation2 + $0x20] sm:$0xf]  ;;  %v1981_v56 = vsel %vm4121_vm12, %v3066_v52, %v1980_v53  ;;  %v3214_v12 = vld [vmem:[#allocation9 + $0xe0] sm:$0xf]  ;;  %v3216_v15 = vld [vmem:[#allocation9 + $0xf0] sm:$0xf0]  ;;  %v4231_v52 = vor.u32 %v3378_v61, %v3192_v50 }
 0x17c   : > { %2059 = vmatpush.bf16.msrb.mxu0 %v3356_v17  ;;  %1678 = vmatmul.bf16.vlgmr.msra.gmra.mxu1 %v1618_v39  ;;  %v1592_v17 = vsel %vm4121_vm12, %v2958_v60, %v1591_v63  ;;  %v1596_v18 = vsel %vm4121_vm12, %v2959_v51, %v1595_v21  ;;  %v1882_v30 = vunpack.c.l.b16 %v1861_v20  ;;  %v2999_v32 = vor.u32 %v3332_v27, %v2998_v26  ;;  %v3351_v35 = vld [vmem:[#allocation8 + $0x210] sm:$0xff]  ;;  %v1959_v39 = vld [vmem:[#allocation2 + $0x18] sm:$0xe]  ;;  %v3386_v20 = vld [vmem:[#allocation9 + $0xec] sm:$0xf] }
 0x17d   : > { %1783 = vmatmul.bf16.vlgmr.msra.gmra.mxu2 %v2995_v36  ;;  %v1616_v24 = vunpack.c.l.b16 %v1592_v17  ;;  %v1617_v25 = vunpack.c.l.b16 %v1596_v18  ;;  %v1495_v31 = vpack.c.b16 %v1493_v23, %v1492_v22  ;;  %v1958_v36 = vld [vmem:[#allocation2 + $0x10] sm:$0xe]  ;;  %v3065_v37 = vrot.slane %v1959_v39, 9  ;;  %v3387_v13 = vld [vmem:[#allocation9 + $0xec] sm:$0xf0] }
 0x17e   : > { %1943 = vmatmul.bf16.vlgmr.msra.gmra.mxu3 %v1883_v45  ;;  %v1884_v34 = vpack.c.b16 %v1882_v30, %v1881_v29  ;;  %v3064_v43 = vrot.slane %v1958_v36, 9  ;;  %v2006_v60 = vunpack.c.l.b16 %v1985_v57  ;;  %v3215_v14 = vor.u32 %v3387_v13, %v3214_v12  ;;  %v3388_v17 = vld [vmem:[#allocation9 + $0xf4] sm:$0xf0]  ;;  %v3224_v22 = vld [vmem:[#allocation9 + $0xf8] sm:$0xf0] }
 0x17f   : > { %v1619_v33 = vpack.c.b16 %v1617_v25, %v1616_v24  ;;  %v3219_v18 = vor.u32 %v3385_v62, %v3216_v15  ;;  %v4219_v24 = vor.u32 %v3386_v20, %v3224_v22  ;;  %v3198_v25 = vld [vmem:[#allocation9 + $0xc0] sm:$0xf]  ;;  %v3383_v26 = vld [vmem:[#allocation9 + $0xcc] sm:$0xf0]  ;;  %v3381_v29 = vld [vmem:[#allocation9 + $0xc4] sm:$0xf] }
 0x180   : > { %2060 = vmatpush.bf16.msrb.mxu0 %v3355_v38  ;;  %v1973_v45 = vsel %vm4121_vm12, %v3064_v43, %v1972_v58  ;;  %v1977_v38 = vsel %vm4121_vm12, %v3065_v37, %v1976_v42  ;;  %2312 = vmatpush.bf16.msrb.mxu1 %v3215_v14  ;;  %v3200_v30 = vld [vmem:[#allocation9 + $0xd0] sm:$0xf0]  ;;  %v3182_v43 = vld [vmem:[#allocation9 + $0xa0] sm:$0xf]  ;;  %v3379_v37 = vld [vmem:[#allocation9 + $0xac] sm:$0xf0] }
 0x181   : > { %v2003_v47 = vunpack.c.l.b16 %v1973_v45  ;;  %v2004_v49 = vunpack.c.l.b16 %v1977_v38  ;;  %2331 = vmatpush.bf16.msrb.mxu2 %v3219_v18  ;;  %v3183_v45 = vor.u32 %v3379_v37, %v3182_v43  ;;  %v3184_v38 = vld [vmem:[#allocation9 + $0xb0] sm:$0xf0]  ;;  %v3166_v53 = vld [vmem:[#allocation9 + $0x80] sm:$0xf]  ;;  %v3376_v12 = vld [vmem:[#allocation9 + $0x94] sm:$0xf0] }
 0x182   : > { %v3167_v55 = vor.u32 %v3375_v54, %v3166_v53  ;;  %v3168_v57 = vld [vmem:[#allocation9 + $0x90] sm:$0xf0]  ;;  %v3374_v13 = vld [vmem:[#allocation9 + $0x8c] sm:$0xf]  ;;  %v3176_v62 = vld [vmem:[#allocation9 + $0x98] sm:$0xf0] }
 0x183   : > { %v2007_v48 = vpack.c.b16 %v2004_v49, %v2003_v47  ;;  %v3380_v47 = vld [vmem:[#allocation9 + $0xb4] sm:$0xf0]  ;;  %v3150_v18 = vld [vmem:[#allocation9 + $0x60] sm:$0xf]  ;;  %v3369_v20 = vld [vmem:[#allocation9 + $0x64] sm:$0xf] }
 0x184   : > { %2061 = vmatpush.bf16.msrb.mxu0 %v3354_v59  ;;  %v2005_v59 = vunpack.c.l.b16 %v1981_v56  ;;  %v3373_v56 = vld [vmem:[#allocation9 + $0x84] sm:$0xf] }
 0x185   : > { %v3365_v43 = vld [vmem:[#allocation9 + $0x44] sm:$0xf] }
 0x186   : > { %v2008_v63 = vpack.c.b16 %v2006_v60, %v2005_v59  ;;  %v3174_v59 = vld [vmem:[#allocation9 + $0x88] sm:$0xf] }
 0x187   : > { %v3175_v15 = vor.u32 %v3376_v12, %v3174_v59  ;;  %v3126_v12 = vld [vmem:[#allocation9 + $0x28] sm:$0xf] }
 0x188   : > { %2062 = vmatpush.bf16.msrb.mxu0 %v3353_v16  ;;  %v3222_v16 = vld [vmem:[#allocation9 + $0xe8] sm:$0xf] }
 0x189   : > { %v3223_v19 = vor.u32 %v3388_v17, %v3222_v16  ;;  %v4238_v16 = vor.u32 %v3374_v13, %v3176_v62  ;;  %v3364_v13 = vld [vmem:[#allocation9 + $0x34] sm:$0xf0] }
 0x18b   : > { %1559 = vmatmul.bf16.gmra.mxu0 %v1495_v31  ;;  %2350 = vmatpush.bf16.msrb.mxu3 %v3223_v19  ;;  %v3206_v31 = vld [vmem:[#allocation9 + $0xc8] sm:$0xf]  ;;  %v3371_v19 = vld [vmem:[#allocation9 + $0x6c] sm:$0xf0] }
 0x18c   : > { %2063 = vmatpush.bf16.msrb.mxu0 %v3352_v28  ;;  %1683 = vmatmul.bf16.gmra.mxu1 %v1619_v33  ;;  %v3199_v28 = vor.u32 %v3383_v26, %v3198_v25  ;;  %v3384_v33 = vld [vmem:[#allocation9 + $0xd4] sm:$0xf0]  ;;  %v3151_v22 = vor.u32 %v3371_v19, %v3150_v18  ;;  %v3152_v25 = vld [vmem:[#allocation9 + $0x70] sm:$0xf0]  ;;  %v3158_v26 = vld [vmem:[#allocation9 + $0x68] sm:$0xf] }
 0x18d   : > { %1788 = vmatmul.bf16.gmra.mxu2 %v2999_v32  ;;  %v3203_v32 = vor.u32 %v3381_v29, %v3200_v30  ;;  %v3207_v36 = vor.u32 %v3384_v33, %v3206_v31  ;;  %v3155_v30 = vor.u32 %v3369_v20, %v3152_v25  ;;  %v3160_v33 = vld [vmem:[#allocation9 + $0x78] sm:$0xf0]  ;;  %v3362_v18 = vld [vmem:[#allocation9 + $0x2c] sm:$0xf]  ;;  %v3102_v25 = vld [vmem:[#allocation9] sm:$0xf] }
 0x18e   : > { %1948 = vmatmul.bf16.gmra.mxu3 %v1884_v34  ;;  %v3382_v34 = vld [vmem:[#allocation9 + $0xcc] sm:$0xf]  ;;  %2313 = vmatpush.bf16.msrb.mxu1 %v3199_v28  ;;  %v3372_v28 = vld [vmem:[#allocation9 + $0x74] sm:$0xf0]  ;;  %v3128_v19 = vld [vmem:[#allocation9 + $0x38] sm:$0xf0] }
 0x18f   : > { %2332 = vmatpush.bf16.msrb.mxu2 %v3203_v32  ;;  %2351 = vmatpush.bf16.msrb.mxu3 %v3207_v36  ;;  %v3159_v31 = vor.u32 %v3372_v28, %v3158_v26  ;;  %v3370_v32 = vld [vmem:[#allocation9 + $0x6c] sm:$0xf]  ;;  %v3367_v36 = vld [vmem:[#allocation9 + $0x4c] sm:$0xf0]  ;;  %v4255_v20 = vor.u32 %v3362_v18, %v3128_v19  ;;  %v3357_v28 = vld [vmem:[#allocation9 + $0x4] sm:$0xf] }
 0x190   : > { %2064 = vmatpush.bf16.msrb.mxu0 %v3351_v35  ;;  %v3208_v35 = vld [vmem:[#allocation9 + $0xd8] sm:$0xf0]  ;;  %v3359_v26 = vld [vmem:[#allocation9 + $0xc] sm:$0xf0] }
 0x191   : > { %v4224_v39 = vor.u32 %v3382_v34, %v3208_v35  ;;  %v4245_v34 = vor.u32 %v3370_v32, %v3160_v33  ;;  %v3134_v35 = vld [vmem:[#allocation9 + $0x40] sm:$0xf]  ;;  %v3110_v32 = vld [vmem:[#allocation9 + $0x8] sm:$0xf]  ;;  %v3360_v33 = vld [vmem:[#allocation9 + $0x14] sm:$0xf0] }
 0x192   : > { %2314 = vmatpush.bf16.msrb.mxu1 %v3183_v45  ;;  %v3135_v37 = vor.u32 %v3367_v36, %v3134_v35  ;;  %v3142_v45 = vld [vmem:[#allocation9 + $0x48] sm:$0xf]  ;;  %v3111_v36 = vor.u32 %v3360_v33, %v3110_v32 }
 0x194   : > { %2065 = vmatpush.bf16.msrb.mxu0 %v3350_v44  ;;  %v3377_v44 = vld [vmem:[#allocation9 + $0xa4] sm:$0xf] }
 0x195   : > { %v3187_v49 = vor.u32 %v3377_v44, %v3184_v38  ;;  %v3136_v44 = vld [vmem:[#allocation9 + $0x50] sm:$0xf0]  ;;  %v3368_v38 = vld [vmem:[#allocation9 + $0x54] sm:$0xf0] }
 0x196   : > { %2315 = vmatpush.bf16.msrb.mxu1 %v3167_v55  ;;  %v3118_v55 = vld [vmem:[#allocation9 + $0x20] sm:$0xf] }
 0x197   : > { %2333 = vmatpush.bf16.msrb.mxu2 %v3187_v49  ;;  %v3366_v49 = vld [vmem:[#allocation9 + $0x4c] sm:$0xf] }
 0x198   : > { %2066 = vmatpush.bf16.msrb.mxu0 %v3349_v46  ;;  %v3190_v46 = vld [vmem:[#allocation9 + $0xa8] sm:$0xf] }
 0x19a   : > { %2316 = vmatpush.bf16.msrb.mxu1 %v3151_v22 }
 0x19b   : > { %2067 = vmatmul.bf16.vlgmr.msrb.gmra.mxu0 %v2007_v48  ;;  %v3191_v48 = vor.u32 %v3380_v47, %v3190_v46  ;;  %v3139_v46 = vor.u32 %v3365_v43, %v3136_v44  ;;  %v3143_v47 = vor.u32 %v3368_v38, %v3142_v45  ;;  %v3358_v43 = vld [vmem:[#allocation9 + $0xc] sm:$0xf] }
 0x19c   : > { %2369 = vmatpush.bf16.msra.mxu0 %v4219_v24 }
 0x19d   : > { %2352 = vmatpush.bf16.msrb.mxu3 %v3191_v48  ;;  %v3144_v48 = vld [vmem:[#allocation9 + $0x58] sm:$0xf0] }
 0x19e   : > { %2317 = vmatpush.bf16.msrb.mxu1 %v3135_v37  ;;  %v4250_v50 = vor.u32 %v3366_v49, %v3144_v48  ;;  %v3112_v37 = vld [vmem:[#allocation9 + $0x18] sm:$0xf0] }
 0x19f   : > { %v3115_v44 = vor.u32 %v3358_v43, %v3112_v37 }
 0x1a0   : > { %2370 = vmatpush.bf16.msra.mxu0 %v4224_v39 }
 0x1a1   : > { %2353 = vmatpush.bf16.msrb.mxu3 %v3175_v15  ;;  %v3127_v15 = vor.u32 %v3364_v13, %v3126_v12 }
 0x1a4   : > { %2371 = vmatpush.bf16.msra.mxu0 %v4231_v52 }
 0x1a5   : > { %2354 = vmatpush.bf16.msrb.mxu3 %v3159_v31  ;;  %v3104_v31 = vld [vmem:[#allocation9 + $0x10] sm:$0xf0] }
 0x1a6   : > { %v3107_v35 = vor.u32 %v3357_v28, %v3104_v31 }
 0x1a8   : > { %2372 = vmatpush.bf16.msra.mxu0 %v4238_v16 }
 0x1a9   : > { %2355 = vmatpush.bf16.msrb.mxu3 %v3143_v47 }
 0x1ab   : > { %2072 = vmatmul.bf16.gmra.mxu0 %v2008_v63  ;;  %v3171_v63 = vor.u32 %v3373_v56, %v3168_v57  ;;  %v3363_v56 = vld [vmem:[#allocation9 + $0x2c] sm:$0xf0]  ;;  %v3361_v57 = vld [vmem:[#allocation9 + $0x24] sm:$0xf] }
 0x1ac   : > { %2373 = vmatpush.bf16.msra.mxu0 %v4245_v34  ;;  %v3119_v59 = vor.u32 %v3363_v56, %v3118_v55 }
 0x1ad   : > { %2334 = vmatpush.bf16.msrb.mxu2 %v3171_v63  ;;  %v3120_v63 = vld [vmem:[#allocation9 + $0x30] sm:$0xf0]  ;;  %2356 = vmatpush.bf16.msrb.mxu3 %v3127_v15 }
 0x1ae   : > { %v3123_v62 = vor.u32 %v3361_v57, %v3120_v63  ;;  %2318 = vmatpush.bf16.msrb.mxu1 %v3119_v59 }
 0x1b0   : > { %2374 = vmatpush.bf16.msra.mxu0 %v4250_v50 }
 0x1b1   : > { %2335 = vmatpush.bf16.msrb.mxu2 %v3155_v30  ;;  %v3103_v30 = vor.u32 %v3359_v26, %v3102_v25  ;;  %2357 = vmatpush.bf16.msrb.mxu3 %v3111_v36 }
 0x1b3   : > { %2319 = vmatpush.bf16.msrb.mxu1 %v3103_v30 }
 0x1b4   : > { %2375 = vmatpush.bf16.msra.mxu0 %v4255_v20 }
 0x1b5   : > { %2336 = vmatpush.bf16.msrb.mxu2 %v3139_v46 }
 0x1b7   : > { %3390 = vmatpush.bf16.msra.mxu1 %v4219_v24 }
 0x1b8   : > { %2376 = vmatpush.bf16.msra.mxu0 %v3115_v44 }
 0x1b9   : > { %2337 = vmatpush.bf16.msrb.mxu2 %v3123_v62 }
 0x1bb   : > { %3391 = vmatpush.bf16.msra.mxu1 %v4224_v39 }
 0x1bd   : > { %2338 = vmatpush.bf16.msrb.mxu2 %v3107_v35 }
 0x1bf   : > { %3392 = vmatpush.bf16.msra.mxu1 %v4231_v52 }
 0x1c3   : > { %3393 = vmatpush.bf16.msra.mxu1 %v4238_v16  ;;  %v2083_v16 = vperm.slane %v3983_v0, 0 }
 0x1c7   : > { %3394 = vmatpush.bf16.msra.mxu1 %v4245_v34 }
 0x1cb   : > { %3395 = vmatpush.bf16.msra.mxu1 %v4250_v50 }
 0x1cf   : > { %3396 = vmatpush.bf16.msra.mxu1 %v4255_v20 }
 0x1d3   : > { %3397 = vmatpush.bf16.msra.mxu1 %v3115_v44 }
 0x1d8   : > { %v4205_v51 = vpop.f32.mrf.mxu0 }
 0x1d9   : > { %v4209_v10 = vpop.f32.mrf.mxu1 }
 0x1da   : > { %v1168_v46 = vadd.f32 %v4209_v10, %v4205_v51 }
 0x1e0   : > { %v4207_v21 = vpop.f32.mrf.mxu0  ;;  %v4211_v40 = vpop.f32.mrf.mxu2 }
 0x1e1   : > { %v4213_v11 = vpop.f32.mrf.mxu3  ;;  %v4217_v23 = vpop.f32.mrf.mxu1  ;;  %v1300_v49 = vadd.f32 %v4211_v40, %v1168_v46 }
 0x1e2   : > { %v1170_v48 = vadd.f32 %v4217_v23, %v4207_v21 }
 0x1e3   : > { %v1405_v56 = vadd.f32 %v4213_v11, %v1300_v49 }
 0x1e8   : > { %v4215_v41 = vpop.f32.mrf.mxu0  ;;  %v4221_v27 = vpop.f32.mrf.mxu2 }
 0x1e9   : > { %v4226_v58 = vpop.f32.mrf.mxu3  ;;  %v4233_v60 = vpop.f32.mrf.mxu1  ;;  %v1301_v57 = vadd.f32 %v4221_v27, %v1170_v48 }
 0x1ea   : > { %v1173_v11 = vadd.f32 %v4233_v60, %v4215_v41 }
 0x1eb   : > { %v1406_v10 = vadd.f32 %v4226_v58, %v1301_v57  ;;  %v2127_v57 = vunpack.c.l.bf16 %v3988_v2 }
 0x1f0   : > { %v4228_v42 = vpop.f32.mrf.mxu0  ;;  %v4236_v14 = vpop.f32.mrf.mxu2 }
 0x1f1   : > { %v4243_v29 = vpop.f32.mrf.mxu3  ;;  %v4248_v61 = vpop.f32.mrf.mxu1 }
 0x1f2   : > { %v1175_v58 = vadd.f32 %v4248_v61, %v4228_v42 }
 0x1f8   : > { %v4240_v17 = vpop.f32.mrf.mxu0  ;;  %v4252_v53 = vpop.f32.mrf.mxu2 }
 0x1f9   : > { %v4257_v22 = vpop.f32.mrf.mxu3  ;;  %v1679_v45 = vpop.f32.mrf.mxu1  ;;  %v1565_v63 = vadd.f32 %v4240_v17, %v1405_v56  ;;  %v1302_v17 = vadd.f32 %v4236_v14, %v1173_v11  ;;  %v1303_v41 = vadd.f32 %v4252_v53, %v1175_v58  ;;  %v4289_v56 = vperm.slane %v3985_v1, 3 }
 0x1fa   : > { %v2128_v11 = vunpack.c.h.bf16 %v3988_v2  ;;  %v2131_v58 = vunpack.c.l.bf16 %v3994_v4 }
 0x1fb   : > { %v1689_v40 = vadd.f32 %v1679_v45, %v1565_v63  ;;  %v1407_v18 = vadd.f32 %v4243_v29, %v1302_v17  ;;  %v1408_v42 = vadd.f32 %v4257_v22, %v1303_v41  ;;  %v2130_v63 = vunpack.c.h.bf16 %v3991_v3 }
 0x200   : > { %v1557_v54 = vpop.f32.mrf.mxu0  ;;  %v1784_v47 = vpop.f32.mrf.mxu2 }
 0x201   : > { %v1944_v55 = vpop.f32.mrf.mxu3  ;;  %v1681_v51 = vpop.f32.mrf.mxu1  ;;  %v1566_v12 = vadd.f32 %v1557_v54, %v1406_v10  ;;  %v1794_v21 = vadd.f32 %v1784_v47, %v1689_v40 }
 0x203   : > { %v1690_v27 = vadd.f32 %v1681_v51, %v1566_v12  ;;  %v1954_v52 = vadd.f32 %v1944_v55, %v1794_v21  ;;  %v4286_v55 = vperm.slane %v3985_v1, 0  ;;  %v4296_v12 = vperm.slane %v3985_v1, 1 }
 0x208   : > { %v1560_v38 = vpop.f32.mrf.mxu0  ;;  %v1786_v24 = vpop.f32.mrf.mxu2 }
 0x209   : > { %v1946_v23 = vpop.f32.mrf.mxu3  ;;  %v1795_v13 = vadd.f32 %v1786_v24, %v1690_v27  ;;  %v1684_v62 = vpop.f32.mrf.mxu1  ;;  %v1567_v19 = vadd.f32 %v1560_v38, %v1407_v18 }
 0x20b   : > { %v1955_v60 = vadd.f32 %v1946_v23, %v1795_v13  ;;  %v1691_v28 = vadd.f32 %v1684_v62, %v1567_v19  ;;  %v4299_v23 = vperm.slane %v3985_v1, 2 }
 0x210   : > { %v1562_v59 = vpop.f32.mrf.mxu0  ;;  %v1789_v15 = vpop.f32.mrf.mxu2 }
 0x211   : > { %v1949_v26 = vpop.f32.mrf.mxu3  ;;  %v1568_v0 = vadd.f32 %v1562_v59, %v1408_v42  ;;  %v1686_v31 = vpop.f32.mrf.mxu1  ;;  %v1796_v29 = vadd.f32 %v1789_v15, %v1691_v28  ;;  %v2133_v28 = vunpack.c.l.bf16 %v3997_v5 }
 0x213   : > { %v1692_v35 = vadd.f32 %v1686_v31, %v1568_v0  ;;  %v1956_v20 = vadd.f32 %v1949_v26, %v1796_v29  ;;  %v2132_v26 = vunpack.c.h.bf16 %v3994_v4 }
 0x218   : > { %v2068_v39 = vpop.f32.mrf.mxu0  ;;  %v1791_v53 = vpop.f32.mrf.mxu2 }
 0x219   : > { %v2078_v54 = vadd.f32 %v2068_v39, %v1954_v52  ;;  %v1797_v36 = vadd.f32 %v1791_v53, %v1692_v35  ;;  %v1951_v43 = vpop.f32.mrf.mxu3  ;;  %v2129_v52 = vunpack.c.l.bf16 %v3991_v3 }
 0x21b   : > { %v2085_v14 = vadd.f32 %v2083_v16, %v2078_v54  ;;  %v1957_v37 = vadd.f32 %v1951_v43, %v1797_v36  ;;  %v2136_v36 = vunpack.c.h.bf16 %v4000_v6 }
 0x21d   : > { %v2089_v30 = vmax.f32 %v2085_v14, 0.0 }
 0x220   : > { %v2070_v34 = vpop.f32.mrf.mxu0 }
 0x221   : > { %v2079_v25 = vadd.f32 %v2070_v34, %v1955_v60 }
 0x223   : > { %v2086_v61 = vadd.f32 %v2083_v16, %v2079_v25 }
 0x225   : > { %v2090_v50 = vmax.f32 %v2086_v61, 0.0 }
 0x227   : > { %v2093_v32 = vpack.c.bf16 %v2090_v50, %v2089_v30  ;;  %v2135_v50 = vunpack.c.l.bf16 %v4000_v6 }
 0x228   : > { %v2073_v33 = vpop.f32.mrf.mxu0 }
 0x229   : > { %2320 = vmatmul.bf16.vlgmr.msrb.gmra.mxu1 %v2093_v32  ;;  %2339 = vmatmul.bf16.vlgmr.msrb.gmra.mxu2 %v2093_v32  ;;  %v2080_v22 = vadd.f32 %v2073_v33, %v1956_v20 }
 0x22a   : > { %2358 = vmatmul.bf16.vlgmr.msrb.gmra.mxu3 %v2093_v32  ;;  %2377 = vmatmul.bf16.vlgmr.msra.gmra.mxu0 %v2093_v32 }
 0x22b   : > { %v2087_v38 = vadd.f32 %v2083_v16, %v2080_v22  ;;  %v2137_v22 = vunpack.c.l.bf16 %v4003_v7 }
 0x22d   : > { %v2091_v44 = vmax.f32 %v2087_v38, 0.0  ;;  %v2139_v38 = vunpack.c.l.bf16 %v4006_v8 }
 0x230   : > { %v2075_v45 = vpop.f32.mrf.mxu0 }
 0x231   : > { %v2081_v46 = vadd.f32 %v2075_v45, %v1957_v37 }
 0x233   : > { %v2088_v47 = vadd.f32 %v2083_v16, %v2081_v46  ;;  %v2134_v16 = vunpack.c.h.bf16 %v3997_v5 }
 0x235   : > { %v2092_v49 = vmax.f32 %v2088_v47, 0.0 }
 0x237   : > { %v2094_v48 = vpack.c.bf16 %v2092_v49, %v2091_v44 }
 0x239   : > { %2325 = vmatmul.bf16.gmra.mxu1 %v2094_v48  ;;  %2344 = vmatmul.bf16.gmra.mxu2 %v2094_v48 }
 0x23a   : > { %2363 = vmatmul.bf16.gmra.mxu3 %v2094_v48 }
 0x249   : > { %2382 = vmatmul.bf16.vlgmr.msra.gmra.mxu1 %v2094_v48 }
 0x2a6   : > { %v2321_v59 = vpop.f32.mrf.mxu1 }
 0x2a7   : > { %v2322_v51 = vadd.f32 %v2321_v59, %v4286_v55  ;;  %v2378_v10 = vpop.f32.mrf.mxu0 }
 0x2a8   : > { %v2379_v24 = vadd.f32 %v2378_v10, %v4289_v56 }
 0x2a9   : > { %v2388_v40 = vadd.f32 %v2322_v51, %v2127_v57  ;;  %v2140_v51 = vunpack.c.h.bf16 %v4006_v8 }
 0x2aa   : > { %v2391_v21 = vadd.f32 %v2379_v24, %v2130_v63  ;;  %v2141_v24 = vunpack.c.l.bf16 %v4009_v9 }
 0x2ab   : > { %v2404_v39 = vmax.f32 %v2388_v40, 0.0 }
 0x2ac   : > { %v2407_v27 = vmax.f32 %v2391_v21, 0.0  ;;  %v2340_v17 = vpop.f32.mrf.mxu2  ;;  %v2138_v21 = vunpack.c.h.bf16 %v4003_v7  ;;  %v2142_v7 = vunpack.c.h.bf16 %v4009_v9 }
 0x2ad   : > { %2420 = vst [vmem:[%s4109_s23] sm:$0xff] %v2404_v39  ;;  %v2341_v13 = vadd.f32 %v2340_v17, %v4296_v12  ;;  %v2359_v62 = vpop.f32.mrf.mxu3 }
 0x2ae   : > { %2423 = vst [vmem:[%s4109_s23 + $0x18] sm:$0xff] %v2407_v27  ;;  %v2360_v54 = vadd.f32 %v2359_v62, %v4299_v23  ;;  %v2323_v1 = vpop.f32.mrf.mxu1 }
 0x2af   : > { %v2389_v15 = vadd.f32 %v2341_v13, %v2128_v11  ;;  %v2324_v2 = vadd.f32 %v2323_v1, %v4286_v55  ;;  %v2380_v18 = vpop.f32.mrf.mxu0 }
 0x2b0   : > { %v2390_v3 = vadd.f32 %v2360_v54, %v2129_v52  ;;  %v2381_v41 = vadd.f32 %v2380_v18, %v4289_v56 }
 0x2b1   : > { %v2405_v60 = vmax.f32 %v2389_v15, 0.0  ;;  %v2392_v34 = vadd.f32 %v2324_v2, %v2131_v58 }
 0x2b2   : > { %v2406_v19 = vmax.f32 %v2390_v3, 0.0  ;;  %v2395_v14 = vadd.f32 %v2381_v41, %v2134_v16 }
 0x2b3   : > { %2421 = vst [vmem:[%s4109_s23 + $0x8] sm:$0xff] %v2405_v60  ;;  %v2408_v25 = vmax.f32 %v2392_v34, 0.0 }
 0x2b4   : > { %2422 = vst [vmem:[%s4109_s23 + $0x10] sm:$0xff] %v2406_v19  ;;  %v2411_v42 = vmax.f32 %v2395_v14, 0.0  ;;  %v2342_v61 = vpop.f32.mrf.mxu2 }
 0x2b5   : > { %2424 = vst [vmem:[%s4109_s23 + $0x20] sm:$0xff] %v2408_v25  ;;  %v2343_v0 = vadd.f32 %v2342_v61, %v4296_v12  ;;  %v2361_v30 = vpop.f32.mrf.mxu3 }
 0x2b6   : > { %2427 = vst [vmem:[%s4109_s23 + $0x38] sm:$0xff] %v2411_v42  ;;  %v2362_v31 = vadd.f32 %v2361_v30, %v4299_v23  ;;  %v2326_v29 = vpop.f32.mrf.mxu1 }
 0x2b7   : > { %v2393_v32 = vadd.f32 %v2343_v0, %v2132_v26  ;;  %v2327_v4 = vadd.f32 %v2326_v29, %v4286_v55 }
 0x2b8   : > { %v2394_v53 = vadd.f32 %v2362_v31, %v2133_v28 }
 0x2b9   : > { %v2409_v33 = vmax.f32 %v2393_v32, 0.0  ;;  %v2396_v35 = vadd.f32 %v2327_v4, %v2135_v50 }
 0x2ba   : > { %v2410_v20 = vmax.f32 %v2394_v53, 0.0 }
 0x2bb   : > { %2425 = vst [vmem:[%s4109_s23 + $0x28] sm:$0xff] %v2409_v33  ;;  %v2412_v5 = vmax.f32 %v2396_v35, 0.0 }
 0x2bc   : > { %2426 = vst [vmem:[%s4109_s23 + $0x30] sm:$0xff] %v2410_v20  ;;  %v2345_v43 = vpop.f32.mrf.mxu2 }
 0x2bd   : > { %2428 = vst [vmem:[%s4109_s23 + $0x40] sm:$0xff] %v2412_v5  ;;  %v2346_v37 = vadd.f32 %v2345_v43, %v4296_v12  ;;  %v2364_v45 = vpop.f32.mrf.mxu3 }
 0x2be   : > { %v2365_v46 = vadd.f32 %v2364_v45, %v4299_v23  ;;  %v2328_v47 = vpop.f32.mrf.mxu1 }
 0x2bf   : > { %v2397_v44 = vadd.f32 %v2346_v37, %v2136_v36  ;;  %v2329_v6 = vadd.f32 %v2328_v47, %v4286_v55 }
 0x2c0   : > { %v2398_v49 = vadd.f32 %v2365_v46, %v2137_v22 }
 0x2c1   : > { %v2413_v48 = vmax.f32 %v2397_v44, 0.0  ;;  %v2400_v57 = vadd.f32 %v2329_v6, %v2139_v38 }
 0x2c2   : > { %v2414_v59 = vmax.f32 %v2398_v49, 0.0 }
 0x2c3   : > { %2429 = vst [vmem:[%s4109_s23 + $0x48] sm:$0xff] %v2413_v48  ;;  %v2416_v63 = vmax.f32 %v2400_v57, 0.0 }
 0x2c4   : > { %2430 = vst [vmem:[%s4109_s23 + $0x50] sm:$0xff] %v2414_v59  ;;  %v2347_v10 = vpop.f32.mrf.mxu2 }
 0x2c5   : > { %2432 = vst [vmem:[%s4109_s23 + $0x60] sm:$0xff] %v2416_v63  ;;  %v2348_v40 = vadd.f32 %v2347_v10, %v4296_v12  ;;  %v2366_v55 = vpop.f32.mrf.mxu3 }
 0x2c6   : > { %v2367_v39 = vadd.f32 %v2366_v55, %v4299_v23  ;;  %v2383_v11 = vpop.f32.mrf.mxu1 }
 0x2c7   : > { %v2401_v8 = vadd.f32 %v2348_v40, %v2140_v51  ;;  %v2384_v27 = vadd.f32 %v2383_v11, %v4289_v56 }
 0x2c8   : > { %v2402_v17 = vadd.f32 %v2367_v39, %v2141_v24 }
 0x2c9   : > { %v2417_v52 = vmax.f32 %v2401_v8, 0.0  ;;  %v2399_v13 = vadd.f32 %v2384_v27, %v2138_v21 }
 0x2ca   : > { %v2418_v62 = vmax.f32 %v2402_v17, 0.0 }
 0x2cb   : > { %2433 = vst [vmem:[%s4109_s23 + $0x68] sm:$0xff] %v2417_v52  ;;  %v2415_v12 = vmax.f32 %v2399_v13, 0.0 }
 0x2cc   : > { %2434 = vst [vmem:[%s4109_s23 + $0x70] sm:$0xff] %v2418_v62 }
 0x2cd   : > { %2431 = vst [vmem:[%s4109_s23 + $0x58] sm:$0xff] %v2415_v12 }
 0x2ce   : > { %v2385_v23 = vpop.f32.mrf.mxu1 }
 0x2cf   : > { %v2386_v58 = vadd.f32 %v2385_v23, %v4289_v56 }
 0x2d1   : > { %v2403_v54 = vadd.f32 %v2386_v58, %v2142_v7 }
 0x2d3   : > { %v2419_v1 = vmax.f32 %v2403_v54, 0.0 }
 0x2d5   : > { %2435 = vst [vmem:[%s4109_s23 + $0x78] sm:$0xff] %v2419_v1 }
 0x2d6   : > { %3707 = shalt.err (!%p3704_p4)
}
 0x2d7   : > { %s3798_s13 = smov 512   ;;  %s3799_s26 = smov 32  }
 0x2d8   : > { %3420 = dma.vmem_to_hbm [thread:$0]  (%p3940_p2), %s2453_s14, 2048, %s2455_s1, %s2437_s16, %s3798_s13, %s3798_s13, %s3799_s26  }
 0x2d9 PF: > { %s4439_s10 = sld [smem:[#allocation19_spill]] }
 0x2da   : > { %s4440_s4 = sld [smem:[#allocation17_spill]] }
 0x2df   : > { %p3452_p6 = scmp.ge.s32.totalorder %s4439_s10, 2 }
 0x2e0   : > { %s2469_s18 = sand.u32 1, %s4440_s4  }
 0x2e1   : > { %p3440_p8 = pnand %p3452_p6, %p3887_p5  ;;  %s2470_s23 = scalar_lea.sflag [#allocation5], %s2469_s18 }
 0x2e3   : > { %p3441_p9 = pneg %p3440_p8 }
 0x2e5   : > { %3753 = dma.done.wait (%p3441_p9), %s2470_s23, 2048  }
 0x2e6   : > { %3755 = vsyncadd (%p3441_p9), %s2470_s23, 4294965248  ;;  %s23_s25 = sadd.s32 1, %s4439_s10   ;;  %s4442_s21 = sld [smem:[#allocation18_spill]] }
 0x2e7   : > { %p20_p1 = scmp.ge.s32.totalorder %s23_s25, 6   ;;  %s4443_s23 = sld [smem:[#allocation21_spill]] }
 0x2e8   : > { %s4444_s3 = sld [smem:[#allocation22_spill]]  ;;  %s4445_s18 = smov %s3762_s19 }
 0x2e9   : > { %s4446_s19 = smov %s3766_s20  ;;  %s4447_s20 = smov %s3953_s7 }
 0x2ea   : > { %s4448_s22 = smov %s3782_s24  ;;  %22 = sbr.rel (!%p20_p1) target bundleno = 14 (0xe), region = 120 }
 0x2ee   : > { %s4449_s24 = smov %s4444_s3 }
 0x2ef   :  { %2476 = vsyncpa [#allocation4], 1 }
 0x2f0   :  { %2478 = vsyncpa [#allocation4 + $0x1], 1 }
 0x2f1   :  { %2479 = vsyncpa [#allocation7], 1 }
 0x2f2   :  { %2480 = vsyncpa [#allocation10], 1 }
 0x2f3   :  { %2481 = vsyncpa [#allocation5], 1 }
 0x2f4   :  { %2483 = vsyncpa [#allocation5 + $0x1], 1 }

</bundles_post_ra>
